<compile_context>
chip_gen: v5e
topology: v5e:2x2
jax: 0.10.0
libtpu: 0.0.40
codegen_flags: <defaults>
</compile_context>

<pallas_src>
import jax
import jax.numpy as jnp
from jax import lax
from jax.experimental import pallas as pl
from jax.experimental.pallas import tpu as pltpu

LANE = 128   # Cout (and the streamed conv1's Cin) are handled in multiples of this.


# ---------------------------------------------------------------------------
# In-kernel helpers
# ---------------------------------------------------------------------------
def _shift_w(x, direction):
    """Shift a (B, H, W, C) tensor by one column along W, zero-filling the border.

    direction=+1: out[..., x, :] = in[..., x-1, :]   (kw = 0 tap)
    direction=-1: out[..., x, :] = in[..., x+1, :]   (kw = 2 tap)
    """
    b, h, w, c = x.shape
    zero = jnp.zeros((b, h, 1, c), x.dtype)
    if direction > 0:
        return jnp.concatenate([zero, x[:, :, :w - 1, :]], axis=2)
    return jnp.concatenate([x[:, :, 1:, :], zero], axis=2)


def _conv3x3_bn_relu(y, w, shift):
    """3x3 same-padding conv+BN-shift+ReLU as ONE MXU matmul (in-kernel im2col).

    y:      (bn, H, W, C)   bf16 activations, C a multiple of 128
    w:      (9*C, Cout)     bf16 weights, rows ordered (kh, kw, cin); BN scale folded
    shift:  (1, Cout)       f32 additive BN shift
    returns (bn*H*W, Cout)  f32 post-ReLU activations
    """
    bn, H, W, C = y.shape
    left = _shift_w(y, +1)                                   # input at x-1 (kw = 0)
    right = _shift_w(y, -1)                                  # input at x+1 (kw = 2)
    wide = jnp.concatenate([left, y, right], axis=-1)        # (bn, H, W, 3C), lane-aligned
    zrow = jnp.zeros((bn, 1, W, 3 * C), wide.dtype)
    widep = jnp.concatenate([zrow, wide, zrow], axis=1)      # pad H (untiled axis) — cheap
    # Fold the 3 kh taps into the lane/K axis too: single matmul, single MXU drain.
    patches = jnp.concatenate([widep[:, dy:dy + H] for dy in range(3)], axis=-1)
    patches = patches.reshape(bn * H * W, 9 * C)             # layout-preserving (W % 8 == 0)
    acc = jnp.dot(patches, w, preferred_element_type=jnp.float32)
    return jnp.maximum(acc + shift, 0.0)


def _make_kernel(bn, H, W, Cp, stream_conv1):
    """Fused conv1 -> conv2 -> 2x2 maxpool over a block of `bn` images."""
    def kernel(x_ref, w1_ref, b1_ref, w2_ref, b2_ref, out_ref):
        # ---- conv1_ll ----
        if stream_conv1:
            # Raw NHWC bf16 block streamed straight from HBM; taps folded in-kernel.
            y1 = _conv3x3_bn_relu(x_ref[...], w1_ref[...], b1_ref[...])
        else:
            # Wrapper-built im2col patches (tiny-Cin blocks): one MXU matmul.
            y1 = jnp.maximum(
                jnp.dot(x_ref[...], w1_ref[...], preferred_element_type=jnp.float32)
                + b1_ref[...], 0.0)
        # bf16 right after the ReLU: all conv2 prep copies move half the bytes.
        y1 = y1.astype(jnp.bfloat16).reshape(bn, H, W, Cp)

        # ---- conv2 ----
        y2 = _conv3x3_bn_relu(y1, w2_ref[...], b2_ref[...]).reshape(bn, H, W, Cp)
        # TODO(synk): conv_more=True configurations add one more _conv3x3_bn_relu here.

        # ---- 2x2 max-pool, stride 2 (VPU maximums over views) ----
        y2 = y2.reshape(bn, H // 2, 2, W, Cp)
        hmax = jnp.maximum(y2[:, :, 0, :, :], y2[:, :, 1, :, :])
        hmax = hmax.reshape(bn, H // 2, W // 2, 2, Cp)
        pooled = jnp.maximum(hmax[:, :, :, 0, :], hmax[:, :, :, 1, :])

        out_ref[...] = pooled.astype(out_ref.dtype)          # lane-dense bf16 store
    return kernel


# ---------------------------------------------------------------------------
# Per-generation sizing
# ---------------------------------------------------------------------------
def _pick_block_n(N, H, W, max_rows=4096):
    """Largest per-step batch block that (a) divides N, (b) keeps >= 2 grid steps when
    N >= 2 (v7x has 2 TensorCores), (c) bounds the matmul M dim so the live VMEM set
    fits every generation (64 MiB/TC on v7x)."""
    divisors = [d for d in range(1, N + 1) if N % d == 0]
    usable = [d for d in divisors if N // d >= 2] or [divisors[0]]
    fitting = [d for d in usable if d * H * W <= max_rows] or [usable[0]]
    return max(fitting)


def _pick_vmem_limit_bytes():
    """~3/4 of physical VMEM (128 MiB on v5e/v6e, 64 MiB/TC on v7x); safe fallback."""
    try:
        cap = int(pltpu.get_tpu_info().vmem_capacity_bytes)
        return max(32 << 20, min(3 * cap // 4, 100 << 20))
    except Exception:
        return 48 << 20


# ---------------------------------------------------------------------------
# Wrapper
# ---------------------------------------------------------------------------
def wavelet_vgg_block2(inputs, params, *, block_n=None):
    """inputs: (ll, lh, hl, hh), each (N, Cin, H, W) f32 NCHW; only ll is used.

    Returns (N, Cout, H//2, W//2) f32 NCHW, matching WaveletVGGBlock2.forward
    (conv_more=False, BatchNorm in inference mode).
    """
    ll = inputs[0]                      # lh/hl/hh accepted but unused (PyTorch parity)
    w1p, b1p, w2p, b2p, cout = params
    N, Cin, H, W = ll.shape
    assert H % 2 == 0 and W % 2 == 0 and W % 8 == 0
    K1, Cp = w1p.shape
    assert K1 == 9 * Cin and w2p.shape == (9 * Cp, Cp)

    if block_n is None:
        block_n = _pick_block_n(N, H, W)
    assert N % block_n == 0

    # NCHW -> NHWC bf16 (halves HBM->VMEM traffic; MXU-native operand).
    x = jnp.transpose(ll, (0, 2, 3, 1)).astype(jnp.bfloat16)

    stream_conv1 = (Cin % LANE == 0)
    if stream_conv1:
        # Deeper blocks: stream the raw activation block (no 9x im2col HBM blow-up).
        conv1_in = x
        conv1_spec = pl.BlockSpec((block_n, H, W, Cin), lambda n: (n, 0, 0, 0))
    else:
        # Tiny-Cin first block: wrapper im2col (negligible absolute cost) keeps every
        # in-kernel lane concat 128-aligned.  Tap order (kh, kw, cin).
        # TODO(synk): for half-lane Cin (e.g. 64) a channel-padded streaming path
        # would cut conv1 input traffic further; not needed for this block.
        xp = jnp.pad(x, ((0, 0), (1, 1), (1, 1), (0, 0)))
        taps = [xp[:, dy:dy + H, dx:dx + W, :] for dy in range(3) for dx in range(3)]
        conv1_in = jnp.concatenate(taps, axis=-1).reshape(N * H * W, K1)
        conv1_spec = pl.BlockSpec((block_n * H * W, K1), lambda n: (n, 0))

    flops = 2 * N * H * W * Cp * (9 * Cin + 9 * Cp)
    bytes_accessed = (conv1_in.size * conv1_in.dtype.itemsize
                      + w1p.size * 2 + w2p.size * 2 + b1p.size * 4 + b2p.size * 4
                      + N * (H // 2) * (W // 2) * Cp * 2)

    out = pl.pallas_call(
        _make_kernel(block_n, H, W, Cp, stream_conv1),
        out_shape=jax.ShapeDtypeStruct((N, H // 2, W // 2, Cp), jnp.bfloat16),
        grid=(N // block_n,),
        in_specs=[
            conv1_spec,
            pl.BlockSpec((K1, Cp), lambda n: (0, 0)),        # w1 (flat 2-D, resident)
            pl.BlockSpec((1, Cp), lambda n: (0, 0)),         # shift1
            pl.BlockSpec((9 * Cp, Cp), lambda n: (0, 0)),    # w2 (flat 2-D, resident)
            pl.BlockSpec((1, Cp), lambda n: (0, 0)),         # shift2
        ],
        out_specs=pl.BlockSpec((block_n, H // 2, W // 2, Cp),
                               lambda n: (n, 0, 0, 0)),
        compiler_params=pltpu.CompilerParams(
            dimension_semantics=("parallel",),               # megacore-shardable batch axis
            vmem_limit_bytes=_pick_vmem_limit_bytes()),
        cost_estimate=pl.CostEstimate(flops=flops, transcendentals=0,
                                      bytes_accessed=bytes_accessed),
    )(conv1_in, w1p, b1p, w2p, b2p)

    # Drop the lane padding, back to NCHW, f32 for downstream consumers.
    return jnp.transpose(out[..., :cout], (0, 3, 1, 2)).astype(jnp.float32)


# ---------------------------------------------------------------------------
# Parameter prep (BN folding) and pure-JAX reference
# ---------------------------------------------------------------------------
def _fold_bn(conv_b, gamma, beta, mean, var, eps=1e-5):
    scale = gamma / jnp.sqrt(var + eps)
    shift = (conv_b - mean) * scale + beta
    return scale, shift


def _prepare_params(w1, b1, bn1, w2, b2, bn2, lane=LANE):
    """Fold BN into the convs, pad Cout to the lane width, pack for the kernel.

    w1: (3,3,Cin,Cout) HWIO; w2: (3,3,Cout,Cout); bn* = (gamma, beta, mean, var).
    Returns (kernel_params, reference_params) with matched bf16 quantization.
    """
    Cin, Cout = w1.shape[2], w1.shape[3]
    # In the real WaveletVGG3 these blocks have Cout in {128, 256, 512}, so this pad is
    # a no-op there.  TODO(synk): for small-Cout toy blocks, pack spatial columns into
    # the lane axis instead of padding to avoid wasted MXU K-depth / output bandwidth.
    Cp = ((Cout + lane - 1) // lane) * lane

    s1, sh1 = _fold_bn(b1, *bn1)
    s2, sh2 = _fold_bn(b2, *bn2)
    w1f = (w1 * s1).astype(jnp.bfloat16)            # BN scale folded into producing conv
    w2f = (w2 * s2).astype(jnp.bfloat16)

    # Zero-pad output (and conv2 input) channels so the kernel is lane-dense; padded
    # weight columns AND padded shift entries are zero -> padded lanes stay exactly 0.
    w1p = jnp.zeros((3, 3, Cin, Cp), jnp.bfloat16).at[:, :, :, :Cout].set(w1f)
    w2p = jnp.zeros((3, 3, Cp, Cp), jnp.bfloat16).at[:, :, :Cout, :Cout].set(w2f)
    b1p = jnp.zeros((1, Cp), jnp.float32).at[0, :Cout].set(sh1)
    b2p = jnp.zeros((1, Cp), jnp.float32).at[0, :Cout].set(sh2)

    kernel_params = (w1p.reshape(9 * Cin, Cp), b1p,
                     w2p.reshape(9 * Cp, Cp), b2p, Cout)
    ref_params = (w1f.astype(jnp.float32), sh1, w2f.astype(jnp.float32), sh2)
    return kernel_params, ref_params


def _reference(ll, ref_params):
    """Pure-JAX reference with matched bf16 quantization points."""
    w1, sh1, w2, sh2 = ref_params
    dn = ('NHWC', 'HWIO', 'NHWC')
    x = jnp.transpose(ll, (0, 2, 3, 1))
    xq = x.astype(jnp.bfloat16).astype(jnp.float32)           # kernel casts input to bf16
    y = lax.conv_general_dilated(xq, w1, (1, 1), [(1, 1), (1, 1)],
                                 dimension_numbers=dn, precision=lax.Precision.HIGHEST)
    y = jnp.maximum(y + sh1, 0.0)
    yq = y.astype(jnp.bfloat16).astype(jnp.float32)           # kernel feeds bf16 into conv2
    y = lax.conv_general_dilated(yq, w2, (1, 1), [(1, 1), (1, 1)],
                                 dimension_numbers=dn, precision=lax.Precision.HIGHEST)
    y = jnp.maximum(y + sh2, 0.0)
    N, H, W, C = y.shape
    y = jnp.max(y.reshape(N, H // 2, 2, W // 2, 2, C), axis=(2, 4))
    y = y.astype(jnp.bfloat16).astype(jnp.float32)            # kernel stores bf16 output
    return jnp.transpose(y, (0, 3, 1, 2))


def _init_raw_params(key, Cin, Cout):
    ks = jax.random.split(key, 12)
    w1 = jax.random.normal(ks[0], (3, 3, Cin, Cout), jnp.float32) * 0.1
    b1 = jax.random.normal(ks[1], (Cout,), jnp.float32) * 0.1
    bn1 = (1.0 + 0.1 * jax.random.normal(ks[2], (Cout,), jnp.float32),
           0.1 * jax.random.normal(ks[3], (Cout,), jnp.float32),
           0.1 * jax.random.normal(ks[4], (Cout,), jnp.float32),
           1.0 + 0.1 * jax.random.uniform(ks[5], (Cout,), jnp.float32))
    w2 = jax.random.normal(ks[6], (3, 3, Cout, Cout), jnp.float32) * 0.1
    b2 = jax.random.normal(ks[7], (Cout,), jnp.float32) * 0.1
    bn2 = (1.0 + 0.1 * jax.random.normal(ks[8], (Cout,), jnp.float32),
           0.1 * jax.random.normal(ks[9], (Cout,), jnp.float32),
           0.1 * jax.random.normal(ks[10], (Cout,), jnp.float32),
           1.0 + 0.1 * jax.random.uniform(ks[11], (Cout,), jnp.float32))
    return w1, b1, bn1, w2, b2, bn2


# ---------------------------------------------------------------------------
# Self-test
# ---------------------------------------------------------------------------
if __name__ == "__main__":
    def run_case(key, N, Cin, Cout, H, W, tol):
        k_ll, k_lh, k_hl, k_hh, k_p = jax.random.split(key, 5)
        ll = jax.random.normal(k_ll, (N, Cin, H, W), jnp.float32)
        lh = jax.random.normal(k_lh, (N, Cin, H, W), jnp.float32)
        hl = jax.random.normal(k_hl, (N, Cin, H, W), jnp.float32)
        hh = jax.random.normal(k_hh, (N, Cin, H, W), jnp.float32)
        kernel_params, ref_params = _prepare_params(*_init_raw_params(k_p, Cin, Cout))

        inputs = (ll, lh, hl, hh)       # lh/hl/hh unused, exactly like the PyTorch forward
        out = wavelet_vgg_block2(inputs, kernel_params)
        out = jax.block_until_ready(out)

        ref = _reference(ll, ref_params)
        assert out.shape == (N, Cout, H // 2, W // 2), out.shape
        max_err = float(jnp.max(jnp.abs(out - ref)))
        assert jnp.allclose(out, ref, rtol=tol, atol=tol), max_err

    key = jax.random.PRNGKey(0)
    k1, k2 = jax.random.split(key)
    # First wavelet block style (tiny Cin): conv1 via wrapper im2col path.
    run_case(k1, N=2, Cin=4, Cout=8, H=16, W=16, tol=1e-2)
    # Deeper-block style (lane-scale Cin): conv1 streamed, fully in-kernel im2col path.
    run_case(k2, N=2, Cin=128, Cout=128, H=8, W=8, tol=2e-2)

    print("KERNEL_OK")
</pallas_src>

<mosaic_0001>
module attributes {stable_mosaic.version = 11 : i64} {
  func.func @kernel(%arg0: i32, %arg1: memref<256x36xbf16, #tpu.memory_space<vmem>>, %arg2: memref<36x128xbf16, #tpu.memory_space<vmem>>, %arg3: memref<1x128xf32, #tpu.memory_space<vmem>>, %arg4: memref<1152x128xbf16, #tpu.memory_space<vmem>>, %arg5: memref<1x128xf32, #tpu.memory_space<vmem>>, %arg6: memref<1x8x8x128xbf16, #tpu.memory_space<vmem>>) attributes {dimension_semantics = [#tpu.dimension_semantics<parallel>], iteration_bounds = array<i64: 2>, scalar_prefetch = 0 : i64, scratch_operands = 0 : i64, tpu.core_type = #tpu.core_type<tc>, window_params = [{transform_indices = @transform_0, window_bounds = array<i64: 256, 36>}, {pipeline_mode = #tpu.pipeline_mode<synchronous>, transform_indices = @transform_1, window_bounds = array<i64: 36, 128>}, {pipeline_mode = #tpu.pipeline_mode<synchronous>, transform_indices = @transform_2, window_bounds = array<i64: 1, 128>}, {pipeline_mode = #tpu.pipeline_mode<synchronous>, transform_indices = @transform_3, window_bounds = array<i64: 1152, 128>}, {pipeline_mode = #tpu.pipeline_mode<synchronous>, transform_indices = @transform_4, window_bounds = array<i64: 1, 128>}, {transform_indices = @transform_5, window_bounds = array<i64: 1, 8, 8, 128>}]} {
    %c0 = arith.constant 0 : index
    %c0_0 = arith.constant 0 : index
    %0 = vector.load %arg1[%c0, %c0_0] : memref<256x36xbf16, #tpu.memory_space<vmem>>, vector<256x36xbf16>
    %c0_1 = arith.constant 0 : index
    %c0_2 = arith.constant 0 : index
    %1 = vector.load %arg2[%c0_1, %c0_2] : memref<36x128xbf16, #tpu.memory_space<vmem>>, vector<36x128xbf16>
    %cst = arith.constant dense<0.000000e+00> : vector<256x128xf32>
    %2 = tpu.matmul %0, %1, %cst {dimension_numbers = #tpu.dot_dimension_numbers<[1], [0], [0], [1], [0, 0, 1, 1], [], []>} : vector<256x36xbf16>, vector<36x128xbf16>, vector<256x128xf32> -> vector<256x128xf32>
    %c0_3 = arith.constant 0 : index
    %c0_4 = arith.constant 0 : index
    %3 = vector.load %arg3[%c0_3, %c0_4] : memref<1x128xf32, #tpu.memory_space<vmem>>, vector<1x128xf32>
    %4 = vector.broadcast %3 : vector<1x128xf32> to vector<256x128xf32>
    %5 = arith.addf %2, %4 : vector<256x128xf32>
    %cst_5 = arith.constant 0.000000e+00 : f32
    %6 = vector.broadcast %cst_5 : f32 to vector<256x128xf32>
    %7 = arith.maximumf %5, %6 : vector<256x128xf32>
    %8 = arith.truncf %7 : vector<256x128xf32> to vector<256x128xbf16>
    %9 = vector.shape_cast %8 : vector<256x128xbf16> to vector<1x16x16x128xbf16>
    %c0_6 = arith.constant 0 : index
    %c0_7 = arith.constant 0 : index
    %10 = vector.load %arg4[%c0_6, %c0_7] : memref<1152x128xbf16, #tpu.memory_space<vmem>>, vector<1152x128xbf16>
    %c0_8 = arith.constant 0 : index
    %c0_9 = arith.constant 0 : index
    %11 = vector.load %arg5[%c0_8, %c0_9] : memref<1x128xf32, #tpu.memory_space<vmem>>, vector<1x128xf32>
    %cst_10 = arith.constant 0.000000e+00 : bf16
    %12 = vector.broadcast %cst_10 : bf16 to vector<1x16x1x128xbf16>
    %13 = vector.extract_strided_slice %9 {offsets = [0, 0, 0, 0], sizes = [1, 16, 15, 128], strides = [1, 1, 1, 1]} : vector<1x16x16x128xbf16> to vector<1x16x15x128xbf16>
    %14 = tpu.concatenate %12, %13 in 2 : vector<1x16x1x128xbf16>, vector<1x16x15x128xbf16> -> vector<1x16x16x128xbf16>
    %cst_11 = arith.constant 0.000000e+00 : bf16
    %15 = vector.broadcast %cst_11 : bf16 to vector<1x16x1x128xbf16>
    %16 = vector.extract_strided_slice %9 {offsets = [0, 0, 1, 0], sizes = [1, 16, 15, 128], strides = [1, 1, 1, 1]} : vector<1x16x16x128xbf16> to vector<1x16x15x128xbf16>
    %17 = tpu.concatenate %16, %15 in 2 : vector<1x16x15x128xbf16>, vector<1x16x1x128xbf16> -> vector<1x16x16x128xbf16>
    %18 = tpu.concatenate %14, %9, %17 in 3 : vector<1x16x16x128xbf16>, vector<1x16x16x128xbf16>, vector<1x16x16x128xbf16> -> vector<1x16x16x384xbf16>
    %cst_12 = arith.constant 0.000000e+00 : bf16
    %19 = vector.broadcast %cst_12 : bf16 to vector<1x1x16x384xbf16>
    %20 = tpu.concatenate %19, %18, %19 in 1 : vector<1x1x16x384xbf16>, vector<1x16x16x384xbf16>, vector<1x1x16x384xbf16> -> vector<1x18x16x384xbf16>
    %21 = vector.extract_strided_slice %20 {offsets = [0, 0, 0, 0], sizes = [1, 16, 16, 384], strides = [1, 1, 1, 1]} : vector<1x18x16x384xbf16> to vector<1x16x16x384xbf16>
    %22 = vector.extract_strided_slice %20 {offsets = [0, 1, 0, 0], sizes = [1, 16, 16, 384], strides = [1, 1, 1, 1]} : vector<1x18x16x384xbf16> to vector<1x16x16x384xbf16>
    %23 = vector.extract_strided_slice %20 {offsets = [0, 2, 0, 0], sizes = [1, 16, 16, 384], strides = [1, 1, 1, 1]} : vector<1x18x16x384xbf16> to vector<1x16x16x384xbf16>
    %24 = tpu.concatenate %21, %22, %23 in 3 : vector<1x16x16x384xbf16>, vector<1x16x16x384xbf16>, vector<1x16x16x384xbf16> -> vector<1x16x16x1152xbf16>
    %25 = vector.shape_cast %24 : vector<1x16x16x1152xbf16> to vector<256x1152xbf16>
    %cst_13 = arith.constant dense<0.000000e+00> : vector<256x128xf32>
    %26 = tpu.matmul %25, %10, %cst_13 {dimension_numbers = #tpu.dot_dimension_numbers<[1], [0], [0], [1], [0, 0, 1, 1], [], []>} : vector<256x1152xbf16>, vector<1152x128xbf16>, vector<256x128xf32> -> vector<256x128xf32>
    %27 = vector.broadcast %11 : vector<1x128xf32> to vector<256x128xf32>
    %28 = arith.addf %26, %27 : vector<256x128xf32>
    %cst_14 = arith.constant 0.000000e+00 : f32
    %29 = vector.broadcast %cst_14 : f32 to vector<256x128xf32>
    %30 = arith.maximumf %28, %29 : vector<256x128xf32>
    %31 = vector.shape_cast %30 : vector<256x128xf32> to vector<1x16x16x128xf32>
    %32 = vector.shape_cast %31 : vector<1x16x16x128xf32> to vector<1x8x2x16x128xf32>
    %33 = vector.extract_strided_slice %32 {offsets = [0, 0, 0, 0, 0], sizes = [1, 8, 1, 16, 128], strides = [1, 1, 1, 1, 1]} : vector<1x8x2x16x128xf32> to vector<1x8x1x16x128xf32>
    %34 = vector.shape_cast %33 : vector<1x8x1x16x128xf32> to vector<1x8x16x128xf32>
    %35 = vector.extract_strided_slice %32 {offsets = [0, 0, 1, 0, 0], sizes = [1, 8, 1, 16, 128], strides = [1, 1, 1, 1, 1]} : vector<1x8x2x16x128xf32> to vector<1x8x1x16x128xf32>
    %36 = vector.shape_cast %35 : vector<1x8x1x16x128xf32> to vector<1x8x16x128xf32>
    %37 = arith.maximumf %34, %36 : vector<1x8x16x128xf32>
    %38 = vector.shape_cast %37 : vector<1x8x16x128xf32> to vector<1x8x8x2x128xf32>
    %39 = vector.extract_strided_slice %38 {offsets = [0, 0, 0, 0, 0], sizes = [1, 8, 8, 1, 128], strides = [1, 1, 1, 1, 1]} : vector<1x8x8x2x128xf32> to vector<1x8x8x1x128xf32>
    %40 = vector.shape_cast %39 : vector<1x8x8x1x128xf32> to vector<1x8x8x128xf32>
    %41 = vector.extract_strided_slice %38 {offsets = [0, 0, 0, 1, 0], sizes = [1, 8, 8, 1, 128], strides = [1, 1, 1, 1, 1]} : vector<1x8x8x2x128xf32> to vector<1x8x8x1x128xf32>
    %42 = vector.shape_cast %41 : vector<1x8x8x1x128xf32> to vector<1x8x8x128xf32>
    %43 = arith.maximumf %40, %42 : vector<1x8x8x128xf32>
    %44 = arith.truncf %43 : vector<1x8x8x128xf32> to vector<1x8x8x128xbf16>
    %c0_15 = arith.constant 0 : index
    %c0_16 = arith.constant 0 : index
    %c0_17 = arith.constant 0 : index
    %c0_18 = arith.constant 0 : index
    %45 = vector.load %arg6[%c0_15, %c0_16, %c0_17, %c0_18] : memref<1x8x8x128xbf16, #tpu.memory_space<vmem>>, vector<1x8x8x128xbf16>
    tpu.vector_store %arg6[%c0_15, %c0_16, %c0_17, %c0_18], %44 {strides = array<i32>} : memref<1x8x8x128xbf16, #tpu.memory_space<vmem>>, vector<1x8x8x128xbf16>,
    return
  }
  func.func @transform_0(%arg0: i32) -> (i32, i32) {
    %c0_i32 = arith.constant 0 : i32
    %c0_i32_0 = arith.constant 0 : i32
    return %arg0, %c0_i32 : i32, i32
  }
  func.func @transform_1(%arg0: i32) -> (i32, i32) {
    %c0_i32 = arith.constant 0 : i32
    %c0_i32_0 = arith.constant 0 : i32
    %c0_i32_1 = arith.constant 0 : i32
    return %c0_i32, %c0_i32_0 : i32, i32
  }
  func.func @transform_2(%arg0: i32) -> (i32, i32) {
    %c0_i32 = arith.constant 0 : i32
    %c0_i32_0 = arith.constant 0 : i32
    %c0_i32_1 = arith.constant 0 : i32
    return %c0_i32, %c0_i32_0 : i32, i32
  }
  func.func @transform_3(%arg0: i32) -> (i32, i32) {
    %c0_i32 = arith.constant 0 : i32
    %c0_i32_0 = arith.constant 0 : i32
    %c0_i32_1 = arith.constant 0 : i32
    return %c0_i32, %c0_i32_0 : i32, i32
  }
  func.func @transform_4(%arg0: i32) -> (i32, i32) {
    %c0_i32 = arith.constant 0 : i32
    %c0_i32_0 = arith.constant 0 : i32
    %c0_i32_1 = arith.constant 0 : i32
    return %c0_i32, %c0_i32_0 : i32, i32
  }
  func.func @transform_5(%arg0: i32) -> (i32, i32, i32, i32) {
    %c0_i32 = arith.constant 0 : i32
    %c0_i32_0 = arith.constant 0 : i32
    %c0_i32_1 = arith.constant 0 : i32
    %c0_i32_2 = arith.constant 0 : i32
    return %arg0, %c0_i32, %c0_i32_0, %c0_i32_1 : i32, i32, i32, i32
  }
}

</mosaic_0001>

<bundles_post_ra>
// kernel: tpu_custom_call.1
= control target key start
LH: loop header
LB: loop body
LE: loop exit
PB: predicated region body
PF: predicated region fallthrough
CT: control target
= control target key end

     0   :  { %10 = vsyncpa [#allocation3], 0  ;;  %s5248_s0 = inlined_call_operand.vmem [shape: bf16[512,36], index: 0, kind: input, shape index: {}]   ;;  %s5249_s1 = inlined_call_operand.vmem [shape: bf16[36,128], index: 1, kind: input, shape index: {}]   ;;  %s5250_s2 = inlined_call_operand.vmem [shape: f32[1,128], index: 2, kind: input, shape index: {}]   ;;  %s5251_s3 = inlined_call_operand.hbm [shape: bf16[1152,128], index: 3, kind: input, shape index: {}]   ;;  %s5252_s4 = inlined_call_operand.vmem [shape: f32[1,128], index: 4, kind: input, shape index: {}]   ;;  %s5253_s5 = inlined_call_operand.hbm [shape: bf16[2,8,8,128], index: 5, kind: output, shape index: {}]  }
   0x1   :  { %11 = vsyncpa [#allocation4], 0 }
   0x2   :  { %13 = vsyncpa [#allocation4 + $0x1], 0  ;;  %s3864_s18 = smov 0   ;;  %s3866_s19 = smov 0  }
   0x3   :  { %s3868_s20 = smov 0   ;;  %s3870_s21 = smov 0  }
   0x4 LB: > { %s3885_s22 = sadd.s32 4294967295, %s3826_s21   ;;  %s3117_s23 = sadd.s32 4294967294, %s3826_s21   ;;  %s3826_s21 = sphi %s3870_s21, %s5543_s21   ;;  %s3822_s20 = sphi %s3868_s20, %s5542_s20   ;;  %s3818_s19 = sphi %s3866_s19, %s5541_s19   ;;  %s3814_s18 = sphi %s3864_s18, %s5540_s18  }
   0x5   : > { %s3889_s24 = sadd.s32 1, %s3826_s21   ;;  %s136_s25 = sadd.s32 1, %s3822_s20 }
   0x6   : > { %s133_s26 = ssub.s32 %s3826_s21, %s3889_s24  ;;  %p146_p0 = scmp.ne.s32.totalorder %s3822_s20, %s3818_s19 }
   0x7   : > { %p134_p1 = scmp.eq.s32.totalorder %s133_s26, 0  ;;  %p147_p2 = scmp.eq.s32.totalorder %s3885_s22, 1 }
   0x8   : > { %p152_p3 = scmp.ne.s32.totalorder %s3818_s19, %s3814_s18  ;;  %p153_p4 = scmp.eq.s32.totalorder %s3117_s23, 1 }
   0x9   : > { %s3900_s27 = scalar_select %p134_p1, %s3822_s20, %s136_s25  }
   0xa   : > { %p3902_p5 = por %p147_p2, %p146_p0  ;;  %p3906_p6 = por %p153_p4, %p152_p3 }
   0xb   : > { %p3118_p7 = scmp.ge.s32.totalorder %s3826_s21, 1  ;;  %p160_p8 = scmp.lt.s32.totalorder %s3826_s21, 3 }
   0xc   : > { %p3687_p9 = scmp.eq.s32.totalorder %s3885_s22, 0  ;;  %s177_s7 = sshll.u32 %s5251_s3, 4  ;;  %s178_s7 = int_to_ptr.hbm [resolvable:$true] %s177_s7 }
   0xd   : > { %p161_p10 = pnand %p3118_p7, %p160_p8  ;;  %s3828_s8 = smov [#allocation2]  }
   0xe   : > { %s179_s9 = sshll.u32 %s3828_s8, 4  ;;  %s3829_s10 = smov 64   ;;  %s180_s9 = int_to_ptr.vmem [resolvable:$true] %s179_s9 }
   0xf   : > { %p3679_p11 = pneg %p161_p10  ;;  %s3830_s11 = smov 4  }
  0x10   : > { %207 = sbr.rel (%p161_p10) target bundleno = 1100 (0x44c), region = 40 }
  0x11   : > { %p3680_p12 = pnand %p3687_p9, %p3679_p11 }
  0x13   : > { %3682 = dma.hbm_to_vmem [thread:$0]  (!%p3680_p12), %s178_s7, 9216, %s180_s9, [#allocation3], %s3829_s10, %s3829_s10, %s3830_s11  }
  0x15   : > { %3805 = dma.done.wait (%p3687_p9), [#allocation3], 9216  }
  0x16   : > { %3807 = vsyncadd (%p3687_p9), [#allocation3], 4294958080  ;;  %s3923_s12 = sshll.u32 %s3885_s22, 5  ;;  %v279_v0 = vld [vmem:[%s5249_s1 + $0x10] sm:$0x3]  ;;  %vm428_vm0 = vcmask 1041408  }
  0x17   : > { %p237_p13 = scmp.lt.s32.totalorder %s3923_s12, 63  ;;  %v373_v1 = vunpack.c.l.b16 %v279_v0  ;;  %v3588_v4 = vld [vmem:[%s5249_s1 + $0x8] sm:$0xff]  ;;  %v3587_v5 = vld [vmem:[%s5249_s1] sm:$0xff]  ;;  %vm379_vm1 = vcmask 293888   ;;  %v3596_v16 = vld [vmem:[#allocation2 + $0x38] sm:$0xff]  ;;  %v5254_v41 = vmov 0   ;;  %s3039_s17 = scalar_lea.hbm %s5253_s5, %s3923_s12 }
  0x18   : > { %v3612_v17 = vld [vmem:[#allocation2 + $0xb8] sm:$0xff]  ;;  %1475 = vmatpush.bf16.msra.mxu1 %v3596_v16  ;;  %v3595_v18 = vld [vmem:[#allocation2 + $0x30] sm:$0xff]  ;;  %3665 = vmatpush.bf16.msra.mxu2 %v3596_v16  ;;  %v3594_v22 = vld [vmem:[#allocation2 + $0x28] sm:$0xff]  ;;  %vm938_vm2 = vcmask 1040384   ;;  %vm939_vm3 = vsmask.f32 256 }
  0x19   : > { %v376_v2 = vpack.c.b16 %v373_v1, %v373_v1  ;;  %s238_s15 = scalar_select %p237_p13, %s3923_s12, 63  ;;  %v3611_v19 = vld [vmem:[#allocation2 + $0xb0] sm:$0xff]  ;;  %v3610_v23 = vld [vmem:[#allocation2 + $0xa8] sm:$0xff]  ;;  %v3593_v24 = vld [vmem:[#allocation2 + $0x20] sm:$0xff]  ;;  %vm1005_vm4 = vcmask 1047552   ;;  %vm2885_vm8 = vcmask 1041409  }
  0x1a   : > { %v3609_v25 = vld [vmem:[#allocation2 + $0xa0] sm:$0xff]  ;;  %v3620_v26 = vld [vmem:[#allocation2 + $0xf8] sm:$0xff]  ;;  %v3619_v27 = vld [vmem:[#allocation2 + $0xf0] sm:$0xff]  ;;  %vm1006_vm5 = vsmask.f32 7424  ;;  %vm2888_vm9 = vcmask 1042434  }
  0x1b   : > { %v430_v3 = vsel %vm428_vm0, %v376_v2, 0  ;;  %s3125_s22 = sshll.u32 %s238_s15, 2  ;;  %v3592_v28 = vld [vmem:[#allocation2 + $0x18] sm:$0xff]  ;;  %v3591_v30 = vld [vmem:[#allocation2 + $0x10] sm:$0xff]  ;;  %v3590_v34 = vld [vmem:[#allocation2 + $0x8] sm:$0xff]  ;;  %vm2891_vm10 = vcmask 1043459  }
  0x1c   : > { %437 = vmatpush.bf16.msra.mxu0 %v430_v3  ;;  %3662 = vmatpush.bf16.msra.mxu3 %v430_v3  ;;  %s3939_s6 = scalar_lea.vmem %s5248_s0, %s3125_s22  ;;  %v3608_v29 = vld [vmem:[#allocation2 + $0x98] sm:$0xff]  ;;  %v3607_v31 = vld [vmem:[#allocation2 + $0x90] sm:$0xff]  ;;  %v3606_v35 = vld [vmem:[#allocation2 + $0x88] sm:$0xff]  ;;  %vm2894_vm11 = vcmask 1044484   ;;  %s233_s11 = sand.u32 1, %s3818_s19   ;;  %vm2897_vm12 = vcmask 1045509  }
  0x1d   : > { %v3571_v6 = vld [vmem:[%s3939_s6] sm:$0xff]  ;;  %v3580_v7 = vld [vmem:[%s3939_s6 + $0x48] sm:$0xff]  ;;  %v3581_v9 = vld [vmem:[%s3939_s6 + $0x50] sm:$0xff]  ;;  %1476 = vmatpush.bf16.msra.mxu1 %v3595_v18  ;;  %3666 = vmatpush.bf16.msra.mxu2 %v3595_v18  ;;  %vm2900_vm13 = vcmask 1046534   ;;  %s3123_s13 = sshll.u32 %s233_s11, 5  ;;  %vm2903_vm14 = vcmask 1047559  }
  0x1e   : > { %v3572_v8 = vld [vmem:[%s3939_s6 + $0x8] sm:$0xff]  ;;  %v3573_v10 = vld [vmem:[%s3939_s6 + $0x10] sm:$0xff]  ;;  %v3582_v11 = vld [vmem:[%s3939_s6 + $0x58] sm:$0xff]  ;;  %s4914_s14 = scalar_lea.vmem [#allocation5], %s3123_s13  ;;  %s5212_s23 = sshll.u32 %s3039_s17, 4  ;;  %s3043_s23 = int_to_ptr.hbm [resolvable:$true] %s5212_s23 }
  0x1f   : > { %v3574_v12 = vld [vmem:[%s3939_s6 + $0x18] sm:$0xff]  ;;  %v3583_v13 = vld [vmem:[%s3939_s6 + $0x60] sm:$0xff]  ;;  %v3584_v15 = vld [vmem:[%s3939_s6 + $0x68] sm:$0xff]  ;;  %s3040_s22 = sshll.u32 %s4914_s14, 4  ;;  %s3028_s12 = scalar_lea.sflag [#allocation4], %s233_s11  ;;  %s3041_s22 = int_to_ptr.vmem [resolvable:$true] %s3040_s22 }
  0x20   : > { %438 = vmatpush.bf16.msra.mxu0 %v3588_v4  ;;  %3663 = vmatpush.bf16.msra.mxu3 %v3588_v4  ;;  %v3575_v14 = vld [vmem:[%s3939_s6 + $0x20] sm:$0xff]  ;;  %v3576_v20 = vld [vmem:[%s3939_s6 + $0x28] sm:$0xff]  ;;  %v3585_v21 = vld [vmem:[%s3939_s6 + $0x70] sm:$0xff]  ;;  %s3774_s25 = sshra.s32 %s3043_s23, 4  ;;  %s3780_s7 = scalar_lea.hbm %s5253_s5, 64  ;;  %s3775_s25 = int_to_ptr.hbm [resolvable:$true] %s3774_s25 }
  0x21   : > { %1477 = vmatpush.bf16.msra.mxu1 %v3594_v22  ;;  %3667 = vmatpush.bf16.msra.mxu2 %v3594_v22  ;;  %v3577_v32 = vld [vmem:[%s3939_s6 + $0x30] sm:$0xff]  ;;  %v3586_v33 = vld [vmem:[%s3939_s6 + $0x78] sm:$0xff]  ;;  %v3618_v36 = vld [vmem:[#allocation2 + $0xe8] sm:$0xff]  ;;  %s3776_s26 = scalar_lea.hbm %s3775_s25, 32  ;;  %p3781_p3 = scmp.lt.s32.totalorder %s3775_s25, %s5253_s5 }
  0x22   : > { %v3589_v37 = vld [vmem:[#allocation2] sm:$0xff]  ;;  %v3616_v40 = vld [vmem:[#allocation2 + $0xd8] sm:$0xff]  ;;  %v3615_v42 = vld [vmem:[#allocation2 + $0xd0] sm:$0xff]  ;;  %p3777_p0 = scmp.ne.s32.totalorder %s3775_s25, %s3776_s26  ;;  %p3782_p4 = scmp.lt.s32.totalorder %s3780_s7, %s3776_s26 }
  0x23   : > { %v3605_v38 = vld [vmem:[#allocation2 + $0x80] sm:$0xff]  ;;  %v3578_v43 = vld [vmem:[%s3939_s6 + $0x38] sm:$0xff]  ;;  %v3614_v44 = vld [vmem:[#allocation2 + $0xc8] sm:$0xff] }
  0x24   : > { %439 = vmatpush.bf16.msra.mxu0 %v3587_v5  ;;  %3664 = vmatpush.bf16.msra.mxu3 %v3587_v5  ;;  %v3617_v39 = vld [vmem:[#allocation2 + $0xe0] sm:$0xff]  ;;  %vm3991_vm6 = vmand %vm938_vm2, %vm939_vm3  ;;  %p3778_p1 = pnand %p3777_p0, %p3902_p5  ;;  %p3783_p7 = por %p3782_p4, %p3781_p3 }
  0x25   : > { %1478 = vmatpush.bf16.msra.mxu1 %v3593_v24  ;;  %3668 = vmatpush.bf16.msra.mxu2 %v3593_v24  ;;  %v3613_v45 = vld [vmem:[#allocation2 + $0xc0] sm:$0xff]  ;;  %vm3995_vm7 = vmand %vm1005_vm4, %vm1006_vm5 }
  0x26   : > { %v3976_v46 = vld [vmem:[%s5250_s2] ss:$0 sm:$0xff]  ;;  %p3779_p2 = pneg %p3778_p1 }
  0x27   : > { %3198 = vmatmul.msk.bf16.vlgmr.msra.gmra.mxu0 %vm379_vm1, %v3571_v6  ;;  %3207 = vmatmul.msk.bf16.vlgmr.msra.gmra.mxu3 %vm379_vm1, %v3580_v7  ;;  %v3579_v47 = vld [vmem:[%s3939_s6 + $0x40] sm:$0xff] }
  0x28   : > { %1653 = vmatpush.bf16.msrb.mxu3 %v3612_v17  ;;  %1742 = vmatpush.bf16.msrb.mxu0 %v3620_v26  ;;  %p3784_p8 = pnand %p3783_p7, %p3779_p2 }
  0x29   : > { %1479 = vmatpush.bf16.msra.mxu1 %v3592_v28  ;;  %3669 = vmatpush.bf16.msra.mxu2 %v3592_v28 }
  0x2c   : > { %1654 = vmatpush.bf16.msrb.mxu3 %v3611_v19  ;;  %1743 = vmatpush.bf16.msrb.mxu0 %v3619_v27 }
  0x2d   : > { %1480 = vmatpush.bf16.msra.mxu1 %v3591_v30  ;;  %3670 = vmatpush.bf16.msra.mxu2 %v3591_v30 }
  0x30   : > { %1655 = vmatpush.bf16.msrb.mxu3 %v3610_v23  ;;  %1744 = vmatpush.bf16.msrb.mxu0 %v3618_v36 }
  0x31   : > { %1481 = vmatpush.bf16.msra.mxu1 %v3590_v34  ;;  %3671 = vmatpush.bf16.msra.mxu2 %v3590_v34 }
  0x34   : > { %1656 = vmatpush.bf16.msrb.mxu3 %v3609_v25  ;;  %1745 = vmatpush.bf16.msrb.mxu0 %v3617_v39 }
  0x35   : > { %1482 = vmatpush.bf16.msra.mxu1 %v3589_v37  ;;  %3672 = vmatpush.bf16.msra.mxu2 %v3589_v37 }
  0x37   : > { %3199 = vmatmul.msk.bf16.gmra.mxu0 %vm379_vm1, %v3572_v8  ;;  %3208 = vmatmul.msk.bf16.gmra.mxu3 %vm379_vm1, %v3581_v9 }
  0x38   : > { %1657 = vmatpush.bf16.msrb.mxu3 %v3608_v29  ;;  %1483 = vmatmul.bf16.vlgmr.msra.gmra.mxu1 %v5254_v41 }
  0x39   : > { %1746 = vmatpush.bf16.msrb.mxu0 %v3616_v40 }
  0x3c   : > { %1658 = vmatpush.bf16.msrb.mxu3 %v3607_v31 }
  0x3d   : > { %1747 = vmatpush.bf16.msrb.mxu0 %v3615_v42 }
  0x40   : > { %1659 = vmatpush.bf16.msrb.mxu3 %v3606_v35 }
  0x41   : > { %1748 = vmatpush.bf16.msrb.mxu0 %v3614_v44 }
  0x44   : > { %1660 = vmatpush.bf16.msrb.mxu3 %v3605_v38 }
  0x45   : > { %1749 = vmatpush.bf16.msrb.mxu0 %v3613_v45 }
  0x47   : > { %3200 = vmatmul.msk.bf16.gmra.mxu0 %vm379_vm1, %v3573_v10  ;;  %3209 = vmatmul.msk.bf16.gmra.mxu3 %vm379_vm1, %v3582_v11 }
  0x57   : > { %3201 = vmatmul.msk.bf16.gmra.mxu0 %vm379_vm1, %v3574_v12  ;;  %3210 = vmatmul.msk.bf16.gmra.mxu3 %vm379_vm1, %v3583_v13 }
  0x67   : > { %3202 = vmatmul.msk.bf16.gmra.mxu0 %vm379_vm1, %v3575_v14  ;;  %3211 = vmatmul.msk.bf16.gmra.mxu3 %vm379_vm1, %v3584_v15 }
  0x77   : > { %3203 = vmatmul.msk.bf16.gmra.mxu0 %vm379_vm1, %v3576_v20  ;;  %3212 = vmatmul.msk.bf16.gmra.mxu3 %vm379_vm1, %v3585_v21 }
  0x87   : > { %3204 = vmatmul.msk.bf16.gmra.mxu0 %vm379_vm1, %v3577_v32  ;;  %3213 = vmatmul.msk.bf16.gmra.mxu3 %vm379_vm1, %v3586_v33 }
  0x97   : > { %3205 = vmatmul.msk.bf16.gmra.mxu0 %vm379_vm1, %v3578_v43  ;;  %1661 = vmatmul.bf16.vlgmr.msrb.gmra.mxu3 %v5254_v41 }
  0xa4   : > { %v441_v48 = vpop.f32.mrf.mxu0 }
  0xa5   : > { %v442_v49 = vadd.f32 %v3976_v46, %v441_v48 }
  0xa7   : > { %3206 = vmatmul.msk.bf16.gmra.mxu0 %vm379_vm1, %v3579_v47  ;;  %v521_v51 = vmax.f32 %v442_v49, 0.0 }
  0xa9   : > { %v553_v54 = vpack.c.bf16 %v521_v51, %v521_v51 }
  0xaa   : > { %v3981_v50 = vpop.f32.mrf.mxu3 }
  0xab   : > { %v762_v58 = vunpack.c.l.b16 %v553_v54 }
  0xac   : > { %v443_v52 = vpop.f32.mrf.mxu0 }
  0xad   : > { %v444_v53 = vadd.f32 %v3976_v46, %v443_v52 }
  0xaf   : > { %v522_v55 = vmax.f32 %v444_v53, 0.0 }
  0xb1   : > { %v554_v56 = vpack.c.bf16 %v522_v55, %v522_v55 }
  0xb2   : > { %v3984_v57 = vpop.f32.mrf.mxu3 }
  0xb3   : > { %v763_v59 = vunpack.c.l.b16 %v554_v56 }
  0xb4   : > { %v446_v60 = vpop.f32.mrf.mxu0 }
  0xb5   : > { %v3986_v61 = vpack.c.b16 %v763_v59, %v762_v58  ;;  %v447_v62 = vadd.f32 %v3976_v46, %v446_v60 }
  0xb7   : > { %v811_v63 = vshrl.u32 %v3986_v61, 16  ;;  %v814_v0 = vshll.u32 %v3986_v61, 16  ;;  %v523_v6 = vmax.f32 %v447_v62, 0.0 }
  0xb9   : > { %v813_v1 = vrot.slane %v811_v63, 7  ;;  %v957_v3 = vrot.slane %v814_v0, 1  ;;  %v555_v13 = vpack.c.bf16 %v523_v6, %v523_v6 }
  0xba   : > { %v3999_v5 = vpop.f32.mrf.mxu3 }
  0xbb   : > { %v816_v7 = vor.u32 %v814_v0, %v813_v1  ;;  %v958_v8 = vor.u32 %v957_v3, %v811_v63  ;;  %v764_v17 = vunpack.c.l.b16 %v555_v13 }
  0xbc   : > { %v448_v9 = vpop.f32.mrf.mxu0 }
  0xbd   : > { %v449_v10 = vadd.f32 %v3976_v46, %v448_v9  ;;  %v941_v11 = vsel %vm3991_vm6, 0, %v816_v7  ;;  %v4006_v12 = vsel %vm3995_vm7, %v958_v8, 0 }
  0xbe   : > { %5281 = vst [vmem:[#allocation8_spill] sm:$0xff] %v4006_v12  ;;  %1488 = vmatmul.bf16.gmra.mxu1 %v941_v11  ;;  %1666 = vmatmul.bf16.gmra.mxu3 %v4006_v12 }
  0xbf   : > { %v524_v14 = vmax.f32 %v449_v10, 0.0  ;;  %1750 = vmatmul.bf16.vlgmr.msrb.gmra.mxu0 %v941_v11 }
  0xc1   : > { %v556_v15 = vpack.c.bf16 %v524_v14, %v524_v14 }
  0xc2   : > { %v4009_v16 = vpop.f32.mrf.mxu3 }
  0xc3   : > { %v765_v18 = vunpack.c.l.b16 %v556_v15 }
  0xc4   : > { %v451_v19 = vpop.f32.mrf.mxu0 }
  0xc5   : > { %v4011_v20 = vpack.c.b16 %v765_v18, %v764_v17  ;;  %v452_v21 = vadd.f32 %v3976_v46, %v451_v19 }
  0xc7   : > { %v818_v22 = vshrl.u32 %v4011_v20, 16  ;;  %v821_v23 = vshll.u32 %v4011_v20, 16  ;;  %v525_v27 = vmax.f32 %v452_v21, 0.0 }
  0xc9   : > { %v820_v24 = vrot.slane %v818_v22, 7  ;;  %v959_v25 = vrot.slane %v821_v23, 1  ;;  %v557_v34 = vpack.c.bf16 %v525_v27, %v525_v27 }
  0xca   : > { %v4016_v26 = vpop.f32.mrf.mxu3 }
  0xcb   : > { %v823_v28 = vor.u32 %v821_v23, %v820_v24  ;;  %v960_v29 = vor.u32 %v959_v25, %v818_v22  ;;  %v766_v37 = vunpack.c.l.b16 %v557_v34  ;;  %v3628_v22 = vld [vmem:[#allocation2 + $0x138] sm:$0xff]  ;;  %v497_v41 = vadd.f32 %v3976_v46, %v4016_v26 }
  0xcc   : > { %v453_v30 = vpop.f32.mrf.mxu0  ;;  %1831 = vmatpush.bf16.msrb.mxu1 %v3628_v22  ;;  %v3621_v22 = vld [vmem:[#allocation2 + $0x100] sm:$0xff]  ;;  %v3600_v26 = vld [vmem:[#allocation2 + $0x58] sm:$0xff] }
  0xcd   : > { %v454_v31 = vadd.f32 %v3976_v46, %v453_v30  ;;  %v4021_v32 = vsel %vm3991_vm6, 0, %v823_v28  ;;  %v4025_v33 = vsel %vm3995_vm7, %v960_v29, 0  ;;  %v3627_v28 = vld [vmem:[#allocation2 + $0x130] sm:$0xff] }
  0xce   : > { %1493 = vmatmul.bf16.gmra.mxu1 %v4021_v32  ;;  %1671 = vmatmul.bf16.gmra.mxu3 %v4025_v33 }
  0xcf   : > { %v526_v35 = vmax.f32 %v454_v31, 0.0  ;;  %1755 = vmatmul.bf16.gmra.mxu0 %v4021_v32 }
  0xd0   : > { %1832 = vmatpush.bf16.msrb.mxu1 %v3627_v28 }
  0xd1   : > { %v558_v36 = vpack.c.bf16 %v526_v35, %v526_v35  ;;  %v3626_v35 = vld [vmem:[#allocation2 + $0x128] sm:$0xff] }
  0xd2   : > { %v4030_v39 = vpop.f32.mrf.mxu3 }
  0xd3   : > { %v767_v38 = vunpack.c.l.b16 %v558_v36 }
  0xd4   : > { %v456_v40 = vpop.f32.mrf.mxu0  ;;  %1833 = vmatpush.bf16.msrb.mxu1 %v3626_v35 }
  0xd5   : > { %v4032_v42 = vpack.c.b16 %v767_v38, %v766_v37  ;;  %v457_v43 = vadd.f32 %v3976_v46, %v456_v40 }
  0xd7   : > { %v825_v44 = vshrl.u32 %v4032_v42, 16  ;;  %v828_v45 = vshll.u32 %v4032_v42, 16  ;;  %v527_v49 = vmax.f32 %v457_v43, 0.0 }
  0xd9   : > { %v827_v47 = vrot.slane %v825_v44, 7  ;;  %v961_v48 = vrot.slane %v828_v45, 1  ;;  %v559_v59 = vpack.c.bf16 %v527_v49, %v527_v49 }
  0xda   : > { %v4046_v58 = vpop.f32.mrf.mxu3 }
  0xdb   : > { %v830_v51 = vor.u32 %v828_v45, %v827_v47  ;;  %v962_v52 = vor.u32 %v961_v48, %v825_v44  ;;  %v768_v63 = vunpack.c.l.b16 %v559_v59  ;;  %v3625_v44 = vld [vmem:[#allocation2 + $0x120] sm:$0xff]  ;;  %v3624_v59 = vld [vmem:[#allocation2 + $0x118] sm:$0xff] }
  0xdc   : > { %v458_v53 = vpop.f32.mrf.mxu0  ;;  %1834 = vmatpush.bf16.msrb.mxu1 %v3625_v44 }
  0xdd   : > { %v459_v54 = vadd.f32 %v3976_v46, %v458_v53  ;;  %v4040_v55 = vsel %vm3991_vm6, 0, %v830_v51  ;;  %v4044_v56 = vsel %vm3995_vm7, %v962_v52, 0 }
  0xde   : > { %1498 = vmatmul.bf16.gmra.mxu1 %v4040_v55  ;;  %1676 = vmatmul.bf16.gmra.mxu3 %v4044_v56 }
  0xdf   : > { %v528_v60 = vmax.f32 %v459_v54, 0.0  ;;  %1760 = vmatmul.bf16.gmra.mxu0 %v4040_v55 }
  0xe0   : > { %1835 = vmatpush.bf16.msrb.mxu1 %v3624_v59 }
  0xe1   : > { %v560_v62 = vpack.c.bf16 %v528_v60, %v528_v60 }
  0xe2   : > { %v4056_v9 = vpop.f32.mrf.mxu3 }
  0xe3   : > { %v769_v0 = vunpack.c.l.b16 %v560_v62 }
  0xe4   : > { %v461_v1 = vpop.f32.mrf.mxu0 }
  0xe5   : > { %v4051_v3 = vpack.c.b16 %v769_v0, %v768_v63  ;;  %v462_v6 = vadd.f32 %v3976_v46, %v461_v1  ;;  %v3623_v0 = vld [vmem:[#allocation2 + $0x110] sm:$0xff] }
  0xe6   : > { %1836 = vmatpush.bf16.msrb.mxu1 %v3623_v0 }
  0xe7   : > { %v832_v7 = vshrl.u32 %v4051_v3, 16  ;;  %v835_v8 = vshll.u32 %v4051_v3, 16  ;;  %v529_v13 = vmax.f32 %v462_v6, 0.0 }
  0xe9   : > { %v834_v10 = vrot.slane %v832_v7, 7  ;;  %v963_v11 = vrot.slane %v835_v8, 1  ;;  %v561_v23 = vpack.c.bf16 %v529_v13, %v529_v13 }
  0xea   : > { %v4070_v27 = vpop.f32.mrf.mxu3 }
  0xeb   : > { %v837_v14 = vor.u32 %v835_v8, %v834_v10  ;;  %v964_v15 = vor.u32 %v963_v11, %v832_v7  ;;  %v770_v29 = vunpack.c.l.b16 %v561_v23  ;;  %v3622_v11 = vld [vmem:[#allocation2 + $0x108] sm:$0xff] }
  0xec   : > { %v463_v17 = vpop.f32.mrf.mxu0  ;;  %1837 = vmatpush.bf16.msrb.mxu1 %v3622_v11 }
  0xed   : > { %v464_v18 = vadd.f32 %v3976_v46, %v463_v17  ;;  %v4061_v19 = vsel %vm3991_vm6, 0, %v837_v14  ;;  %v4065_v21 = vsel %vm3995_vm7, %v964_v15, 0 }
  0xee   : > { %1503 = vmatmul.bf16.gmra.mxu1 %v4061_v19  ;;  %1681 = vmatmul.bf16.gmra.mxu3 %v4065_v21 }
  0xef   : > { %v530_v24 = vmax.f32 %v464_v18, 0.0  ;;  %1765 = vmatmul.bf16.gmra.mxu0 %v4061_v19 }
  0xf0   : > { %1838 = vmatpush.bf16.msrb.mxu1 %v3621_v22 }
  0xf1   : > { %v562_v25 = vpack.c.bf16 %v530_v24, %v530_v24 }
  0xf2   : > { %v4077_v49 = vpop.f32.mrf.mxu3 }
  0xf3   : > { %v771_v30 = vunpack.c.l.b16 %v562_v25 }
  0xf4   : > { %v466_v31 = vpop.f32.mrf.mxu0 }
  0xf5   : > { %v4072_v34 = vpack.c.b16 %v771_v30, %v770_v29  ;;  %v467_v36 = vadd.f32 %v3976_v46, %v466_v31 }
  0xf7   : > { %v839_v37 = vshrl.u32 %v4072_v34, 16  ;;  %v842_v38 = vshll.u32 %v4072_v34, 16  ;;  %v531_v45 = vmax.f32 %v467_v36, 0.0 }
  0xf9   : > { %v841_v40 = vrot.slane %v839_v37, 7  ;;  %v965_v43 = vrot.slane %v842_v38, 1  ;;  %v563_v60 = vpack.c.bf16 %v531_v45, %v531_v45 }
  0xfa   : > { %v4093_v10 = vpop.f32.mrf.mxu3 }
  0xfb   : > { %v844_v47 = vor.u32 %v842_v38, %v841_v40  ;;  %v966_v48 = vor.u32 %v965_v43, %v839_v37  ;;  %v772_v1 = vunpack.c.l.b16 %v563_v60 }
  0xfc   : > { %v468_v51 = vpop.f32.mrf.mxu0 }
  0xfd   : > { %v469_v52 = vadd.f32 %v3976_v46, %v468_v51  ;;  %v4082_v53 = vsel %vm3991_vm6, 0, %v844_v47  ;;  %v4086_v54 = vsel %vm3995_vm7, %v966_v48, 0  ;;  %v3604_v47 = vld [vmem:[#allocation2 + $0x78] sm:$0xff] }
  0xfe   : > { %1508 = vmatmul.bf16.gmra.mxu1 %v4082_v53  ;;  %1686 = vmatmul.bf16.gmra.mxu3 %v4086_v54 }
  0xff   : > { %v532_v62 = vmax.f32 %v469_v52, 0.0  ;;  %1770 = vmatmul.bf16.gmra.mxu0 %v4082_v53  ;;  %1564 = vmatpush.bf16.msrb.mxu2 %v3604_v47 }
 0x101   : > { %v564_v63 = vpack.c.bf16 %v532_v62, %v532_v62 }
 0x102   : > { %v4110_v37 = vpop.f32.mrf.mxu3 }
 0x103   : > { %v773_v6 = vunpack.c.l.b16 %v564_v63 }
 0x104   : > { %v471_v7 = vpop.f32.mrf.mxu0 }
 0x105   : > { %v4091_v8 = vpack.c.b16 %v773_v6, %v772_v1  ;;  %v472_v13 = vadd.f32 %v3976_v46, %v471_v7 }
 0x107   : > { %v846_v14 = vshrl.u32 %v4091_v8, 16  ;;  %v849_v15 = vshll.u32 %v4091_v8, 16  ;;  %v533_v23 = vmax.f32 %v472_v13, 0.0 }
 0x109   : > { %v848_v17 = vrot.slane %v846_v14, 7  ;;  %v967_v18 = vrot.slane %v849_v15, 1  ;;  %v565_v35 = vpack.c.bf16 %v533_v23, %v533_v23 }
 0x10a   : > { %v4117_v62 = vpop.f32.mrf.mxu3 }
 0x10b   : > { %v851_v24 = vor.u32 %v849_v15, %v848_v17  ;;  %v968_v25 = vor.u32 %v967_v18, %v846_v14  ;;  %v774_v40 = vunpack.c.l.b16 %v565_v35  ;;  %v3603_v14 = vld [vmem:[#allocation2 + $0x70] sm:$0xff]  ;;  %v4136_v35 = vpop.f32.mrf.mxu1 }
 0x10c   : > { %v473_v28 = vpop.f32.mrf.mxu0  ;;  %1565 = vmatpush.bf16.msrb.mxu2 %v3603_v14 }
 0x10d   : > { %v474_v29 = vadd.f32 %v3976_v46, %v473_v28  ;;  %v4101_v30 = vsel %vm3991_vm6, 0, %v851_v24  ;;  %v4105_v31 = vsel %vm3995_vm7, %v968_v25, 0 }
 0x10e   : > { %1513 = vmatmul.bf16.gmra.mxu1 %v4101_v30  ;;  %1691 = vmatmul.bf16.gmra.mxu3 %v4105_v31 }
 0x10f   : > { %v534_v36 = vmax.f32 %v474_v29, 0.0  ;;  %1775 = vmatmul.bf16.gmra.mxu0 %v4101_v30 }
 0x111   : > { %v566_v38 = vpack.c.bf16 %v534_v36, %v534_v36 }
 0x112   : > { %v4131_v24 = vpop.f32.mrf.mxu3 }
 0x113   : > { %v775_v43 = vunpack.c.l.b16 %v566_v38 }
 0x114   : > { %v476_v44 = vpop.f32.mrf.mxu0 }
 0x115   : > { %v4112_v45 = vpack.c.b16 %v775_v43, %v774_v40  ;;  %v477_v48 = vadd.f32 %v3976_v46, %v476_v44 }
 0x117   : > { %v853_v51 = vshrl.u32 %v4112_v45, 16  ;;  %v856_v52 = vshll.u32 %v4112_v45, 16  ;;  %v535_v63 = vmax.f32 %v477_v48, 0.0 }
 0x119   : > { %v855_v59 = vrot.slane %v853_v51, 7  ;;  %v969_v60 = vrot.slane %v856_v52, 1  ;;  %v567_v15 = vpack.c.bf16 %v535_v63, %v535_v63 }
 0x11b   : > { %v858_v0 = vor.u32 %v856_v52, %v855_v59  ;;  %v970_v1 = vor.u32 %v969_v60, %v853_v51  ;;  %v776_v22 = vunpack.c.l.b16 %v567_v15  ;;  %v487_v51 = vadd.f32 %v3976_v46, %v3981_v50  ;;  %v3602_v50 = vld [vmem:[#allocation2 + $0x68] sm:$0xff] }
 0x11c   : > { %v478_v6 = vpop.f32.mrf.mxu0  ;;  %v489_v52 = vadd.f32 %v3976_v46, %v3984_v57  ;;  %1566 = vmatpush.bf16.msrb.mxu2 %v3602_v50 }
 0x11d   : > { %v479_v7 = vadd.f32 %v3976_v46, %v478_v6  ;;  %v4122_v11 = vsel %vm3991_vm6, 0, %v858_v0  ;;  %v4126_v13 = vsel %vm3995_vm7, %v970_v1, 0  ;;  %v4153_v1 = vpop.f32.mrf.mxu3 }
 0x11e   : > { %5282 = vst [vmem:[#allocation9_spill] sm:$0xff] %v4126_v13  ;;  %1518 = vmatmul.bf16.gmra.mxu1 %v4122_v11  ;;  %1696 = vmatmul.bf16.gmra.mxu3 %v4126_v13  ;;  %v540_v14 = vmax.f32 %v489_v52, 0.0 }
 0x11f   : > { %v536_v17 = vmax.f32 %v479_v7, 0.0  ;;  %1780 = vmatmul.bf16.gmra.mxu0 %v4122_v11  ;;  %5284 = vst [vmem:[#allocation11_spill] sm:$0xff] %v4153_v1  ;;  %v539_v7 = vmax.f32 %v487_v51, 0.0 }
 0x121   : > { %v568_v18 = vpack.c.bf16 %v536_v17, %v536_v17  ;;  %v4159_v17 = vpop.f32.mrf.mxu1 }
 0x122   : > { %5285 = vst [vmem:[#allocation12_spill] sm:$0xff] %v4159_v17 }
 0x123   : > { %v777_v23 = vunpack.c.l.b16 %v568_v18 }
 0x124   : > { %v481_v25 = vpop.f32.mrf.mxu0 }
 0x125   : > { %v4133_v28 = vpack.c.b16 %v777_v23, %v776_v22  ;;  %v482_v29 = vadd.f32 %v3976_v46, %v481_v25  ;;  %v571_v23 = vpack.c.bf16 %v539_v7, %v539_v7  ;;  %v572_v25 = vpack.c.bf16 %v540_v14, %v540_v14 }
 0x127   : > { %v860_v36 = vshrl.u32 %v4133_v28, 16  ;;  %v863_v38 = vshll.u32 %v4133_v28, 16  ;;  %v537_v44 = vmax.f32 %v482_v29, 0.0 }
 0x129   : > { %v862_v40 = vrot.slane %v860_v36, 7  ;;  %v971_v43 = vrot.slane %v863_v38, 1  ;;  %v569_v6 = vpack.c.bf16 %v537_v44, %v537_v44  ;;  %v781_v44 = vunpack.c.l.b16 %v572_v25 }
 0x12b   : > { %v865_v47 = vor.u32 %v863_v38, %v862_v40  ;;  %v972_v48 = vor.u32 %v971_v43, %v860_v36  ;;  %v778_v18 = vunpack.c.l.b16 %v569_v6  ;;  %v4163_v36 = vpop.f32.mrf.mxu3  ;;  %v780_v43 = vunpack.c.l.b16 %v571_v23 }
 0x12c   : > { %v483_v59 = vpop.f32.mrf.mxu0  ;;  %5286 = vst [vmem:[#allocation13_spill] sm:$0xff] %v4163_v36  ;;  %v492_v6 = vadd.f32 %v3976_v46, %v3999_v5  ;;  %v499_v36 = vadd.f32 %v3976_v46, %v4030_v39  ;;  %v543_v39 = vmax.f32 %v497_v41, 0.0 }
 0x12d   : > { %v484_v60 = vadd.f32 %v3976_v46, %v483_v59  ;;  %v4147_v63 = vsel %vm3991_vm6, 0, %v865_v47  ;;  %v4151_v0 = vsel %vm3995_vm7, %v972_v48, 0 }
 0x12e   : > { %5283 = vst [vmem:[#allocation10_spill] sm:$0xff] %v4151_v0  ;;  %1523 = vmatmul.bf16.vlgmr.msra.gmra.mxu2 %v4147_v63  ;;  %1701 = vmatmul.bf16.gmra.mxu3 %v4151_v0  ;;  %v541_v5 = vmax.f32 %v492_v6, 0.0 }
 0x12f   : > { %v538_v57 = vmax.f32 %v484_v60, 0.0  ;;  %1785 = vmatmul.bf16.gmra.mxu0 %v4147_v63  ;;  %1839 = vmatmul.bf16.vlgmr.msrb.gmra.mxu1 %v3986_v61  ;;  %v4169_v60 = vpack.c.b16 %v781_v44, %v780_v43 }
 0x131   : > { %v570_v15 = vpack.c.bf16 %v538_v57, %v538_v57  ;;  %v494_v57 = vadd.f32 %v3976_v46, %v4009_v16  ;;  %v877_v23 = vshll.u32 %v4169_v60, 16 }
 0x133   : > { %v779_v22 = vunpack.c.l.b16 %v570_v15  ;;  %v3601_v15 = vld [vmem:[#allocation2 + $0x60] sm:$0xff]  ;;  %v542_v16 = vmax.f32 %v494_v57, 0.0 }
 0x134   : > { %1567 = vmatpush.bf16.msrb.mxu2 %v3601_v15 }
 0x135   : > { %v4161_v29 = vpack.c.b16 %v779_v22, %v778_v18  ;;  %v874_v22 = vshrl.u32 %v4169_v60, 16  ;;  %v574_v43 = vpack.c.bf16 %v542_v16, %v542_v16 }
 0x137   : > { %v867_v38 = vshrl.u32 %v4161_v29, 16  ;;  %v870_v40 = vshll.u32 %v4161_v29, 16  ;;  %v876_v44 = vrot.slane %v874_v22, 7 }
 0x138   : > { %1568 = vmatpush.bf16.msrb.mxu2 %v3600_v26 }
 0x139   : > { %v869_v47 = vrot.slane %v867_v38, 7  ;;  %v973_v48 = vrot.slane %v870_v40, 1  ;;  %v879_v6 = vor.u32 %v877_v23, %v876_v44 }
 0x13b   : > { %v4167_v51 = vpop.f32.mrf.mxu1  ;;  %v872_v52 = vor.u32 %v870_v40, %v869_v47  ;;  %v974_v59 = vor.u32 %v973_v48, %v867_v38  ;;  %v573_v40 = vpack.c.bf16 %v541_v5, %v541_v5  ;;  %v975_v47 = vrot.slane %v877_v23, 1 }
 0x13c   : > { %v4171_v50 = vpop.f32.mrf.mxu0  ;;  %v4211_v16 = vsel %vm3991_vm6, 0, %v879_v6 }
 0x13d   : > { %5287 = vst [vmem:[#allocation14_spill] sm:$0xff] %v4171_v50  ;;  %v4179_v7 = vsel %vm3991_vm6, 0, %v872_v52  ;;  %v4183_v14 = vsel %vm3995_vm7, %v974_v59, 0  ;;  %v782_v48 = vunpack.c.l.b16 %v573_v40  ;;  %v783_v52 = vunpack.c.l.b16 %v574_v43 }
 0x13e   : > { %5288 = vst [vmem:[#allocation15_spill] sm:$0xff] %v4183_v14  ;;  %1528 = vmatmul.bf16.gmra.mxu2 %v4179_v7  ;;  %1706 = vmatmul.bf16.gmra.mxu3 %v4183_v14  ;;  %v976_v57 = vor.u32 %v975_v47, %v874_v22  ;;  %v544_v22 = vmax.f32 %v499_v36, 0.0  ;;  %v3641_v14 = vld [vmem:[#allocation2 + $0x1a0] sm:$0xff] }
 0x13f   : > { %1790 = vmatmul.bf16.gmra.mxu0 %v4179_v7  ;;  %1844 = vmatmul.bf16.gmra.mxu1 %v4011_v20  ;;  %v4207_v5 = vpack.c.b16 %v783_v52, %v782_v48  ;;  %v575_v48 = vpack.c.bf16 %v543_v39, %v543_v39  ;;  %v502_v39 = vadd.f32 %v3976_v46, %v4046_v58 }
 0x140   : > { %v4215_v23 = vsel %vm3995_vm7, %v976_v57, 0  ;;  %v576_v52 = vpack.c.bf16 %v544_v22, %v544_v22  ;;  %v504_v22 = vadd.f32 %v3976_v46, %v4056_v9 }
 0x141   : > { %v4189_v18 = vpop.f32.mrf.mxu3  ;;  %5293 = vst [vmem:[#allocation20_spill] sm:$0xff] %v4215_v23  ;;  %v881_v43 = vshrl.u32 %v4207_v5, 16  ;;  %v884_v44 = vshll.u32 %v4207_v5, 16  ;;  %v545_v58 = vmax.f32 %v502_v39, 0.0 }
 0x142   : > { %5289 = vst [vmem:[#allocation16_spill] sm:$0xff] %v4189_v18  ;;  %v546_v9 = vmax.f32 %v504_v22, 0.0 }
 0x143   : > { %v4193_v25 = vpop.f32.mrf.mxu1  ;;  %v883_v57 = vrot.slane %v881_v43, 7 }
 0x144   : > { %v4195_v38 = vpop.f32.mrf.mxu0 }
 0x145   : > { %5290 = vst [vmem:[#allocation17_spill] sm:$0xff] %v4195_v38  ;;  %v784_v38 = vunpack.c.l.b16 %v575_v48  ;;  %v886_v41 = vor.u32 %v884_v44, %v883_v57 }
 0x147   : > { %v4243_v48 = vsel %vm3991_vm6, 0, %v886_v41  ;;  %v577_v41 = vpack.c.bf16 %v545_v58, %v545_v58 }
 0x149   : > { %v4197_v59 = vpop.f32.mrf.mxu3 }
 0x14a   : > { %5291 = vst [vmem:[#allocation18_spill] sm:$0xff] %v4197_v59  ;;  %v977_v59 = vrot.slane %v884_v44, 1 }
 0x14b   : > { %v4199_v15 = vpop.f32.mrf.mxu1 }
 0x14c   : > { %v4205_v18 = vpop.f32.mrf.mxu0  ;;  %v978_v36 = vor.u32 %v977_v59, %v881_v43 }
 0x14d   : > { %5292 = vst [vmem:[#allocation19_spill] sm:$0xff] %v4205_v18  ;;  %v785_v18 = vunpack.c.l.b16 %v576_v52 }
 0x14e   : > { %1533 = vmatmul.bf16.gmra.mxu2 %v4211_v16  ;;  %1711 = vmatmul.bf16.gmra.mxu3 %v4215_v23  ;;  %v4247_v44 = vsel %vm3995_vm7, %v978_v36, 0  ;;  %v578_v36 = vpack.c.bf16 %v546_v9, %v546_v9  ;;  %v509_v23 = vadd.f32 %v3976_v46, %v4077_v49 }
 0x14f   : > { %1795 = vmatmul.bf16.gmra.mxu0 %v4211_v16  ;;  %1849 = vmatmul.bf16.gmra.mxu1 %v4032_v42  ;;  %5298 = vst [vmem:[#allocation25_spill] sm:$0xff] %v4247_v44 }
 0x150   : > { %v787_v1 = vunpack.c.l.b16 %v578_v36 }
 0x151   : > { %v4221_v40 = vpop.f32.mrf.mxu3 }
 0x152   : > { %5294 = vst [vmem:[#allocation21_spill] sm:$0xff] %v4221_v40  ;;  %v4233_v40 = vpack.c.b16 %v785_v18, %v784_v38  ;;  %v3599_v18 = vld [vmem:[#allocation2 + $0x50] sm:$0xff] }
 0x153   : > { %v4225_v47 = vpop.f32.mrf.mxu1  ;;  %1569 = vmatpush.bf16.msrb.mxu2 %v3599_v18 }
 0x154   : > { %v4227_v6 = vpop.f32.mrf.mxu0  ;;  %v888_v59 = vshrl.u32 %v4233_v40, 16  ;;  %v891_v43 = vshll.u32 %v4233_v40, 16 }
 0x155   : > { %5295 = vst [vmem:[#allocation22_spill] sm:$0xff] %v4227_v6  ;;  %v786_v6 = vunpack.c.l.b16 %v577_v41  ;;  %v3643_v41 = vld [vmem:[#allocation2 + $0x1b0] sm:$0xff] }
 0x157   : > { %v4271_v58 = vpack.c.b16 %v787_v1, %v786_v6  ;;  %v548_v1 = vmax.f32 %v509_v23, 0.0 }
 0x159   : > { %v4229_v50 = vpop.f32.mrf.mxu3 }
 0x15a   : > { %5296 = vst [vmem:[#allocation23_spill] sm:$0xff] %v4229_v50  ;;  %v890_v50 = vrot.slane %v888_v59, 7 }
 0x15b   : > { %v4231_v26 = vpop.f32.mrf.mxu1 }
 0x15c   : > { %v4235_v17 = vpop.f32.mrf.mxu0  ;;  %v893_v39 = vor.u32 %v891_v43, %v890_v50 }
 0x15d   : > { %5297 = vst [vmem:[#allocation24_spill] sm:$0xff] %v4235_v17  ;;  %v979_v17 = vrot.slane %v891_v43, 1  ;;  %v898_v43 = vshll.u32 %v4271_v58, 16 }
 0x15e   : > { %1538 = vmatmul.bf16.gmra.mxu2 %v4243_v48  ;;  %1716 = vmatmul.bf16.gmra.mxu3 %v4247_v44  ;;  %v4275_v9 = vsel %vm3991_vm6, 0, %v893_v39 }
 0x15f   : > { %1800 = vmatmul.bf16.gmra.mxu0 %v4243_v48  ;;  %1854 = vmatmul.bf16.gmra.mxu1 %v4051_v3  ;;  %v980_v22 = vor.u32 %v979_v17, %v888_v59  ;;  %v3644_v17 = vld [vmem:[#allocation2 + $0x1b8] sm:$0xff]  ;;  %v895_v59 = vshrl.u32 %v4271_v58, 16 }
 0x160   : > { %2009 = vmatpush.bf16.msra.mxu3 %v3644_v17 }
 0x161   : > { %v4253_v38 = vpop.f32.mrf.mxu3  ;;  %v4279_v50 = vsel %vm3995_vm7, %v980_v22, 0  ;;  %v580_v22 = vpack.c.bf16 %v548_v1, %v548_v1  ;;  %v512_v1 = vadd.f32 %v3976_v46, %v4093_v10 }
 0x162   : > { %5299 = vst [vmem:[#allocation26_spill] sm:$0xff] %v4253_v38  ;;  %v507_v38 = vadd.f32 %v3976_v46, %v4070_v27  ;;  %v3598_v27 = vld [vmem:[#allocation2 + $0x48] sm:$0xff] }
 0x163   : > { %v4257_v52 = vpop.f32.mrf.mxu1  ;;  %5304 = vst [vmem:[#allocation31_spill] sm:$0xff] %v4279_v50  ;;  %1570 = vmatpush.bf16.msrb.mxu2 %v3598_v27  ;;  %v789_v27 = vunpack.c.l.b16 %v580_v22  ;;  %v549_v10 = vmax.f32 %v512_v1, 0.0  ;;  %v3639_v22 = vld [vmem:[#allocation2 + $0x190] sm:$0xff] }
 0x164   : > { %v4259_v57 = vpop.f32.mrf.mxu0  ;;  %v547_v49 = vmax.f32 %v507_v38, 0.0  ;;  %2010 = vmatpush.bf16.msra.mxu3 %v3643_v41  ;;  %v981_v38 = vrot.slane %v898_v43, 1  ;;  %v514_v41 = vadd.f32 %v3976_v46, %v4110_v37 }
 0x165   : > { %5300 = vst [vmem:[#allocation27_spill] sm:$0xff] %v4259_v57  ;;  %v897_v57 = vrot.slane %v895_v59, 7 }
 0x166   : > { %v579_v39 = vpack.c.bf16 %v547_v49, %v547_v49  ;;  %v550_v37 = vmax.f32 %v514_v41, 0.0  ;;  %v3650_v41 = vld [vmem:[#allocation2 + $0x1e8] sm:$0xff] }
 0x168   : > { %v788_v23 = vunpack.c.l.b16 %v579_v39 }
 0x169   : > { %v4261_v44 = vpop.f32.mrf.mxu3 }
 0x16a   : > { %5301 = vst [vmem:[#allocation28_spill] sm:$0xff] %v4261_v44  ;;  %v4297_v13 = vpack.c.b16 %v789_v27, %v788_v23 }
 0x16b   : > { %v4263_v18 = vpop.f32.mrf.mxu1 }
 0x16c   : > { %5302 = vst [vmem:[#allocation29_spill] sm:$0xff] %v4263_v18  ;;  %v4269_v12 = vpop.f32.mrf.mxu0  ;;  %v905_v39 = vshll.u32 %v4297_v13, 16 }
 0x16d   : > { %5303 = vst [vmem:[#allocation30_spill] sm:$0xff] %v4269_v12  ;;  %v3642_v12 = vld [vmem:[#allocation2 + $0x1a8] sm:$0xff] }
 0x16e   : > { %1543 = vmatmul.bf16.gmra.mxu2 %v4275_v9  ;;  %1721 = vmatmul.bf16.gmra.mxu3 %v4279_v50  ;;  %v982_v50 = vor.u32 %v981_v38, %v895_v59  ;;  %v3597_v59 = vld [vmem:[#allocation2 + $0x40] sm:$0xff]  ;;  %v3651_v38 = vld [vmem:[#allocation2 + $0x1f0] sm:$0xff]  ;;  %v983_v1 = vrot.slane %v905_v39, 1 }
 0x16f   : > { %1805 = vmatmul.bf16.gmra.mxu0 %v4275_v9  ;;  %1859 = vmatmul.bf16.gmra.mxu1 %v4072_v34 }
 0x170   : > { %2011 = vmatpush.bf16.msra.mxu3 %v3642_v12  ;;  %1571 = vmatpush.bf16.msrb.mxu2 %v3597_v59  ;;  %v582_v59 = vpack.c.bf16 %v550_v37, %v550_v37  ;;  %v519_v37 = vadd.f32 %v3976_v46, %v4131_v24 }
 0x171   : > { %v4285_v6 = vpop.f32.mrf.mxu3 }
 0x172   : > { %5305 = vst [vmem:[#allocation32_spill] sm:$0xff] %v4285_v6  ;;  %v900_v6 = vor.u32 %v898_v43, %v897_v57  ;;  %v4311_v57 = vsel %vm3995_vm7, %v982_v50, 0  ;;  %v3652_v43 = vld [vmem:[#allocation2 + $0x1f8] sm:$0xff]  ;;  %v902_v50 = vshrl.u32 %v4297_v13, 16 }
 0x173   : > { %v4289_v36 = vpop.f32.mrf.mxu1  ;;  %5311 = vst [vmem:[#allocation38_spill] sm:$0xff] %v4311_v57  ;;  %2098 = vmatpush.bf16.msra.mxu0 %v3652_v43 }
 0x174   : > { %5306 = vst [vmem:[#allocation33_spill] sm:$0xff] %v4289_v36  ;;  %v4291_v44 = vpop.f32.mrf.mxu0  ;;  %2012 = vmatpush.bf16.msra.mxu3 %v3641_v14  ;;  %v4307_v12 = vsel %vm3991_vm6, 0, %v900_v6  ;;  %v3640_v14 = vld [vmem:[#allocation2 + $0x198] sm:$0xff]  ;;  %v3637_v36 = vld [vmem:[#allocation2 + $0x180] sm:$0xff] }
 0x175   : > { %5307 = vst [vmem:[#allocation34_spill] sm:$0xff] %v4291_v44  ;;  %v791_v44 = vunpack.c.l.b16 %v582_v59 }
 0x177   : > { %2099 = vmatpush.bf16.msra.mxu0 %v3651_v38 }
 0x178   : > { %2013 = vmatpush.bf16.msra.mxu3 %v3640_v14  ;;  %v904_v14 = vrot.slane %v902_v50, 7 }
 0x179   : > { %v4293_v17 = vpop.f32.mrf.mxu3 }
 0x17a   : > { %5308 = vst [vmem:[#allocation35_spill] sm:$0xff] %v4293_v17  ;;  %v3638_v17 = vld [vmem:[#allocation2 + $0x188] sm:$0xff]  ;;  %v907_v43 = vor.u32 %v905_v39, %v904_v14  ;;  %v3647_v39 = vld [vmem:[#allocation2 + $0x1d0] sm:$0xff] }
 0x17b   : > { %v4295_v0 = vpop.f32.mrf.mxu1  ;;  %2100 = vmatpush.bf16.msra.mxu0 %v3650_v41  ;;  %v3646_v41 = vld [vmem:[#allocation2 + $0x1c8] sm:$0xff] }
 0x17c   : > { %5309 = vst [vmem:[#allocation36_spill] sm:$0xff] %v4295_v0  ;;  %v4299_v49 = vpop.f32.mrf.mxu0  ;;  %2014 = vmatpush.bf16.msra.mxu3 %v3639_v22  ;;  %v984_v0 = vor.u32 %v983_v1, %v902_v50 }
 0x17d   : > { %5310 = vst [vmem:[#allocation37_spill] sm:$0xff] %v4299_v49  ;;  %v581_v49 = vpack.c.bf16 %v549_v10, %v549_v10  ;;  %v517_v10 = vadd.f32 %v3976_v46, %v4117_v62  ;;  %v3648_v62 = vld [vmem:[#allocation2 + $0x1d8] sm:$0xff] }
 0x17e   : > { %1548 = vmatmul.bf16.gmra.mxu2 %v4307_v12  ;;  %1726 = vmatmul.bf16.gmra.mxu3 %v4311_v57  ;;  %v4343_v50 = vsel %vm3995_vm7, %v984_v0, 0  ;;  %v3636_v46 = vld [vmem:[#allocation2 + $0x178] sm:$0xff] }
 0x17f   : > { %1810 = vmatmul.bf16.gmra.mxu0 %v4307_v12  ;;  %1864 = vmatmul.bf16.gmra.mxu1 %v4091_v8  ;;  %5317 = vst [vmem:[#allocation44_spill] sm:$0xff] %v4343_v50  ;;  %v551_v24 = vmax.f32 %v517_v10, 0.0 }
 0x180   : > { %2015 = vmatpush.bf16.msra.mxu3 %v3638_v17  ;;  %1920 = vmatpush.bf16.msra.mxu2 %v3636_v46  ;;  %v3660_v46 = vld [vmem:[#allocation2 + $0x238] sm:$0xff] }
 0x181   : > { %v4317_v6 = vpop.f32.mrf.mxu3  ;;  %2187 = vmatpush.bf16.msra.mxu1 %v3660_v46  ;;  %v3635_v46 = vld [vmem:[#allocation2 + $0x170] sm:$0xff] }
 0x182   : > { %5312 = vst [vmem:[#allocation39_spill] sm:$0xff] %v4317_v6  ;;  %v790_v6 = vunpack.c.l.b16 %v581_v49  ;;  %v4339_v49 = vsel %vm3991_vm6, 0, %v907_v43 }
 0x183   : > { %v4321_v23 = vpop.f32.mrf.mxu1 }
 0x184   : > { %5313 = vst [vmem:[#allocation40_spill] sm:$0xff] %v4321_v23  ;;  %v4323_v27 = vpop.f32.mrf.mxu0  ;;  %v3649_v23 = vld [vmem:[#allocation2 + $0x1e0] sm:$0xff]  ;;  %2016 = vmatpush.bf16.msra.mxu3 %v3637_v36  ;;  %v4333_v22 = vpack.c.b16 %v791_v44, %v790_v6  ;;  %v552_v44 = vmax.f32 %v519_v37, 0.0  ;;  %1921 = vmatpush.bf16.msra.mxu2 %v3635_v46 }
 0x185   : > { %5314 = vst [vmem:[#allocation41_spill] sm:$0xff] %v4323_v27  ;;  %2101 = vmatpush.bf16.msra.mxu0 %v3649_v23  ;;  %v583_v23 = vpack.c.bf16 %v551_v24, %v551_v24 }
 0x186   : > { %v909_v6 = vshrl.u32 %v4333_v22, 16  ;;  %v912_v0 = vshll.u32 %v4333_v22, 16  ;;  %v584_v59 = vpack.c.bf16 %v552_v44, %v552_v44 }
 0x187   : > { %v792_v10 = vunpack.c.l.b16 %v583_v23 }
 0x188   : > { %v911_v14 = vrot.slane %v909_v6, 7  ;;  %v985_v1 = vrot.slane %v912_v0, 1  ;;  %v793_v37 = vunpack.c.l.b16 %v584_v59 }
 0x189   : > { %v4325_v57 = vpop.f32.mrf.mxu3  ;;  %2102 = vmatpush.bf16.msra.mxu0 %v3648_v62  ;;  %v3645_v62 = vld [vmem:[#allocation2 + $0x1c0] sm:$0xff] }
 0x18a   : > { %5315 = vst [vmem:[#allocation42_spill] sm:$0xff] %v4325_v57  ;;  %v986_v57 = vor.u32 %v985_v1, %v909_v6 }
 0x18b   : > { %v4327_v18 = vpop.f32.mrf.mxu1 }
 0x18c   : > { %v4335_v17 = vpop.f32.mrf.mxu0  ;;  %v4369_v44 = vsel %vm3995_vm7, %v986_v57, 0 }
 0x18d   : > { %5316 = vst [vmem:[#allocation43_spill] sm:$0xff] %v4335_v17  ;;  %2103 = vmatpush.bf16.msra.mxu0 %v3647_v39 }
 0x18e   : > { %1553 = vmatmul.bf16.gmra.mxu2 %v4339_v49  ;;  %1731 = vmatmul.bf16.gmra.mxu3 %v4343_v50  ;;  %v4361_v50 = vpack.c.b16 %v793_v37, %v792_v10  ;;  %v5325_v37 = vmov 0  }
 0x18f   : > { %1815 = vmatmul.bf16.gmra.mxu0 %v4339_v49  ;;  %1869 = vmatmul.bf16.gmra.mxu1 %v4112_v45 }
 0x190   : > { %v5273_v6 = vshrl.u32 %v4361_v50, 16  ;;  %v5274_v23 = vshll.u32 %v4361_v50, 16 }
 0x191   : > { %v4349_v36 = vpop.f32.mrf.mxu3  ;;  %2104 = vmatpush.bf16.msra.mxu0 %v3646_v41 }
 0x192   : > { %5318 = vst [vmem:[#allocation45_spill] sm:$0xff] %v4349_v36  ;;  %v914_v36 = vor.u32 %v912_v0, %v911_v14  ;;  %v918_v57 = vrot.slane %v5273_v6, 7 }
 0x193   : > { %v4353_v38 = vpop.f32.mrf.mxu1 }
 0x194   : > { %v4355_v43 = vpop.f32.mrf.mxu0  ;;  %v4365_v24 = vsel %vm3991_vm6, 0, %v914_v36  ;;  %v921_v59 = vor.u32 %v5274_v23, %v918_v57  ;;  %v3659_v23 = vld [vmem:[#allocation2 + $0x230] sm:$0xff] }
 0x195   : > { %5319 = vst [vmem:[#allocation46_spill] sm:$0xff] %v4355_v43  ;;  %2105 = vmatpush.bf16.msra.mxu0 %v3645_v62  ;;  %2188 = vmatpush.bf16.msra.mxu1 %v3659_v23 }
 0x196   : > { %v4393_v41 = vsel %vm3991_vm6, 0, %v921_v59 }
 0x199   : > { %v4357_v27 = vpop.f32.mrf.mxu3 }
 0x19a   : > { %5320 = vst [vmem:[#allocation47_spill] sm:$0xff] %v4357_v27 }
 0x19b   : > { %v4359_v17 = vpop.f32.mrf.mxu1 }
 0x19c   : > { %v4376_v0 = vpop.f32.mrf.mxu0 }
 0x19d   : > { %5321 = vst [vmem:[#allocation48_spill] sm:$0xff] %v4376_v0  ;;  %v3658_v0 = vld [vmem:[#allocation2 + $0x228] sm:$0xff] }
 0x19e   : > { %1558 = vmatmul.bf16.gmra.mxu2 %v4365_v24  ;;  %1736 = vmatmul.bf16.gmra.mxu3 %v4369_v44 }
 0x19f   : > { %1820 = vmatmul.bf16.gmra.mxu0 %v4365_v24  ;;  %1874 = vmatmul.bf16.gmra.mxu1 %v4133_v28 }
 0x1a0   : > { %2189 = vmatpush.bf16.msra.mxu1 %v3658_v0 }
 0x1a1   : > { %v4380_v36 = vpop.f32.mrf.mxu3 }
 0x1a2   : > { %5322 = vst [vmem:[#allocation49_spill] sm:$0xff] %v4380_v36 }
 0x1a3   : > { %v4378_v39 = vpop.f32.mrf.mxu1 }
 0x1a4   : > { %v4387_v14 = vpop.f32.mrf.mxu0 }
 0x1a5   : > { %5323 = vst [vmem:[#allocation50_spill] sm:$0xff] %v4387_v14 }
 0x1a9   : > { %v4395_v10 = vpop.f32.mrf.mxu3 }
 0x1aa   : > { %5324 = vst [vmem:[#allocation51_spill] sm:$0xff] %v4395_v10 }
 0x1ac   : > { %v4389_v1 = vpop.f32.mrf.mxu1  ;;  %v4405_v6 = vpop.f32.mrf.mxu0 }
 0x1ad   : > { %5326 = vst [vmem:[#allocation52_spill] sm:$0xff] %v4405_v6 }
 0x1ae   : > { %1572 = vmatmul.bf16.vlgmr.msrb.gmra.mxu2 %v5325_v37  ;;  %2017 = vmatmul.bf16.vlgmr.msra.gmra.mxu3 %v4021_v32 }
 0x1af   : > { %1825 = vmatmul.bf16.gmra.mxu0 %v4393_v41  ;;  %1879 = vmatmul.bf16.gmra.mxu1 %v4161_v29 }
 0x1b1   : > { %v4401_v62 = vpop.f32.mrf.mxu2  ;;  %v4407_v2 = vpop.f32.mrf.mxu3 }
 0x1b2   : > { %5327 = vst [vmem:[#allocation53_spill] sm:$0xff] %v4407_v2 }
 0x1b4   : > { %v4403_v57 = vpop.f32.mrf.mxu1  ;;  %v4415_v32 = vpop.f32.mrf.mxu0 }
 0x1b5   : > { %5328 = vst [vmem:[#allocation54_spill] sm:$0xff] %v4415_v32 }
 0x1b9   : > { %v4409_v59 = vpop.f32.mrf.mxu2  ;;  %v4421_v14 = vpop.f32.mrf.mxu3 }
 0x1ba   : > { %5329 = vst [vmem:[#allocation55_spill] sm:$0xff] %v4421_v14 }
 0x1bc   : > { %v4411_v10 = vpop.f32.mrf.mxu1  ;;  %v4425_v6 = vpop.f32.mrf.mxu0 }
 0x1bd   : > { %5330 = vst [vmem:[#allocation56_spill] sm:$0xff] %v4425_v6 }
 0x1be   : > { %1577 = vmatmul.bf16.gmra.mxu2 %v3986_v61  ;;  %2022 = vmatmul.bf16.gmra.mxu3 %v4040_v55  ;;  %v3634_v55 = vld [vmem:[#allocation2 + $0x168] sm:$0xff] }
 0x1bf   : > { %1884 = vmatmul.bf16.gmra.mxu1 %v4169_v60  ;;  %2106 = vmatmul.bf16.vlgmr.msra.gmra.mxu0 %v4011_v20 }
 0x1c0   : > { %1922 = vmatpush.bf16.msra.mxu2 %v3634_v55 }
 0x1c1   : > { %v4419_v46 = vpop.f32.mrf.mxu2  ;;  %v4429_v23 = vpop.f32.mrf.mxu3 }
 0x1c2   : > { %5331 = vst [vmem:[#allocation57_spill] sm:$0xff] %v4429_v23 }
 0x1c4   : > { %v4423_v2 = vpop.f32.mrf.mxu1  ;;  %v4439_v32 = vpop.f32.mrf.mxu0 }
 0x1c5   : > { %5333 = vst [vmem:[#allocation59_spill] sm:$0xff] %v4439_v32 }
 0x1c9   : > { %v4427_v36 = vpop.f32.mrf.mxu2  ;;  %v4443_v27 = vpop.f32.mrf.mxu3 }
 0x1ca   : > { %5335 = vst [vmem:[#allocation61_spill] sm:$0xff] %v4443_v27 }
 0x1cc   : > { %v4431_v61 = vpop.f32.mrf.mxu1 }
 0x1cd   : > { %5332 = vst [vmem:[#allocation58_spill] sm:$0xff] %v4431_v61 }
 0x1ce   : > { %1582 = vmatmul.bf16.gmra.mxu2 %v4011_v20  ;;  %2027 = vmatmul.bf16.gmra.mxu3 %v4061_v19  ;;  %v4449_v19 = vpop.f32.mrf.mxu0 }
 0x1cf   : > { %1889 = vmatmul.bf16.gmra.mxu1 %v4207_v5  ;;  %2111 = vmatmul.bf16.gmra.mxu0 %v4032_v42  ;;  %5337 = vst [vmem:[#allocation63_spill] sm:$0xff] %v4449_v19 }
 0x1d1   : > { %v4437_v14 = vpop.f32.mrf.mxu2  ;;  %v4455_v55 = vpop.f32.mrf.mxu3 }
 0x1d2   : > { %5338 = vst [vmem:[#allocation64_spill] sm:$0xff] %v4455_v55 }
 0x1d4   : > { %v4441_v6 = vpop.f32.mrf.mxu1 }
 0x1d5   : > { %5334 = vst [vmem:[#allocation60_spill] sm:$0xff] %v4441_v6 }
 0x1d6   : > { %v4461_v43 = vpop.f32.mrf.mxu0 }
 0x1d7   : > { %5340 = vst [vmem:[#allocation66_spill] sm:$0xff] %v4461_v43 }
 0x1d9   : > { %v4445_v23 = vpop.f32.mrf.mxu2  ;;  %v4465_v0 = vpop.f32.mrf.mxu3 }
 0x1da   : > { %5341 = vst [vmem:[#allocation67_spill] sm:$0xff] %v4465_v0 }
 0x1dc   : > { %v4447_v20 = vpop.f32.mrf.mxu1 }
 0x1dd   : > { %5336 = vst [vmem:[#allocation62_spill] sm:$0xff] %v4447_v20 }
 0x1de   : > { %1587 = vmatmul.bf16.gmra.mxu2 %v4032_v42  ;;  %2032 = vmatmul.bf16.gmra.mxu3 %v4082_v53  ;;  %v3633_v42 = vld [vmem:[#allocation2 + $0x160] sm:$0xff]  ;;  %v4473_v53 = vpop.f32.mrf.mxu0 }
 0x1df   : > { %1894 = vmatmul.bf16.gmra.mxu1 %v4233_v40  ;;  %2116 = vmatmul.bf16.gmra.mxu0 %v4051_v3  ;;  %5343 = vst [vmem:[#allocation69_spill] sm:$0xff] %v4473_v53  ;;  %v3656_v53 = vld [vmem:[#allocation2 + $0x218] sm:$0xff] }
 0x1e0   : > { %1923 = vmatpush.bf16.msra.mxu2 %v3633_v42 }
 0x1e1   : > { %v4457_v32 = vpop.f32.mrf.mxu2  ;;  %v4477_v43 = vpop.f32.mrf.mxu3 }
 0x1e2   : > { %5344 = vst [vmem:[#allocation70_spill] sm:$0xff] %v4477_v43  ;;  %v3655_v43 = vld [vmem:[#allocation2 + $0x210] sm:$0xff] }
 0x1e4   : > { %v4459_v27 = vpop.f32.mrf.mxu1 }
 0x1e5   : > { %5339 = vst [vmem:[#allocation65_spill] sm:$0xff] %v4459_v27 }
 0x1e9   : > { %v4463_v20 = vpop.f32.mrf.mxu2  ;;  %v4487_v6 = vpop.f32.mrf.mxu3 }
 0x1ea   : > { %5348 = vst [vmem:[#allocation74_spill] sm:$0xff] %v4487_v6 }
 0x1ec   : > { %v4467_v19 = vpop.f32.mrf.mxu1 }
 0x1ed   : > { %5342 = vst [vmem:[#allocation68_spill] sm:$0xff] %v4467_v19  ;;  %v3657_v19 = vld [vmem:[#allocation2 + $0x220] sm:$0xff] }
 0x1ee   : > { %1592 = vmatmul.bf16.gmra.mxu2 %v4051_v3  ;;  %2037 = vmatmul.bf16.gmra.mxu3 %v4101_v30  ;;  %v4483_v3 = vpop.f32.mrf.mxu0 }
 0x1ef   : > { %1899 = vmatmul.bf16.gmra.mxu1 %v4271_v58  ;;  %2121 = vmatmul.bf16.gmra.mxu0 %v4072_v34  ;;  %5346 = vst [vmem:[#allocation72_spill] sm:$0xff] %v4483_v3  ;;  %v3654_v3 = vld [vmem:[#allocation2 + $0x208] sm:$0xff] }
 0x1f0   : > { %2190 = vmatpush.bf16.msra.mxu1 %v3657_v19 }
 0x1f1   : > { %v4475_v55 = vpop.f32.mrf.mxu2  ;;  %v4499_v6 = vpop.f32.mrf.mxu3 }
 0x1f2   : > { %5351 = vst [vmem:[#allocation77_spill] sm:$0xff] %v4499_v6 }
 0x1f4   : > { %v4479_v27 = vpop.f32.mrf.mxu1  ;;  %2191 = vmatpush.bf16.msra.mxu1 %v3656_v53  ;;  %v3632_v53 = vld [vmem:[#allocation2 + $0x158] sm:$0xff] }
 0x1f5   : > { %5345 = vst [vmem:[#allocation71_spill] sm:$0xff] %v4479_v27  ;;  %1924 = vmatpush.bf16.msra.mxu2 %v3632_v53 }
 0x1f6   : > { %v4495_v19 = vpop.f32.mrf.mxu0 }
 0x1f7   : > { %5349 = vst [vmem:[#allocation75_spill] sm:$0xff] %v4495_v19 }
 0x1f8   : > { %2192 = vmatpush.bf16.msra.mxu1 %v3655_v43 }
 0x1f9   : > { %v4481_v0 = vpop.f32.mrf.mxu2 }
 0x1fc   : > { %v4485_v30 = vpop.f32.mrf.mxu1  ;;  %2193 = vmatpush.bf16.msra.mxu1 %v3654_v3  ;;  %v4513_v3 = vpop.f32.mrf.mxu3 }
 0x1fd   : > { %5347 = vst [vmem:[#allocation73_spill] sm:$0xff] %v4485_v30 }
 0x1fe   : > { %1597 = vmatmul.bf16.gmra.mxu2 %v4072_v34  ;;  %2042 = vmatmul.bf16.gmra.mxu3 %v4122_v11  ;;  %v3653_v11 = vld [vmem:[#allocation2 + $0x200] sm:$0xff]  ;;  %v4505_v30 = vpop.f32.mrf.mxu0  ;;  %5354 = vst [vmem:[#allocation80_spill] sm:$0xff] %v4513_v3 }
 0x1ff   : > { %1904 = vmatmul.bf16.gmra.mxu1 %v4297_v13  ;;  %2126 = vmatmul.bf16.gmra.mxu0 %v4091_v8  ;;  %5352 = vst [vmem:[#allocation78_spill] sm:$0xff] %v4505_v30 }
 0x200   : > { %2194 = vmatpush.bf16.msra.mxu1 %v3653_v11 }
 0x201   : > { %v4493_v42 = vpop.f32.mrf.mxu2 }
 0x204   : > { %v4497_v27 = vpop.f32.mrf.mxu1 }
 0x205   : > { %5350 = vst [vmem:[#allocation76_spill] sm:$0xff] %v4497_v27 }
 0x206   : > { %v4515_v19 = vpop.f32.mrf.mxu0 }
 0x207   : > { %5355 = vst [vmem:[#allocation81_spill] sm:$0xff] %v4515_v19 }
 0x209   : > { %v4501_v34 = vpop.f32.mrf.mxu2 }
 0x20c   : > { %v4509_v43 = vpop.f32.mrf.mxu1 }
 0x20d   : > { %5353 = vst [vmem:[#allocation79_spill] sm:$0xff] %v4509_v43 }
 0x20e   : > { %1602 = vmatmul.bf16.gmra.mxu2 %v4091_v8  ;;  %2047 = vmatmul.bf16.gmra.mxu3 %v4147_v63  ;;  %v4521_v63 = vpop.f32.mrf.mxu3  ;;  %v4529_v30 = vpop.f32.mrf.mxu0 }
 0x20f   : > { %1909 = vmatmul.bf16.gmra.mxu1 %v4333_v22  ;;  %2131 = vmatmul.bf16.gmra.mxu0 %v4112_v45  ;;  %5357 = vst [vmem:[#allocation83_spill] sm:$0xff] %v4521_v63 }
 0x210   : > { %5358 = vst [vmem:[#allocation84_spill] sm:$0xff] %v4529_v30 }
 0x211   : > { %v4511_v6 = vpop.f32.mrf.mxu2 }
 0x214   : > { %v4519_v8 = vpop.f32.mrf.mxu1 }
 0x215   : > { %5356 = vst [vmem:[#allocation82_spill] sm:$0xff] %v4519_v8 }
 0x216   : > { %v4533_v19 = vpop.f32.mrf.mxu3  ;;  %v4537_v8 = vpop.f32.mrf.mxu0 }
 0x217   : > { %5360 = vst [vmem:[#allocation86_spill] sm:$0xff] %v4533_v19 }
 0x218   : > { %5361 = vst [vmem:[#allocation87_spill] sm:$0xff] %v4537_v8 }
 0x219   : > { %v4517_v11 = vpop.f32.mrf.mxu2 }
 0x21c   : > { %v4531_v3 = vpop.f32.mrf.mxu1 }
 0x21d   : > { %5359 = vst [vmem:[#allocation85_spill] sm:$0xff] %v4531_v3 }
 0x21e   : > { %1607 = vmatmul.bf16.gmra.mxu2 %v4112_v45  ;;  %2052 = vmatmul.bf16.gmra.mxu3 %v4179_v7  ;;  %v4542_v45 = vld [vmem:[%s5252_s4] ss:$0 sm:$0xff]  ;;  %v3631_v7 = vld [vmem:[#allocation2 + $0x150] sm:$0xff]  ;;  %v4552_v30 = vpop.f32.mrf.mxu3  ;;  %v4556_v27 = vpop.f32.mrf.mxu0 }
 0x21f   : > { %1914 = vmatmul.bf16.gmra.mxu1 %v4361_v50  ;;  %2136 = vmatmul.bf16.gmra.mxu0 %v4133_v28  ;;  %v1485_v19 = vadd.f32 %v4542_v45, %v4136_v35  ;;  %5363 = vst [vmem:[#allocation89_spill] sm:$0xff] %v4552_v30  ;;  %v1490_v35 = vadd.f32 %v4542_v45, %v4167_v51 }
 0x220   : > { %1925 = vmatpush.bf16.msra.mxu2 %v3631_v7  ;;  %5364 = vst [vmem:[#allocation90_spill] sm:$0xff] %v4556_v27 }
 0x221   : > { %v4527_v53 = vpop.f32.mrf.mxu2 }
 0x224   : > { %v4546_v63 = vpop.f32.mrf.mxu1 }
 0x225   : > { %5362 = vst [vmem:[#allocation88_spill] sm:$0xff] %v4546_v63 }
 0x226   : > { %v4562_v63 = vpop.f32.mrf.mxu3 }
 0x227   : > { %5366 = vst [vmem:[#allocation92_spill] sm:$0xff] %v4562_v63 }
 0x229   : > { %v4535_v43 = vpop.f32.mrf.mxu2 }
 0x22e   : > { %1612 = vmatmul.bf16.gmra.mxu2 %v4133_v28  ;;  %2057 = vmatmul.bf16.gmra.mxu3 %v4211_v16  ;;  %v4558_v28 = vpop.f32.mrf.mxu1  ;;  %v4576_v27 = vpop.f32.mrf.mxu3 }
 0x22f   : > { %2141 = vmatmul.bf16.gmra.mxu0 %v4161_v29  ;;  %2195 = vmatmul.bf16.vlgmr.msra.gmra.mxu1 %v4025_v33  ;;  %5365 = vst [vmem:[#allocation91_spill] sm:$0xff] %v4558_v28 }
 0x230   : > { %5369 = vst [vmem:[#allocation95_spill] sm:$0xff] %v4576_v27 }
 0x231   : > { %v1573_v8 = vpop.f32.mrf.mxu2 }
 0x232   : > { %v4554_v3 = vadd.f32 %v1573_v8, %v1485_v19  ;;  %v4570_v19 = vpop.f32.mrf.mxu0 }
 0x233   : > { %5367 = vst [vmem:[#allocation93_spill] sm:$0xff] %v4570_v19 }
 0x236   : > { %v4574_v30 = vpop.f32.mrf.mxu1  ;;  %v4586_v51 = vpop.f32.mrf.mxu3 }
 0x237   : > { %5368 = vst [vmem:[#allocation94_spill] sm:$0xff] %v4574_v30 }
 0x238   : > { %5372 = vst [vmem:[#allocation98_spill] sm:$0xff] %v4586_v51 }
 0x239   : > { %v4560_v16 = vpop.f32.mrf.mxu2 }
 0x23a   : > { %v4582_v28 = vpop.f32.mrf.mxu0 }
 0x23b   : > { %5370 = vst [vmem:[#allocation96_spill] sm:$0xff] %v4582_v28 }
 0x23e   : > { %1617 = vmatmul.bf16.gmra.mxu2 %v4161_v29  ;;  %2062 = vmatmul.bf16.gmra.mxu3 %v4243_v48  ;;  %v1492_v29 = vadd.f32 %v4542_v45, %v4193_v25  ;;  %v4584_v61 = vpop.f32.mrf.mxu1  ;;  %v1495_v25 = vadd.f32 %v4542_v45, %v4199_v15 }
 0x23f   : > { %2146 = vmatmul.bf16.gmra.mxu0 %v4169_v60  ;;  %2200 = vmatmul.bf16.gmra.mxu1 %v4044_v56  ;;  %5371 = vst [vmem:[#allocation97_spill] sm:$0xff] %v4584_v61 }
 0x241   : > { %v1578_v8 = vpop.f32.mrf.mxu2 }
 0x242   : > { %v4572_v7 = vadd.f32 %v1578_v8, %v1490_v35  ;;  %v3630_v35 = vld [vmem:[#allocation2 + $0x148] sm:$0xff] }
 0x243   : > { %1926 = vmatpush.bf16.msra.mxu2 %v3630_v35  ;;  %v1500_v35 = vadd.f32 %v4542_v45, %v4231_v26  ;;  %v3629_v26 = vld [vmem:[#allocation2 + $0x140] sm:$0xff] }
 0x246   : > { %v4598_v28 = vpop.f32.mrf.mxu1 }
 0x247   : > { %5374 = vst [vmem:[#allocation100_spill] sm:$0xff] %v4598_v28  ;;  %1927 = vmatpush.bf16.msra.mxu2 %v3629_v26 }
 0x249   : > { %v1580_v48 = vpop.f32.mrf.mxu2 }
 0x24a   : > { %v4580_v63 = vadd.f32 %v1580_v48, %v1492_v29  ;;  %v4596_v48 = vpop.f32.mrf.mxu0 }
 0x24b   : > { %5373 = vst [vmem:[#allocation99_spill] sm:$0xff] %v4596_v48 }
 0x24e   : > { %1622 = vmatmul.bf16.gmra.mxu2 %v4169_v60  ;;  %2067 = vmatmul.bf16.gmra.mxu3 %v4275_v9  ;;  %v1497_v60 = vadd.f32 %v4542_v45, %v4225_v47  ;;  %v4602_v9 = vpop.f32.mrf.mxu3 }
 0x24f   : > { %2151 = vmatmul.bf16.gmra.mxu0 %v4207_v5  ;;  %2205 = vmatmul.bf16.gmra.mxu1 %v4065_v21 }
 0x251   : > { %v1583_v8 = vpop.f32.mrf.mxu2 }
 0x252   : > { %v4594_v29 = vadd.f32 %v1583_v8, %v1495_v25  ;;  %v4608_v15 = vpop.f32.mrf.mxu0  ;;  %v4614_v25 = vpop.f32.mrf.mxu1 }
 0x253   : > { %5375 = vst [vmem:[#allocation101_spill] sm:$0xff] %v4608_v15 }
 0x254   : > { %5376 = vst [vmem:[#allocation102_spill] sm:$0xff] %v4614_v25 }
 0x256   : > { %v4616_v8 = vpop.f32.mrf.mxu3 }
 0x259   : > { %v1585_v51 = vpop.f32.mrf.mxu2 }
 0x25a   : > { %v4604_v27 = vadd.f32 %v1585_v51, %v1497_v60  ;;  %v4626_v48 = vpop.f32.mrf.mxu1 }
 0x25b   : > { %5378 = vst [vmem:[#allocation104_spill] sm:$0xff] %v4626_v48 }
 0x25e   : > { %1627 = vmatmul.bf16.gmra.mxu2 %v4207_v5  ;;  %2072 = vmatmul.bf16.gmra.mxu3 %v4307_v12  ;;  %v1502_v5 = vadd.f32 %v4542_v45, %v4257_v52  ;;  %v4622_v12 = vpop.f32.mrf.mxu0  ;;  %v4628_v19 = vpop.f32.mrf.mxu3 }
 0x25f   : > { %2156 = vmatmul.bf16.gmra.mxu0 %v4233_v40  ;;  %2210 = vmatmul.bf16.gmra.mxu1 %v4086_v54 }
 0x261   : > { %v1588_v47 = vpop.f32.mrf.mxu2 }
 0x262   : > { %v4618_v51 = vadd.f32 %v1588_v47, %v1500_v35  ;;  %v5379_v35 = vld [vmem:[#allocation29_spill] sm:$0xff]  ;;  %v4640_v48 = vpop.f32.mrf.mxu1 }
 0x263   : > { %v1505_v52 = vadd.f32 %v4542_v45, %v5379_v35  ;;  %5381 = vst [vmem:[#allocation105_spill] sm:$0xff] %v4640_v48  ;;  %v5385_v35 = vld [vmem:[#allocation9_spill] sm:$0xff] }
 0x266   : > { %v4642_v25 = vpop.f32.mrf.mxu3 }
 0x269   : > { %v1590_v60 = vpop.f32.mrf.mxu2 }
 0x26a   : > { %v4624_v15 = vadd.f32 %v1590_v60, %v1502_v5  ;;  %v4638_v60 = vpop.f32.mrf.mxu0  ;;  %v4652_v26 = vpop.f32.mrf.mxu1 }
 0x26b   : > { %5384 = vst [vmem:[#allocation106_spill] sm:$0xff] %v4652_v26 }
 0x26c   : > { %5377 = vst [vmem:[#allocation103_spill] sm:$0xff] %v4624_v15 }
 0x26e   : > { %1632 = vmatmul.bf16.gmra.mxu2 %v4233_v40  ;;  %2077 = vmatmul.bf16.gmra.mxu3 %v4339_v49  ;;  %v5382_v40 = vld [vmem:[#allocation33_spill] sm:$0xff]  ;;  %v4658_v48 = vpop.f32.mrf.mxu3 }
 0x26f   : > { %2161 = vmatmul.bf16.gmra.mxu0 %v4271_v58  ;;  %2215 = vmatmul.bf16.gmra.mxu1 %v4105_v31  ;;  %v1507_v49 = vadd.f32 %v4542_v45, %v5382_v40 }
 0x271   : > { %v1593_v47 = vpop.f32.mrf.mxu2 }
 0x272   : > { %v4636_v5 = vadd.f32 %v1593_v47, %v1505_v52  ;;  %v4648_v61 = vpop.f32.mrf.mxu0  ;;  %v5386_v52 = vld [vmem:[#allocation36_spill] sm:$0xff] }
 0x273   : > { %v1510_v47 = vadd.f32 %v4542_v45, %v5386_v52  ;;  %v5392_v52 = vld [vmem:[#allocation10_spill] sm:$0xff] }
 0x274   : > { %5380 = vst [vmem:[#allocation29_spill] sm:$0xff] %v4636_v5 }
 0x276   : > { %v4668_v5 = vpop.f32.mrf.mxu3 }
 0x279   : > { %v1595_v28 = vpop.f32.mrf.mxu2 }
 0x27a   : > { %v4646_v30 = vadd.f32 %v1595_v28, %v1507_v49  ;;  %v4662_v49 = vpop.f32.mrf.mxu0 }
 0x27c   : > { %5383 = vst [vmem:[#allocation33_spill] sm:$0xff] %v4646_v30  ;;  %v5388_v30 = vld [vmem:[#allocation40_spill] sm:$0xff] }
 0x27d   : > { %5390 = vst [vmem:[#allocation40_spill] sm:$0xff] %v4668_v5 }
 0x27e   : > { %1637 = vmatmul.bf16.gmra.mxu2 %v4271_v58  ;;  %2082 = vmatmul.bf16.gmra.mxu3 %v4365_v24  ;;  %v1512_v58 = vadd.f32 %v4542_v45, %v5388_v30  ;;  %v4666_v24 = vpop.f32.mrf.mxu1 }
 0x27f   : > { %2166 = vmatmul.bf16.gmra.mxu0 %v4297_v13  ;;  %2220 = vmatmul.bf16.gmra.mxu1 %v5385_v35  ;;  %5389 = vst [vmem:[#allocation36_spill] sm:$0xff] %v4666_v24 }
 0x281   : > { %v1598_v40 = vpop.f32.mrf.mxu2 }
 0x282   : > { %v4660_v28 = vadd.f32 %v1598_v40, %v1510_v47  ;;  %v1515_v47 = vadd.f32 %v4542_v45, %v4327_v18  ;;  %v4678_v40 = vpop.f32.mrf.mxu0 }
 0x284   : > { %5387 = vst [vmem:[#allocation9_spill] sm:$0xff] %v4660_v28 }
 0x286   : > { %v4682_v28 = vpop.f32.mrf.mxu1 }
 0x287   : > { %5394 = vst [vmem:[#allocation108_spill] sm:$0xff] %v4682_v28 }
 0x289   : > { %v1600_v26 = vpop.f32.mrf.mxu2 }
 0x28a   : > { %v4670_v15 = vadd.f32 %v1600_v26, %v1512_v58  ;;  %v4684_v26 = vpop.f32.mrf.mxu3 }
 0x28c   : > { %5391 = vst [vmem:[#allocation107_spill] sm:$0xff] %v4670_v15  ;;  %v4690_v15 = vpop.f32.mrf.mxu0 }
 0x28d   : > { %5396 = vst [vmem:[#allocation110_spill] sm:$0xff] %v4690_v15  ;;  %v5404_v15 = vld [vmem:[#allocation20_spill] sm:$0xff] }
 0x28e   : > { %1642 = vmatmul.bf16.gmra.mxu2 %v4297_v13  ;;  %2087 = vmatmul.bf16.gmra.mxu3 %v4393_v41  ;;  %v1517_v13 = vadd.f32 %v4542_v45, %v4353_v38  ;;  %v4692_v5 = vpop.f32.mrf.mxu1  ;;  %v1520_v38 = vadd.f32 %v4542_v45, %v4359_v17  ;;  %v1525_v17 = vadd.f32 %v4542_v45, %v4401_v62 }
 0x28f   : > { %2171 = vmatmul.bf16.gmra.mxu0 %v4333_v22  ;;  %2225 = vmatmul.bf16.gmra.mxu1 %v5392_v52  ;;  %5397 = vst [vmem:[#allocation111_spill] sm:$0xff] %v4692_v5  ;;  %v1522_v5 = vadd.f32 %v4542_v45, %v4378_v39  ;;  %v1527_v39 = vadd.f32 %v4542_v45, %v4409_v59 }
 0x290   : > { %v1530_v62 = vadd.f32 %v4542_v45, %v4419_v46  ;;  %v1532_v59 = vadd.f32 %v4542_v45, %v4427_v36  ;;  %v1535_v46 = vadd.f32 %v4542_v45, %v4437_v14 }
 0x291   : > { %v1603_v30 = vpop.f32.mrf.mxu2 }
 0x292   : > { %v4680_v24 = vadd.f32 %v1603_v30, %v1515_v47  ;;  %v4694_v18 = vpop.f32.mrf.mxu3  ;;  %v5399_v47 = vld [vmem:[#allocation15_spill] sm:$0xff] }
 0x293   : > { %5398 = vst [vmem:[#allocation112_spill] sm:$0xff] %v4694_v18 }
 0x294   : > { %5393 = vst [vmem:[#allocation10_spill] sm:$0xff] %v4680_v24  ;;  %v5403_v24 = vld [vmem:[#allocation8_spill] sm:$0xff] }
 0x296   : > { %v4706_v28 = vpop.f32.mrf.mxu1 }
 0x297   : > { %5401 = vst [vmem:[#allocation113_spill] sm:$0xff] %v4706_v28 }
 0x299   : > { %v1605_v41 = vpop.f32.mrf.mxu2 }
 0x29a   : > { %v4688_v58 = vadd.f32 %v1605_v41, %v1517_v13  ;;  %v4704_v41 = vpop.f32.mrf.mxu0 }
 0x29c   : > { %5395 = vst [vmem:[#allocation109_spill] sm:$0xff] %v4688_v58 }
 0x29e   : > { %1647 = vmatmul.bf16.gmra.mxu2 %v4333_v22  ;;  %2092 = vmatmul.bf16.gmra.mxu3 %v5325_v37 }
 0x29f   : > { %2176 = vmatmul.bf16.gmra.mxu0 %v4361_v50  ;;  %2230 = vmatmul.bf16.gmra.mxu1 %v5399_v47 }
 0x2a1   : > { %v1608_v30 = vpop.f32.mrf.mxu2 }
 0x2a2   : > { %v4702_v13 = vadd.f32 %v1608_v30, %v1520_v38  ;;  %v4713_v18 = vpop.f32.mrf.mxu0  ;;  %v4719_v38 = vpop.f32.mrf.mxu1 }
 0x2a3   : > { %5405 = vst [vmem:[#allocation8_spill] sm:$0xff] %v4719_v38 }
 0x2a4   : > { %5400 = vst [vmem:[#allocation15_spill] sm:$0xff] %v4702_v13 }
 0x2a9   : > { %v1610_v22 = vpop.f32.mrf.mxu2 }
 0x2aa   : > { %v4710_v58 = vadd.f32 %v1610_v22, %v1522_v5 }
 0x2ac   : > { %5402 = vst [vmem:[#allocation114_spill] sm:$0xff] %v4710_v58  ;;  %v5407_v58 = vld [vmem:[#allocation25_spill] sm:$0xff] }
 0x2ae   : > { %1928 = vmatmul.bf16.vlgmr.msra.gmra.mxu2 %v5403_v24  ;;  %v4727_v24 = vpop.f32.mrf.mxu1 }
 0x2af   : > { %2235 = vmatmul.bf16.gmra.mxu1 %v5404_v15  ;;  %2181 = vmatmul.bf16.gmra.mxu0 %v5325_v37  ;;  %5406 = vst [vmem:[#allocation20_spill] sm:$0xff] %v4727_v24 }
 0x2b1   : > { %v1613_v30 = vpop.f32.mrf.mxu2 }
 0x2b2   : > { %v4721_v28 = vadd.f32 %v1613_v30, %v1525_v17 }
 0x2b6   : > { %v4735_v17 = vpop.f32.mrf.mxu1 }
 0x2b7   : > { %5408 = vst [vmem:[#allocation25_spill] sm:$0xff] %v4735_v17 }
 0x2b9   : > { %v1615_v5 = vpop.f32.mrf.mxu2 }
 0x2ba   : > { %v4725_v22 = vadd.f32 %v1615_v5, %v1527_v39 }
 0x2be   : > { %1933 = vmatmul.bf16.gmra.mxu2 %v4025_v33  ;;  %v4742_v5 = vpop.f32.mrf.mxu1  ;;  %v5410_v33 = vld [vmem:[#allocation31_spill] sm:$0xff] }
 0x2bf   : > { %2240 = vmatmul.bf16.gmra.mxu1 %v5407_v58  ;;  %5409 = vst [vmem:[#allocation115_spill] sm:$0xff] %v4742_v5 }
 0x2c1   : > { %v1618_v13 = vpop.f32.mrf.mxu2 }
 0x2c2   : > { %v4733_v38 = vadd.f32 %v1618_v13, %v1530_v62  ;;  %v1537_v62 = vadd.f32 %v4542_v45, %v4445_v23  ;;  %v1542_v23 = vadd.f32 %v4542_v45, %v4463_v20  ;;  %v1547_v20 = vadd.f32 %v4542_v45, %v4481_v0 }
 0x2c3   : > { %v1552_v0 = vadd.f32 %v4542_v45, %v4501_v34 }
 0x2c6   : > { %v4751_v17 = vpop.f32.mrf.mxu1 }
 0x2c9   : > { %v1620_v30 = vpop.f32.mrf.mxu2 }
 0x2ca   : > { %v4739_v39 = vadd.f32 %v1620_v30, %v1532_v59  ;;  %v1540_v30 = vadd.f32 %v4542_v45, %v4457_v32  ;;  %v1545_v32 = vadd.f32 %v4542_v45, %v4475_v55 }
 0x2ce   : > { %1938 = vmatmul.bf16.gmra.mxu2 %v4044_v56  ;;  %v5412_v56 = vld [vmem:[#allocation38_spill] sm:$0xff] }
 0x2cf   : > { %2245 = vmatmul.bf16.gmra.mxu1 %v5410_v33 }
 0x2d1   : > { %v1623_v24 = vpop.f32.mrf.mxu2 }
 0x2d2   : > { %v4747_v13 = vadd.f32 %v1623_v24, %v1535_v46  ;;  %v4761_v24 = vpop.f32.mrf.mxu1 }
 0x2d4   : > { %5411 = vst [vmem:[#allocation31_spill] sm:$0xff] %v4747_v13 }
 0x2d9   : > { %v1625_v36 = vpop.f32.mrf.mxu2 }
 0x2da   : > { %v4753_v59 = vadd.f32 %v1625_v36, %v1537_v62  ;;  %v4767_v62 = vpop.f32.mrf.mxu1 }
 0x2de   : > { %1943 = vmatmul.bf16.gmra.mxu2 %v4065_v21  ;;  %v5415_v21 = vld [vmem:[#allocation44_spill] sm:$0xff] }
 0x2df   : > { %2250 = vmatmul.bf16.gmra.mxu1 %v5412_v56 }
 0x2e1   : > { %v1628_v5 = vpop.f32.mrf.mxu2 }
 0x2e2   : > { %v4759_v14 = vadd.f32 %v1628_v5, %v1540_v30  ;;  %v4775_v30 = vpop.f32.mrf.mxu1 }
 0x2e4   : > { %5413 = vst [vmem:[#allocation38_spill] sm:$0xff] %v4759_v14 }
 0x2e9   : > { %v1630_v46 = vpop.f32.mrf.mxu2 }
 0x2ea   : > { %v4765_v13 = vadd.f32 %v1630_v46, %v1542_v23  ;;  %v4785_v46 = vpop.f32.mrf.mxu1 }
 0x2ec   : > { %5414 = vst [vmem:[#allocation116_spill] sm:$0xff] %v4765_v13 }
 0x2ee   : > { %1948 = vmatmul.bf16.gmra.mxu2 %v4086_v54  ;;  %v1550_v54 = vadd.f32 %v4542_v45, %v4493_v42 }
 0x2ef   : > { %2255 = vmatmul.bf16.gmra.mxu1 %v5415_v21 }
 0x2f1   : > { %v1633_v36 = vpop.f32.mrf.mxu2 }
 0x2f2   : > { %v4773_v5 = vadd.f32 %v1633_v36, %v1545_v32  ;;  %v5418_v36 = vshll.u32 %v4361_v50, 16  ;;  %v4797_v13 = vpop.f32.mrf.mxu1 }
 0x2f4   : > { %5416 = vst [vmem:[#allocation44_spill] sm:$0xff] %v4773_v5  ;;  %v987_v5 = vrot.slane %v5418_v36, 1 }
 0x2f9   : > { %v1635_v14 = vpop.f32.mrf.mxu2 }
 0x2fa   : > { %v4779_v23 = vadd.f32 %v1635_v14, %v1547_v20  ;;  %v4809_v36 = vpop.f32.mrf.mxu1 }
 0x2fc   : > { %5417 = vst [vmem:[#allocation117_spill] sm:$0xff] %v4779_v23 }
 0x2fe   : > { %1953 = vmatmul.bf16.gmra.mxu2 %v4105_v31  ;;  %v5420_v31 = vshrl.u32 %v4361_v50, 16  ;;  %v1557_v50 = vadd.f32 %v4542_v45, %v4517_v11 }
 0x2ff   : > { %2260 = vmatmul.bf16.gmra.mxu1 %v4369_v44 }
 0x300   : > { %v988_v23 = vor.u32 %v987_v5, %v5420_v31 }
 0x301   : > { %v1638_v55 = vpop.f32.mrf.mxu2 }
 0x302   : > { %v4787_v32 = vadd.f32 %v1638_v55, %v1550_v54  ;;  %v4802_v42 = vsel %vm3995_vm7, %v988_v23, 0  ;;  %v1555_v54 = vadd.f32 %v4542_v45, %v4511_v6  ;;  %v4816_v4 = vpop.f32.mrf.mxu1  ;;  %v1560_v6 = vadd.f32 %v4542_v45, %v4527_v53 }
 0x309   : > { %v1640_v14 = vpop.f32.mrf.mxu2 }
 0x30a   : > { %v4793_v20 = vadd.f32 %v1640_v14, %v1552_v0  ;;  %v1562_v14 = vadd.f32 %v4542_v45, %v4535_v43 }
 0x30c   : > { %5419 = vst [vmem:[#allocation118_spill] sm:$0xff] %v4793_v20 }
 0x30e   : > { %1958 = vmatmul.bf16.gmra.mxu2 %v5385_v35 }
 0x30f   : > { %2265 = vmatmul.bf16.gmra.mxu1 %v4802_v42 }
 0x311   : > { %v1643_v34 = vpop.f32.mrf.mxu2 }
 0x312   : > { %v4807_v55 = vadd.f32 %v1643_v34, %v1555_v54 }
 0x314   : > { %5421 = vst [vmem:[#allocation119_spill] sm:$0xff] %v4807_v55 }
 0x319   : > { %v1645_v5 = vpop.f32.mrf.mxu2 }
 0x31a   : > { %v4813_v0 = vadd.f32 %v1645_v5, %v1557_v50  ;;  %v5426_v50 = vld [vmem:[#allocation12_spill] sm:$0xff]  ;;  %v5427_v5 = vld [vmem:[#allocation14_spill] sm:$0xff] }
 0x31c   : > { %5422 = vst [vmem:[#allocation120_spill] sm:$0xff] %v4813_v0  ;;  %v5430_v0 = vld [vmem:[#allocation19_spill] sm:$0xff] }
 0x31e   : > { %1963 = vmatmul.bf16.gmra.mxu2 %v5392_v52  ;;  %v5425_v52 = vld [vmem:[#allocation11_spill] sm:$0xff] }
 0x31f   : > { %2270 = vmatmul.bf16.gmra.mxu1 %v5325_v37  ;;  %v1663_v54 = vadd.f32 %v5425_v52, %v4554_v3  ;;  %v1487_v37 = vadd.f32 %v4542_v45, %v5426_v50  ;;  %v5431_v3 = vld [vmem:[#allocation17_spill] sm:$0xff]  ;;  %v5432_v45 = vld [vmem:[#allocation18_spill] sm:$0xff] }
 0x321   : > { %v1648_v35 = vpop.f32.mrf.mxu2  ;;  %v1752_v53 = vadd.f32 %v5427_v5, %v1663_v54 }
 0x322   : > { %v4821_v23 = vadd.f32 %v1648_v35, %v1560_v6  ;;  %v1576_v6 = vadd.f32 %v4560_v16, %v1487_v37  ;;  %v5428_v35 = vld [vmem:[#allocation16_spill] sm:$0xff]  ;;  %v1670_v16 = vadd.f32 %v5432_v45, %v4580_v63 }
 0x323   : > { %v1841_v43 = vadd.f32 %v4389_v1, %v1752_v53  ;;  %v4851_v53 = vpop.f32.mrf.mxu3 }
 0x324   : > { %5423 = vst [vmem:[#allocation121_spill] sm:$0xff] %v4821_v23  ;;  %v1668_v23 = vadd.f32 %v5428_v35, %v4572_v7  ;;  %v4859_v35 = vpop.f32.mrf.mxu1 }
 0x326   : > { %v1757_v55 = vadd.f32 %v5430_v0, %v1668_v23  ;;  %v5433_v23 = vld [vmem:[#allocation22_spill] sm:$0xff] }
 0x327   : > { %v1759_v5 = vadd.f32 %v5433_v23, %v1670_v16 }
 0x328   : > { %v1846_v54 = vadd.f32 %v4411_v10, %v1757_v55 }
 0x329   : > { %v1650_v31 = vpop.f32.mrf.mxu2 }
 0x32a   : > { %v4825_v11 = vadd.f32 %v1650_v31, %v1562_v14  ;;  %v5429_v14 = vld [vmem:[#allocation13_spill] sm:$0xff] }
 0x32b   : > { %v1665_v31 = vadd.f32 %v5429_v14, %v1576_v6 }
 0x32c   : > { %5424 = vst [vmem:[#allocation122_spill] sm:$0xff] %v4825_v11 }
 0x32d   : > { %v1754_v52 = vadd.f32 %v5431_v3, %v1665_v31 }
 0x32e   : > { %1968 = vmatmul.bf16.gmra.mxu2 %v5399_v47 }
 0x32f   : > { %v1843_v7 = vadd.f32 %v4403_v57, %v1754_v52  ;;  %v1848_v57 = vadd.f32 %v4423_v2, %v1759_v5 }
 0x331   : > { %v1929_v34 = vpop.f32.mrf.mxu2 }
 0x332   : > { %v1930_v47 = vadd.f32 %v1929_v34, %v1841_v43  ;;  %v5434_v43 = vld [vmem:[#allocation21_spill] sm:$0xff] }
 0x334   : > { %v2019_v20 = vadd.f32 %v4602_v9, %v1930_v47 }
 0x336   : > { %v2108_v50 = vadd.f32 %v4622_v12, %v2019_v20  ;;  %v4856_v12 = vpop.f32.mrf.mxu0 }
 0x338   : > { %v2197_v9 = vadd.f32 %v4751_v17, %v2108_v50  ;;  %v5436_v50 = vld [vmem:[#allocation23_spill] sm:$0xff] }
 0x339   : > { %v1931_v11 = vpop.f32.mrf.mxu2 }
 0x33a   : > { %v1932_v34 = vadd.f32 %v1931_v11, %v1843_v7  ;;  %v2276_v20 = vmax.f32 %v2197_v9, 0.0  ;;  %v5435_v7 = vld [vmem:[#allocation24_spill] sm:$0xff] }
 0x33c   : > { %v2021_v63 = vadd.f32 %v4616_v8, %v1932_v34  ;;  %v1673_v8 = vadd.f32 %v5434_v43, %v4594_v29 }
 0x33e   : > { %1973 = vmatmul.bf16.gmra.mxu2 %v5404_v15  ;;  %v2110_v6 = vadd.f32 %v4638_v60, %v2021_v63  ;;  %v1762_v29 = vadd.f32 %v5435_v7, %v1673_v8  ;;  %v5439_v8 = vld [vmem:[#allocation26_spill] sm:$0xff] }
 0x340   : > { %v2199_v47 = vadd.f32 %v4761_v24, %v2110_v6 }
 0x341   : > { %v1934_v1 = vpop.f32.mrf.mxu2 }
 0x342   : > { %v1935_v37 = vadd.f32 %v1934_v1, %v1846_v54  ;;  %v4867_v54 = vpop.f32.mrf.mxu3  ;;  %v2277_v24 = vmax.f32 %v2199_v47, 0.0 }
 0x344   : > { %v2024_v0 = vadd.f32 %v4628_v19, %v1935_v37  ;;  %v1675_v37 = vadd.f32 %v5436_v50, %v4604_v27 }
 0x346   : > { %v2113_v15 = vadd.f32 %v4648_v61, %v2024_v0 }
 0x348   : > { %v2202_v10 = vadd.f32 %v4767_v62, %v2113_v15 }
 0x349   : > { %v1936_v55 = vpop.f32.mrf.mxu2 }
 0x34a   : > { %v2278_v11 = vmax.f32 %v2202_v10, 0.0  ;;  %v1937_v19 = vadd.f32 %v1936_v55, %v1848_v57  ;;  %v5437_v10 = vld [vmem:[#allocation58_spill] sm:$0xff]  ;;  %v4881_v7 = vpop.f32.mrf.mxu3 }
 0x34b   : > { %v1851_v57 = vadd.f32 %v5437_v10, %v1762_v29 }
 0x34c   : > { %v2308_v17 = vmax.f32 %v2276_v20, %v2278_v11  ;;  %v2026_v61 = vadd.f32 %v4642_v25, %v1937_v19  ;;  %v5438_v19 = vld [vmem:[#allocation27_spill] sm:$0xff] }
 0x34d   : > { %v1764_v27 = vadd.f32 %v5438_v19, %v1675_v37 }
 0x34e   : > { %v2340_v14 = vrot.slane %v2308_v17, 2  ;;  %v2341_v62 = vrot.slane %v2308_v17, 4  ;;  %v2342_v31 = vrot.slane %v2308_v17, 6  ;;  %v3502_v2 = vrot.slane %v2308_v17, 9  ;;  %1978 = vmatmul.bf16.gmra.mxu2 %v5407_v58 }
 0x34f   : > { %v2115_v3 = vadd.f32 %v4662_v49, %v2026_v61  ;;  %v4873_v49 = vpop.f32.mrf.mxu0 }
 0x350   : > { %v3503_v52 = vrot.slane %v2340_v14, 9  ;;  %v3504_v60 = vrot.slane %v2341_v62, 9  ;;  %v3505_v45 = vrot.slane %v2342_v31, 9  ;;  %v2628_v16 = vmax.f32 %v2308_v17, %v3502_v2 }
 0x351   : > { %v2204_v25 = vadd.f32 %v4775_v30, %v2115_v3  ;;  %v1939_v1 = vpop.f32.mrf.mxu2  ;;  %v4876_v30 = vpop.f32.mrf.mxu1 }
 0x352   : > { %v2629_v34 = vmax.f32 %v2340_v14, %v3503_v52  ;;  %v2630_v58 = vmax.f32 %v2341_v62, %v3504_v60  ;;  %v2631_v0 = vmax.f32 %v2342_v31, %v3505_v45  ;;  %v2692_v5 = vpack.c.bf16 %v2628_v16, %v2628_v16 }
 0x353   : > { %v2279_v23 = vmax.f32 %v2204_v25, 0.0  ;;  %v1678_v14 = vadd.f32 %v5439_v8, %v4618_v51  ;;  %v1940_v25 = vadd.f32 %v1939_v1, %v1851_v57  ;;  %v5444_v8 = vld [vmem:[#allocation62_spill] sm:$0xff] }
 0x354   : > { %v2693_v9 = vpack.c.bf16 %v2629_v34, %v2629_v34  ;;  %v2694_v15 = vpack.c.bf16 %v2630_v58, %v2630_v58  ;;  %v2695_v55 = vpack.c.bf16 %v2631_v0, %v2631_v0  ;;  %v2820_v62 = vunpack.c.l.b16 %v2692_v5  ;;  %v5440_v58 = vld [vmem:[#allocation60_spill] sm:$0xff] }
 0x355   : > { %v2309_v63 = vmax.f32 %v2277_v24, %v2279_v23  ;;  %v1853_v0 = vadd.f32 %v5440_v58, %v1764_v27  ;;  %v5441_v24 = vld [vmem:[#allocation30_spill] sm:$0xff]  ;;  %v2029_v57 = vadd.f32 %v4658_v48, %v1940_v25  ;;  %v5442_v27 = vld [vmem:[#allocation103_spill] sm:$0xff] }
 0x356   : > { %v2821_v20 = vunpack.c.l.b16 %v2693_v9  ;;  %v2822_v11 = vunpack.c.l.b16 %v2694_v15  ;;  %v2823_v45 = vunpack.c.l.b16 %v2695_v55  ;;  %v1767_v23 = vadd.f32 %v5441_v24, %v1678_v14 }
 0x357   : > { %v2343_v6 = vrot.slane %v2309_v63, 2  ;;  %v2344_v17 = vrot.slane %v2309_v63, 4  ;;  %v2345_v61 = vrot.slane %v2309_v63, 6  ;;  %v3506_v43 = vrot.slane %v2309_v63, 9 }
 0x358   : > { %v2884_v31 = vrot.slane %v2821_v20, 7  ;;  %v2887_v16 = vrot.slane %v2822_v11, 6  ;;  %v2890_v55 = vrot.slane %v2823_v45, 5  ;;  %v1856_v14 = vadd.f32 %v5444_v8, %v1767_v23  ;;  %v5446_v23 = vld [vmem:[#allocation40_spill] sm:$0xff] }
 0x359   : > { %v3507_v2 = vrot.slane %v2343_v6, 9  ;;  %v3508_v47 = vrot.slane %v2344_v17, 9  ;;  %v3509_v3 = vrot.slane %v2345_v61, 9  ;;  %v2632_v52 = vmax.f32 %v2309_v63, %v3506_v43  ;;  %v1941_v60 = vpop.f32.mrf.mxu2  ;;  %v4886_v63 = vpop.f32.mrf.mxu0 }
 0x35a   : > { %v2886_v29 = vsel %vm2885_vm8, %v2884_v31, %v2820_v62 }
 0x35b   : > { %v2633_v50 = vmax.f32 %v2343_v6, %v3507_v2  ;;  %v2634_v37 = vmax.f32 %v2344_v17, %v3508_v47  ;;  %v2635_v51 = vmax.f32 %v2345_v61, %v3509_v3  ;;  %v2696_v34 = vpack.c.bf16 %v2632_v52, %v2632_v52  ;;  %v5443_v6 = vld [vmem:[#allocation28_spill] sm:$0xff]  ;;  %v4894_v61 = vpop.f32.mrf.mxu1 }
 0x35c   : > { %v2889_v1 = vsel %vm2888_vm9, %v2887_v16, %v2886_v29  ;;  %v1680_v17 = vadd.f32 %v5443_v6, %v5442_v27  ;;  %v2118_v47 = vadd.f32 %v4678_v40, %v2029_v57  ;;  %v1942_v16 = vadd.f32 %v1941_v60, %v1853_v0  ;;  %v5447_v60 = vld [vmem:[#allocation65_spill] sm:$0xff]  ;;  %v5451_v6 = vld [vmem:[#allocation32_spill] sm:$0xff] }
 0x35d   : > { %v2697_v5 = vpack.c.bf16 %v2633_v50, %v2633_v50  ;;  %v2698_v9 = vpack.c.bf16 %v2634_v37, %v2634_v37  ;;  %v2699_v15 = vpack.c.bf16 %v2635_v51, %v2635_v51  ;;  %v2824_v10 = vunpack.c.l.b16 %v2696_v34  ;;  %v5445_v50 = vld [vmem:[#allocation34_spill] sm:$0xff]  ;;  %v4906_v51 = vpop.f32.mrf.mxu3  ;;  %v5450_v27 = vld [vmem:[#allocation29_spill] sm:$0xff] }
 0x35e   : > { %1983 = vmatmul.bf16.gmra.mxu2 %v5410_v33  ;;  %v2892_v62 = vsel %vm2891_vm10, %v2890_v55, %v2889_v1  ;;  %v1769_v37 = vadd.f32 %v5445_v50, %v1680_v17  ;;  %v2207_v24 = vadd.f32 %v4785_v46, %v2118_v47  ;;  %v5448_v55 = vld [vmem:[#allocation110_spill] sm:$0xff]  ;;  %v1683_v17 = vadd.f32 %v5451_v6, %v5450_v27 }
 0x35f   : > { %v2825_v20 = vunpack.c.l.b16 %v2697_v5  ;;  %v2826_v11 = vunpack.c.l.b16 %v2698_v9  ;;  %v2827_v19 = vunpack.c.l.b16 %v2699_v15  ;;  %v2893_v43 = vrot.slane %v2824_v10, 4 }
 0x360   : > { %v2031_v5 = vadd.f32 %v5446_v23, %v1942_v16  ;;  %v1858_v0 = vadd.f32 %v5447_v60, %v1769_v37  ;;  %v2280_v10 = vmax.f32 %v2207_v24, 0.0  ;;  %v5452_v37 = vld [vmem:[#allocation37_spill] sm:$0xff] }
 0x361   : > { %v2896_v48 = vrot.slane %v2825_v20, 3  ;;  %v2899_v31 = vrot.slane %v2826_v11, 2  ;;  %v1944_v33 = vpop.f32.mrf.mxu2  ;;  %v2895_v2 = vsel %vm2894_vm11, %v2893_v43, %v2892_v62  ;;  %v2902_v45 = vrot.slane %v2827_v19, 1  ;;  %v4912_v9 = vpop.f32.mrf.mxu0  ;;  %v5449_v11 = vld [vmem:[#allocation112_spill] sm:$0xff] }
 0x362   : > { %v1945_v3 = vadd.f32 %v1944_v33, %v1856_v14 }
 0x363   : > { %v2898_v52 = vsel %vm2897_vm12, %v2896_v48, %v2895_v2  ;;  %v4919_v1 = vpop.f32.mrf.mxu1 }
 0x364   : > { %v2901_v25 = vsel %vm2900_vm13, %v2899_v31, %v2898_v52  ;;  %v2034_v29 = vadd.f32 %v4684_v26, %v1945_v3 }
 0x365   : > { %v2904_v34 = vsel %vm2903_vm14, %v2902_v45, %v2901_v25  ;;  %v4926_v62 = vpop.f32.mrf.mxu3 }
 0x366   : > { %v3003_v58 = vpack.c.b16 %v2904_v34, %v2904_v34  ;;  %v2123_v40 = vadd.f32 %v4704_v41, %v2034_v29  ;;  %v2120_v41 = vadd.f32 %v5448_v55, %v2031_v5  ;;  %v5454_v55 = vld [vmem:[#allocation33_spill] sm:$0xff] }
 0x368   : > { %3019 = vst [vmem:[%s4914_s14] sm:$0xf] %v3003_v58  ;;  %v2212_v26 = vadd.f32 %v4809_v36, %v2123_v40  ;;  %v2209_v48 = vadd.f32 %v4797_v13, %v2120_v41  ;;  %v5455_v41 = vld [vmem:[#allocation35_spill] sm:$0xff] }
 0x369   : > { %v1946_v15 = vpop.f32.mrf.mxu2  ;;  %v4931_v16 = vpop.f32.mrf.mxu0 }
 0x36a   : > { %v2282_v57 = vmax.f32 %v2212_v26, 0.0  ;;  %v1947_v46 = vadd.f32 %v1946_v15, %v1858_v0  ;;  %v2281_v34 = vmax.f32 %v2209_v48, 0.0 }
 0x36b   : > { %v4934_v24 = vpop.f32.mrf.mxu1 }
 0x36c   : > { %v2310_v20 = vmax.f32 %v2280_v10, %v2282_v57  ;;  %v2036_v19 = vadd.f32 %v5449_v11, %v1947_v46  ;;  %v5456_v11 = vld [vmem:[#allocation9_spill] sm:$0xff] }
 0x36e   : > { %v2346_v43 = vrot.slane %v2310_v20, 2  ;;  %v2347_v8 = vrot.slane %v2310_v20, 4  ;;  %v2348_v14 = vrot.slane %v2310_v20, 6  ;;  %v3510_v36 = vrot.slane %v2310_v20, 9  ;;  %1988 = vmatmul.bf16.gmra.mxu2 %v5412_v56 }
 0x36f   : > { %v2125_v31 = vadd.f32 %v4713_v18, %v2036_v19  ;;  %v1772_v56 = vadd.f32 %v5452_v37, %v1683_v17  ;;  %v5457_v19 = vld [vmem:[#allocation39_spill] sm:$0xff] }
 0x370   : > { %v3511_v33 = vrot.slane %v2346_v43, 9  ;;  %v3512_v2 = vrot.slane %v2347_v8, 9  ;;  %v3513_v47 = vrot.slane %v2348_v14, 9  ;;  %v2636_v3 = vmax.f32 %v2310_v20, %v3510_v36 }
 0x371   : > { %v2214_v52 = vadd.f32 %v4816_v4, %v2125_v31  ;;  %v1949_v45 = vpop.f32.mrf.mxu2  ;;  %v5453_v4 = vld [vmem:[#allocation68_spill] sm:$0xff]  ;;  %v1685_v20 = vadd.f32 %v5455_v41, %v5454_v55  ;;  %v1688_v27 = vadd.f32 %v5457_v19, %v5456_v11  ;;  %v5462_v11 = vld [vmem:[#allocation73_spill] sm:$0xff] }
 0x372   : > { %v2637_v25 = vmax.f32 %v2346_v43, %v3511_v33  ;;  %v2638_v29 = vmax.f32 %v2347_v8, %v3512_v2  ;;  %v2639_v50 = vmax.f32 %v2348_v14, %v3513_v47  ;;  %v2700_v13 = vpack.c.bf16 %v2636_v3, %v2636_v3  ;;  %v4941_v43 = vpop.f32.mrf.mxu3 }
 0x373   : > { %v2283_v58 = vmax.f32 %v2214_v52, 0.0  ;;  %v1861_v0 = vadd.f32 %v5453_v4, %v1772_v56  ;;  %v5458_v56 = vld [vmem:[#allocation43_spill] sm:$0xff] }
 0x374   : > { %v2701_v18 = vpack.c.bf16 %v2637_v25, %v2637_v25  ;;  %v2702_v40 = vpack.c.bf16 %v2638_v29, %v2638_v29  ;;  %v2703_v5 = vpack.c.bf16 %v2639_v50, %v2639_v50  ;;  %v2828_v6 = vunpack.c.l.b16 %v2700_v13  ;;  %v4944_v50 = vpop.f32.mrf.mxu0 }
 0x375   : > { %v2311_v23 = vmax.f32 %v2281_v34, %v2283_v58  ;;  %v1950_v47 = vadd.f32 %v1949_v45, %v1861_v0  ;;  %v1777_v34 = vadd.f32 %v5458_v56, %v1688_v27 }
 0x376   : > { %v2829_v26 = vunpack.c.l.b16 %v2701_v18  ;;  %v2830_v60 = vunpack.c.l.b16 %v2702_v40  ;;  %v2831_v33 = vunpack.c.l.b16 %v2703_v5  ;;  %v5459_v40 = vld [vmem:[#allocation41_spill] sm:$0xff] }
 0x377   : > { %v2349_v15 = vrot.slane %v2311_v23, 2  ;;  %v2350_v10 = vrot.slane %v2311_v23, 4  ;;  %v2351_v57 = vrot.slane %v2311_v23, 6  ;;  %v3514_v46 = vrot.slane %v2311_v23, 9 }
 0x378   : > { %v2905_v17 = vrot.slane %v2829_v26, 7  ;;  %v2907_v2 = vrot.slane %v2830_v60, 6  ;;  %v1774_v26 = vadd.f32 %v5459_v40, %v1685_v20  ;;  %v2039_v60 = vadd.f32 %v4851_v53, %v1950_v47  ;;  %v5465_v40 = vld [vmem:[#allocation76_spill] sm:$0xff] }
 0x379   : > { %v3515_v8 = vrot.slane %v2349_v15, 9  ;;  %v3516_v14 = vrot.slane %v2350_v10, 9  ;;  %v3517_v36 = vrot.slane %v2351_v57, 9  ;;  %v2640_v48 = vmax.f32 %v2311_v23, %v3514_v46  ;;  %v1951_v31 = vpop.f32.mrf.mxu2  ;;  %v4948_v23 = vpop.f32.mrf.mxu1  ;;  %v5461_v46 = vld [vmem:[#allocation42_spill] sm:$0xff] }
 0x37a   : > { %v2906_v3 = vsel %vm2885_vm8, %v2905_v17, %v2828_v6  ;;  %v2909_v4 = vrot.slane %v2831_v33, 5  ;;  %v1866_v19 = vadd.f32 %v5462_v11, %v1777_v34  ;;  %v5463_v17 = vld [vmem:[#allocation71_spill] sm:$0xff] }
 0x37b   : > { %v2641_v52 = vmax.f32 %v2349_v15, %v3515_v8  ;;  %v2642_v25 = vmax.f32 %v2350_v10, %v3516_v14  ;;  %v2643_v29 = vmax.f32 %v2351_v57, %v3517_v36  ;;  %v2704_v37 = vpack.c.bf16 %v2640_v48, %v2640_v48  ;;  %v5460_v57 = vld [vmem:[#allocation107_spill] sm:$0xff]  ;;  %v4960_v48 = vpop.f32.mrf.mxu3 }
 0x37c   : > { %v2908_v5 = vsel %vm2888_vm9, %v2907_v2, %v2906_v3  ;;  %v1690_v55 = vadd.f32 %v5461_v46, %v5460_v57  ;;  %v1863_v8 = vadd.f32 %v5463_v17, %v1774_v26  ;;  %v4967_v56 = vpop.f32.mrf.mxu0 }
 0x37d   : > { %v2705_v58 = vpack.c.bf16 %v2641_v52, %v2641_v52  ;;  %v2706_v13 = vpack.c.bf16 %v2642_v25, %v2642_v25  ;;  %v2707_v18 = vpack.c.bf16 %v2643_v29, %v2643_v29  ;;  %v2832_v45 = vunpack.c.l.b16 %v2704_v37  ;;  %v5464_v25 = vld [vmem:[#allocation46_spill] sm:$0xff] }
 0x37e   : > { %1993 = vmatmul.bf16.gmra.mxu2 %v5415_v21  ;;  %v2910_v20 = vsel %vm2891_vm10, %v2909_v4, %v2908_v5  ;;  %v2128_v21 = vadd.f32 %v4856_v12, %v2039_v60  ;;  %v1952_v47 = vadd.f32 %v1951_v31, %v1863_v8  ;;  %v1779_v29 = vadd.f32 %v5464_v25, %v1690_v55 }
 0x37f   : > { %v2833_v0 = vunpack.c.l.b16 %v2705_v58  ;;  %v2834_v15 = vunpack.c.l.b16 %v2706_v13  ;;  %v2835_v10 = vunpack.c.l.b16 %v2707_v18  ;;  %v2911_v41 = vrot.slane %v2832_v45, 4 }
 0x380   : > { %v2217_v12 = vadd.f32 %v4859_v35, %v2128_v21  ;;  %v2041_v13 = vadd.f32 %v4867_v54, %v1952_v47 }
 0x381   : > { %v2913_v27 = vrot.slane %v2833_v0, 3  ;;  %v2915_v6 = vrot.slane %v2834_v15, 2  ;;  %v1954_v14 = vpop.f32.mrf.mxu2  ;;  %v2912_v53 = vsel %vm2894_vm11, %v2911_v41, %v2910_v20  ;;  %v2917_v2 = vrot.slane %v2835_v10, 1  ;;  %v4972_v18 = vpop.f32.mrf.mxu1  ;;  %v5466_v15 = vld [vmem:[#allocation10_spill] sm:$0xff] }
 0x382   : > { %v1955_v36 = vadd.f32 %v1954_v14, %v1866_v19  ;;  %v2284_v5 = vmax.f32 %v2217_v12, 0.0  ;;  %v2130_v4 = vadd.f32 %v4873_v49, %v2041_v13 }
 0x383   : > { %v2914_v33 = vsel %vm2897_vm12, %v2913_v27, %v2912_v53  ;;  %v4981_v54 = vpop.f32.mrf.mxu3 }
 0x384   : > { %v2916_v3 = vsel %vm2900_vm13, %v2915_v6, %v2914_v33  ;;  %v2044_v52 = vadd.f32 %v4881_v7, %v1955_v36  ;;  %v1868_v7 = vadd.f32 %v5465_v40, %v1779_v29  ;;  %v2219_v41 = vadd.f32 %v4876_v30, %v2130_v4  ;;  %v4986_v19 = vpop.f32.mrf.mxu0  ;;  %v5468_v36 = vld [vmem:[#allocation48_spill] sm:$0xff]  ;;  %v5470_v40 = vld [vmem:[#allocation109_spill] sm:$0xff] }
 0x385   : > { %v2918_v37 = vsel %vm2903_vm14, %v2917_v2, %v2916_v3 }
 0x386   : > { %v3004_v34 = vpack.c.b16 %v2918_v37, %v2918_v37  ;;  %v2133_v58 = vadd.f32 %v4886_v63, %v2044_v52  ;;  %v5467_v63 = vld [vmem:[#allocation45_spill] sm:$0xff]  ;;  %v2285_v33 = vmax.f32 %v2219_v41, 0.0  ;;  %v5469_v37 = vld [vmem:[#allocation79_spill] sm:$0xff] }
 0x387   : > { %v1693_v10 = vadd.f32 %v5467_v63, %v5466_v15 }
 0x388   : > { %3020 = vst [vmem:[%s4914_s14 + $0x4] sm:$0xf] %v3004_v34  ;;  %v2222_v31 = vadd.f32 %v4894_v61, %v2133_v58 }
 0x389   : > { %v1956_v26 = vpop.f32.mrf.mxu2  ;;  %v4989_v8 = vpop.f32.mrf.mxu1 }
 0x38a   : > { %v2286_v45 = vmax.f32 %v2222_v31, 0.0  ;;  %v1957_v60 = vadd.f32 %v1956_v26, %v1868_v7  ;;  %v5471_v7 = vld [vmem:[#allocation47_spill] sm:$0xff] }
 0x38b   : > { %v1695_v26 = vadd.f32 %v5471_v7, %v5470_v40 }
 0x38c   : > { %v2312_v0 = vmax.f32 %v2284_v5, %v2286_v45  ;;  %v2046_v35 = vadd.f32 %v4906_v51, %v1957_v60  ;;  %v5472_v5 = vld [vmem:[#allocation15_spill] sm:$0xff]  ;;  %v5473_v45 = vld [vmem:[#allocation49_spill] sm:$0xff] }
 0x38d   : > { %v1698_v60 = vadd.f32 %v5473_v45, %v5472_v5  ;;  %v5479_v5 = vld [vmem:[#allocation82_spill] sm:$0xff] }
 0x38e   : > { %v2352_v57 = vrot.slane %v2312_v0, 2  ;;  %v2353_v46 = vrot.slane %v2312_v0, 4  ;;  %v2354_v55 = vrot.slane %v2312_v0, 6  ;;  %v3518_v61 = vrot.slane %v2312_v0, 9  ;;  %1998 = vmatmul.bf16.gmra.mxu2 %v4369_v44 }
 0x38f   : > { %v2135_v11 = vadd.f32 %v4912_v9, %v2046_v35  ;;  %v1782_v44 = vadd.f32 %v5468_v36, %v1693_v10 }
 0x390   : > { %v3519_v49 = vrot.slane %v2352_v57, 9  ;;  %v3520_v20 = vrot.slane %v2353_v46, 9  ;;  %v3521_v51 = vrot.slane %v2354_v55, 9  ;;  %v2644_v27 = vmax.f32 %v2312_v0, %v3518_v61 }
 0x391   : > { %v2224_v6 = vadd.f32 %v4919_v1, %v2135_v11  ;;  %v1959_v17 = vpop.f32.mrf.mxu2  ;;  %v1871_v34 = vadd.f32 %v5469_v37, %v1782_v44  ;;  %v4993_v1 = vpop.f32.mrf.mxu3  ;;  %v5477_v37 = vld [vmem:[#allocation51_spill] sm:$0xff] }
 0x392   : > { %v2645_v14 = vmax.f32 %v2352_v57, %v3519_v49  ;;  %v2646_v53 = vmax.f32 %v2353_v46, %v3520_v20  ;;  %v2647_v21 = vmax.f32 %v2354_v55, %v3521_v51  ;;  %v2708_v2 = vpack.c.bf16 %v2644_v27, %v2644_v27  ;;  %v4999_v46 = vpop.f32.mrf.mxu0  ;;  %v5002_v27 = vpop.f32.mrf.mxu1 }
 0x393   : > { %v2287_v30 = vmax.f32 %v2224_v6, 0.0  ;;  %v1960_v41 = vadd.f32 %v1959_v17, %v1871_v34 }
 0x394   : > { %v2709_v9 = vpack.c.bf16 %v2645_v14, %v2645_v14  ;;  %v2710_v47 = vpack.c.bf16 %v2646_v53, %v2646_v53  ;;  %v2711_v52 = vpack.c.bf16 %v2647_v21, %v2647_v21  ;;  %v2836_v4 = vunpack.c.l.b16 %v2708_v2  ;;  %v5474_v14 = vld [vmem:[#allocation52_spill] sm:$0xff] }
 0x395   : > { %v2313_v3 = vmax.f32 %v2285_v33, %v2287_v30  ;;  %v1787_v53 = vadd.f32 %v5474_v14, %v1698_v60  ;;  %v5475_v33 = vld [vmem:[#allocation50_spill] sm:$0xff]  ;;  %v2049_v17 = vadd.f32 %v4926_v62, %v1960_v41  ;;  %v5481_v14 = vld [vmem:[#allocation88_spill] sm:$0xff] }
 0x396   : > { %v2837_v25 = vunpack.c.l.b16 %v2709_v9  ;;  %v2838_v29 = vunpack.c.l.b16 %v2710_v47  ;;  %v2839_v55 = vunpack.c.l.b16 %v2711_v52  ;;  %v1784_v30 = vadd.f32 %v5475_v33, %v1695_v26 }
 0x397   : > { %v2355_v12 = vrot.slane %v2313_v3, 2  ;;  %v2356_v58 = vrot.slane %v2313_v3, 4  ;;  %v2357_v13 = vrot.slane %v2313_v3, 6  ;;  %v3522_v31 = vrot.slane %v2313_v3, 9 }
 0x398   : > { %v2919_v0 = vrot.slane %v2837_v25, 7  ;;  %v2921_v61 = vrot.slane %v2838_v29, 6  ;;  %v2923_v47 = vrot.slane %v2839_v55, 5  ;;  %v5476_v29 = vld [vmem:[#allocation114_spill] sm:$0xff]  ;;  %v1873_v62 = vadd.f32 %v5479_v5, %v1784_v30 }
 0x399   : > { %v3523_v35 = vrot.slane %v2355_v12, 9  ;;  %v3524_v15 = vrot.slane %v2356_v58, 9  ;;  %v3525_v63 = vrot.slane %v2357_v13, 9  ;;  %v2648_v10 = vmax.f32 %v2313_v3, %v3522_v31  ;;  %v1961_v57 = vpop.f32.mrf.mxu2  ;;  %v5012_v31 = vpop.f32.mrf.mxu3 }
 0x39a   : > { %v2920_v11 = vsel %vm2885_vm8, %v2919_v0, %v2836_v4  ;;  %v1700_v34 = vadd.f32 %v5477_v37, %v5476_v29  ;;  %v2138_v60 = vadd.f32 %v4931_v16, %v2049_v17 }
 0x39b   : > { %v2649_v49 = vmax.f32 %v2355_v12, %v3523_v35  ;;  %v2650_v20 = vmax.f32 %v2356_v58, %v3524_v15  ;;  %v2651_v51 = vmax.f32 %v2357_v13, %v3525_v63  ;;  %v2712_v6 = vpack.c.bf16 %v2648_v10, %v2648_v10  ;;  %v5478_v58 = vld [vmem:[#allocation85_spill] sm:$0xff]  ;;  %v5019_v63 = vpop.f32.mrf.mxu0 }
 0x39c   : > { %v2922_v2 = vsel %vm2888_vm9, %v2921_v61, %v2920_v11  ;;  %v1876_v13 = vadd.f32 %v5478_v58, %v1787_v53  ;;  %v1962_v15 = vadd.f32 %v1961_v57, %v1873_v62  ;;  %v5480_v61 = vld [vmem:[#allocation54_spill] sm:$0xff]  ;;  %v2227_v16 = vadd.f32 %v4934_v24, %v2138_v60 }
 0x39d   : > { %v2713_v21 = vpack.c.bf16 %v2649_v49, %v2649_v49  ;;  %v2714_v36 = vpack.c.bf16 %v2650_v20, %v2650_v20  ;;  %v2715_v44 = vpack.c.bf16 %v2651_v51, %v2651_v51  ;;  %v2840_v9 = vunpack.c.l.b16 %v2712_v6  ;;  %v5025_v49 = vpop.f32.mrf.mxu1 }
 0x39e   : > { %2003 = vmatmul.bf16.gmra.mxu2 %v4802_v42  ;;  %v2924_v40 = vsel %vm2891_vm10, %v2923_v47, %v2922_v2  ;;  %v1789_v41 = vadd.f32 %v5480_v61, %v1700_v34  ;;  %v2051_v6 = vadd.f32 %v4941_v43, %v1962_v15  ;;  %v5484_v15 = vld [vmem:[#allocation91_spill] sm:$0xff] }
 0x39f   : > { %v2841_v3 = vunpack.c.l.b16 %v2713_v21  ;;  %v2842_v52 = vunpack.c.l.b16 %v2714_v36  ;;  %v2843_v25 = vunpack.c.l.b16 %v2715_v44  ;;  %v2925_v12 = vrot.slane %v2840_v9, 4 }
 0x3a0   : > { %v1878_v53 = vadd.f32 %v5481_v14, %v1789_v41  ;;  %v2140_v30 = vadd.f32 %v4944_v50, %v2051_v6 }
 0x3a1   : > { %v2927_v7 = vrot.slane %v2841_v3, 3  ;;  %v2929_v26 = vrot.slane %v2842_v52, 2  ;;  %v1964_v45 = vpop.f32.mrf.mxu2  ;;  %v2926_v42 = vsel %vm2894_vm11, %v2925_v12, %v2924_v40  ;;  %v2931_v35 = vrot.slane %v2843_v25, 1  ;;  %v5033_v33 = vpop.f32.mrf.mxu3 }
 0x3a2   : > { %v1965_v4 = vadd.f32 %v1964_v45, %v1876_v13  ;;  %v2229_v52 = vadd.f32 %v4948_v23, %v2140_v30 }
 0x3a3   : > { %v2928_v0 = vsel %vm2897_vm12, %v2927_v7, %v2926_v42  ;;  %v5039_v43 = vpop.f32.mrf.mxu0  ;;  %v5483_v7 = vld [vmem:[#allocation56_spill] sm:$0xff] }
 0x3a4   : > { %v2930_v10 = vsel %vm2900_vm13, %v2929_v26, %v2928_v0  ;;  %v2054_v55 = vadd.f32 %v4960_v48, %v1965_v4  ;;  %v2288_v48 = vmax.f32 %v2227_v16, 0.0  ;;  %v2289_v5 = vmax.f32 %v2229_v52, 0.0  ;;  %v5486_v16 = vld [vmem:[#allocation57_spill] sm:$0xff] }
 0x3a5   : > { %v2932_v11 = vsel %vm2903_vm14, %v2931_v35, %v2930_v10  ;;  %v5043_v29 = vpop.f32.mrf.mxu1 }
 0x3a6   : > { %v3005_v20 = vpack.c.b16 %v2932_v11, %v2932_v11  ;;  %v2143_v51 = vadd.f32 %v4967_v56, %v2054_v55  ;;  %v5482_v56 = vld [vmem:[#allocation53_spill] sm:$0xff]  ;;  %v5485_v11 = vld [vmem:[#allocation55_spill] sm:$0xff] }
 0x3a7   : > { %v1703_v9 = vadd.f32 %v5482_v56, %v4721_v28 }
 0x3a8   : > { %3021 = vst [vmem:[%s4914_s14 + $0x8] sm:$0xf] %v3005_v20  ;;  %v2232_v57 = vadd.f32 %v4972_v18, %v2143_v51  ;;  %v1705_v20 = vadd.f32 %v5485_v11, %v4725_v22  ;;  %v1708_v51 = vadd.f32 %v5486_v16, %v4733_v38 }
 0x3a9   : > { %v1966_v21 = vpop.f32.mrf.mxu2  ;;  %v1792_v26 = vadd.f32 %v5483_v7, %v1703_v9 }
 0x3aa   : > { %v2290_v36 = vmax.f32 %v2232_v57, 0.0  ;;  %v1967_v44 = vadd.f32 %v1966_v21, %v1878_v53 }
 0x3ab   : > { %v1881_v10 = vadd.f32 %v5484_v15, %v1792_v26  ;;  %v5054_v6 = vpop.f32.mrf.mxu0 }
 0x3ac   : > { %v2314_v2 = vmax.f32 %v2288_v48, %v2290_v36  ;;  %v2056_v24 = vadd.f32 %v4981_v54, %v1967_v44 }
 0x3ad   : > { %v5056_v30 = vpop.f32.mrf.mxu1 }
 0x3ae   : > { %v2358_v17 = vrot.slane %v2314_v2, 2  ;;  %v2359_v18 = vrot.slane %v2314_v2, 4  ;;  %v2360_v47 = vrot.slane %v2314_v2, 6  ;;  %v3526_v3 = vrot.slane %v2314_v2, 9 }
 0x3af   : > { %v2145_v25 = vadd.f32 %v4986_v19, %v2056_v24  ;;  %v5047_v19 = vpop.f32.mrf.mxu3 }
 0x3b0   : > { %v3527_v37 = vrot.slane %v2358_v17, 9  ;;  %v3528_v50 = vrot.slane %v2359_v18, 9  ;;  %v3529_v34 = vrot.slane %v2360_v47, 9  ;;  %v2652_v12 = vmax.f32 %v2314_v2, %v3526_v3 }
 0x3b1   : > { %v2234_v54 = vadd.f32 %v4989_v8, %v2145_v25  ;;  %v1969_v58 = vpop.f32.mrf.mxu2 }
 0x3b2   : > { %v2653_v28 = vmax.f32 %v2358_v17, %v3527_v37  ;;  %v2654_v13 = vmax.f32 %v2359_v18, %v3528_v50  ;;  %v2655_v40 = vmax.f32 %v2360_v47, %v3529_v34  ;;  %v2716_v45 = vpack.c.bf16 %v2652_v12, %v2652_v12  ;;  %v5487_v47 = vld [vmem:[#allocation63_spill] sm:$0xff] }
 0x3b3   : > { %v2291_v62 = vmax.f32 %v2234_v54, 0.0  ;;  %v1970_v56 = vadd.f32 %v1969_v58, %v1881_v10  ;;  %v1797_v3 = vadd.f32 %v5487_v47, %v1708_v51  ;;  %v5488_v50 = vld [vmem:[#allocation59_spill] sm:$0xff] }
 0x3b4   : > { %v2717_v23 = vpack.c.bf16 %v2653_v28, %v2653_v28  ;;  %v2718_v42 = vpack.c.bf16 %v2654_v13, %v2654_v13  ;;  %v2719_v4 = vpack.c.bf16 %v2655_v40, %v2655_v40  ;;  %v2844_v57 = vunpack.c.l.b16 %v2716_v45  ;;  %v5494_v47 = vld [vmem:[#allocation31_spill] sm:$0xff] }
 0x3b5   : > { %v2315_v60 = vmax.f32 %v2289_v5, %v2291_v62  ;;  %v1794_v34 = vadd.f32 %v5488_v50, %v1705_v20  ;;  %v2059_v28 = vadd.f32 %v4993_v1, %v1970_v56  ;;  %v5489_v5 = vld [vmem:[#allocation61_spill] sm:$0xff]  ;;  %v5070_v1 = vpop.f32.mrf.mxu0  ;;  %v5075_v20 = vpop.f32.mrf.mxu1 }
 0x3b6   : > { %v2845_v0 = vunpack.c.l.b16 %v2717_v23  ;;  %v2846_v35 = vunpack.c.l.b16 %v2718_v42  ;;  %v2847_v2 = vunpack.c.l.b16 %v2719_v4  ;;  %v1710_v62 = vadd.f32 %v5489_v5, %v4739_v39  ;;  %v5490_v23 = vld [vmem:[#allocation97_spill] sm:$0xff] }
 0x3b7   : > { %v2361_v8 = vrot.slane %v2315_v60, 2  ;;  %v2362_v55 = vrot.slane %v2315_v60, 4  ;;  %v2363_v61 = vrot.slane %v2315_v60, 6  ;;  %v3530_v41 = vrot.slane %v2315_v60, 9  ;;  %v5063_v13 = vpop.f32.mrf.mxu3 }
 0x3b8   : > { %v2933_v14 = vrot.slane %v2845_v0, 7  ;;  %v2935_v24 = vrot.slane %v2846_v35, 6  ;;  %v2937_v58 = vrot.slane %v2847_v2, 5  ;;  %v1886_v42 = vadd.f32 %v5490_v23, %v1797_v3  ;;  %v5491_v35 = vld [vmem:[#allocation94_spill] sm:$0xff]  ;;  %v5493_v2 = vld [vmem:[#allocation100_spill] sm:$0xff] }
 0x3b9   : > { %v3531_v53 = vrot.slane %v2361_v8, 9  ;;  %v3532_v21 = vrot.slane %v2362_v55, 9  ;;  %v3533_v48 = vrot.slane %v2363_v61, 9  ;;  %v2656_v36 = vmax.f32 %v2315_v60, %v3530_v41  ;;  %v1971_v44 = vpop.f32.mrf.mxu2 }
 0x3ba   : > { %v2934_v9 = vsel %vm2885_vm8, %v2933_v14, %v2844_v57  ;;  %v1883_v15 = vadd.f32 %v5491_v35, %v1794_v34  ;;  %v5492_v57 = vld [vmem:[#allocation66_spill] sm:$0xff] }
 0x3bb   : > { %v2657_v22 = vmax.f32 %v2361_v8, %v3531_v53  ;;  %v2658_v17 = vmax.f32 %v2362_v55, %v3532_v21  ;;  %v2659_v18 = vmax.f32 %v2363_v61, %v3533_v48  ;;  %v2720_v38 = vpack.c.bf16 %v2656_v36, %v2656_v36 }
 0x3bc   : > { %v2936_v12 = vsel %vm2888_vm9, %v2935_v24, %v2934_v9  ;;  %v2148_v55 = vadd.f32 %v4999_v46, %v2059_v28  ;;  %v1972_v11 = vadd.f32 %v1971_v44, %v1883_v15  ;;  %v1799_v14 = vadd.f32 %v5492_v57, %v1710_v62  ;;  %v5496_v62 = vld [vmem:[#allocation69_spill] sm:$0xff]  ;;  %v5499_v57 = vld [vmem:[#allocation38_spill] sm:$0xff] }
 0x3bd   : > { %v2721_v52 = vpack.c.bf16 %v2657_v22, %v2657_v22  ;;  %v2722_v25 = vpack.c.bf16 %v2658_v17, %v2658_v17  ;;  %v2723_v37 = vpack.c.bf16 %v2659_v18, %v2659_v18  ;;  %v2848_v54 = vunpack.c.l.b16 %v2720_v38  ;;  %v5090_v38 = vpop.f32.mrf.mxu0 }
 0x3be   : > { %v2938_v60 = vsel %vm2891_vm10, %v2937_v58, %v2936_v12  ;;  %v2237_v48 = vadd.f32 %v5002_v27, %v2148_v55  ;;  %v2061_v36 = vadd.f32 %v5012_v31, %v1972_v11  ;;  %v1888_v24 = vadd.f32 %v5493_v2, %v1799_v14  ;;  %v5495_v31 = vld [vmem:[#allocation64_spill] sm:$0xff]  ;;  %v5497_v55 = vld [vmem:[#allocation102_spill] sm:$0xff] }
 0x3bf   : > { %v2849_v40 = vunpack.c.l.b16 %v2721_v52  ;;  %v2850_v7 = vunpack.c.l.b16 %v2722_v25  ;;  %v2851_v26 = vunpack.c.l.b16 %v2723_v37  ;;  %v2939_v45 = vrot.slane %v2848_v54, 4  ;;  %v5087_v56 = vpop.f32.mrf.mxu3  ;;  %v5095_v52 = vpop.f32.mrf.mxu1  ;;  %v5500_v14 = vld [vmem:[#allocation70_spill] sm:$0xff] }
 0x3c0   : > { %v2150_v18 = vadd.f32 %v5019_v63, %v2061_v36  ;;  %v1713_v3 = vadd.f32 %v5495_v31, %v5494_v47  ;;  %v5501_v31 = vld [vmem:[#allocation75_spill] sm:$0xff] }
 0x3c1   : > { %v2941_v4 = vrot.slane %v2849_v40, 3  ;;  %v2943_v0 = vrot.slane %v2850_v7, 2  ;;  %v1974_v10 = vpop.f32.mrf.mxu2  ;;  %v2940_v8 = vsel %vm2894_vm11, %v2939_v45, %v2938_v60  ;;  %v2945_v41 = vrot.slane %v2851_v26, 1 }
 0x3c2   : > { %v1975_v61 = vadd.f32 %v1974_v10, %v1886_v42  ;;  %v2239_v34 = vadd.f32 %v5025_v49, %v2150_v18  ;;  %v1802_v45 = vadd.f32 %v5496_v62, %v1713_v3 }
 0x3c3   : > { %v2942_v39 = vsel %vm2897_vm12, %v2941_v4, %v2940_v8 }
 0x3c4   : > { %v2944_v16 = vsel %vm2900_vm13, %v2943_v0, %v2942_v39  ;;  %v2064_v51 = vadd.f32 %v5033_v33, %v1975_v61  ;;  %v2292_v33 = vmax.f32 %v2237_v48, 0.0  ;;  %v2293_v42 = vmax.f32 %v2239_v34, 0.0  ;;  %v5502_v34 = vld [vmem:[#allocation72_spill] sm:$0xff] }
 0x3c5   : > { %v2946_v53 = vsel %vm2903_vm14, %v2945_v41, %v2944_v16  ;;  %v2162_v35 = vpop.f32.mrf.mxu0  ;;  %v5498_v16 = vld [vmem:[#allocation67_spill] sm:$0xff] }
 0x3c6   : > { %v3006_v21 = vpack.c.b16 %v2946_v53, %v2946_v53  ;;  %v2153_v46 = vadd.f32 %v5039_v43, %v2064_v51  ;;  %v1715_v51 = vadd.f32 %v5498_v16, %v4753_v59  ;;  %v1718_v53 = vadd.f32 %v5500_v14, %v5499_v57  ;;  %v5507_v57 = vld [vmem:[#allocation78_spill] sm:$0xff] }
 0x3c7   : > { %v5101_v23 = vpop.f32.mrf.mxu3 }
 0x3c8   : > { %3022 = vst [vmem:[%s4914_s14 + $0xc] sm:$0xf] %v3006_v21  ;;  %v2242_v44 = vadd.f32 %v5043_v29, %v2153_v46  ;;  %v2251_v21 = vpop.f32.mrf.mxu1  ;;  %v1807_v3 = vadd.f32 %v5501_v31, %v1718_v53 }
 0x3c9   : > { %v1976_v9 = vpop.f32.mrf.mxu2 }
 0x3ca   : > { %v2294_v22 = vmax.f32 %v2242_v44, 0.0  ;;  %v1977_v17 = vadd.f32 %v1976_v9, %v1888_v24 }
 0x3cc   : > { %v2316_v27 = vmax.f32 %v2292_v33, %v2294_v22  ;;  %v2066_v43 = vadd.f32 %v5047_v19, %v1977_v17 }
 0x3ce   : > { %v2364_v29 = vrot.slane %v2316_v27, 2  ;;  %v2365_v25 = vrot.slane %v2316_v27, 4  ;;  %v2366_v37 = vrot.slane %v2316_v27, 6  ;;  %v3534_v50 = vrot.slane %v2316_v27, 9 }
 0x3cf   : > { %v2155_v12 = vadd.f32 %v5054_v6, %v2066_v43 }
 0x3d0   : > { %v3535_v54 = vrot.slane %v2364_v29, 9  ;;  %v3536_v63 = vrot.slane %v2365_v25, 9  ;;  %v3537_v28 = vrot.slane %v2366_v37, 9  ;;  %v2660_v58 = vmax.f32 %v2316_v27, %v3534_v50 }
 0x3d1   : > { %v2244_v40 = vadd.f32 %v5056_v30, %v2155_v12  ;;  %v1979_v19 = vpop.f32.mrf.mxu2  ;;  %v1891_v30 = vadd.f32 %v5497_v55, %v1802_v45  ;;  %v1804_v12 = vadd.f32 %v5502_v34, %v1715_v51  ;;  %v2164_v45 = vpop.f32.mrf.mxu0 }
 0x3d2   : > { %v2661_v7 = vmax.f32 %v2364_v29, %v3535_v54  ;;  %v2662_v26 = vmax.f32 %v2365_v25, %v3536_v63  ;;  %v2663_v5 = vmax.f32 %v2366_v37, %v3537_v28  ;;  %v2724_v4 = vpack.c.bf16 %v2660_v58, %v2660_v58  ;;  %v2075_v29 = vpop.f32.mrf.mxu3  ;;  %v2253_v55 = vpop.f32.mrf.mxu1 }
 0x3d3   : > { %v2295_v60 = vmax.f32 %v2244_v40, 0.0  ;;  %v1980_v17 = vadd.f32 %v1979_v19, %v1891_v30 }
 0x3d4   : > { %v2725_v49 = vpack.c.bf16 %v2661_v7, %v2661_v7  ;;  %v2726_v0 = vpack.c.bf16 %v2662_v26, %v2662_v26  ;;  %v2727_v15 = vpack.c.bf16 %v2663_v5, %v2663_v5  ;;  %v2852_v48 = vunpack.c.l.b16 %v2724_v4  ;;  %v5503_v26 = vld [vmem:[#allocation116_spill] sm:$0xff]  ;;  %v5504_v5 = vld [vmem:[#allocation74_spill] sm:$0xff] }
 0x3d5   : > { %v2317_v6 = vmax.f32 %v2293_v42, %v2295_v60  ;;  %v2069_v28 = vadd.f32 %v5063_v13, %v1980_v17  ;;  %v1720_v62 = vadd.f32 %v5504_v5, %v5503_v26  ;;  %v5505_v60 = vld [vmem:[#allocation105_spill] sm:$0xff] }
 0x3d6   : > { %v2853_v10 = vunpack.c.l.b16 %v2725_v49  ;;  %v2854_v8 = vunpack.c.l.b16 %v2726_v0  ;;  %v2855_v33 = vunpack.c.l.b16 %v2727_v15  ;;  %v1896_v4 = vadd.f32 %v5505_v60, %v1807_v3  ;;  %v5506_v15 = vld [vmem:[#allocation104_spill] sm:$0xff] }
 0x3d7   : > { %v2367_v61 = vrot.slane %v2317_v6, 2  ;;  %v2368_v39 = vrot.slane %v2317_v6, 4  ;;  %v2369_v41 = vrot.slane %v2317_v6, 6  ;;  %v3538_v11 = vrot.slane %v2317_v6, 9 }
 0x3d8   : > { %v2947_v46 = vrot.slane %v2853_v10, 7  ;;  %v2949_v22 = vrot.slane %v2854_v8, 6  ;;  %v2951_v58 = vrot.slane %v2855_v33, 5  ;;  %v1893_v10 = vadd.f32 %v5506_v15, %v1804_v12 }
 0x3d9   : > { %v3539_v36 = vrot.slane %v2367_v61, 9  ;;  %v3540_v44 = vrot.slane %v2368_v39, 9  ;;  %v3541_v2 = vrot.slane %v2369_v41, 9  ;;  %v2664_v24 = vmax.f32 %v2317_v6, %v3538_v11  ;;  %v1981_v9 = vpop.f32.mrf.mxu2 }
 0x3da   : > { %v2948_v18 = vsel %vm2885_vm8, %v2947_v46, %v2852_v48  ;;  %v2158_v30 = vadd.f32 %v5070_v1, %v2069_v28  ;;  %v1982_v11 = vadd.f32 %v1981_v9, %v1893_v10  ;;  %v1809_v14 = vadd.f32 %v5507_v57, %v1720_v62  ;;  %v5512_v10 = vld [vmem:[#allocation36_spill] sm:$0xff] }
 0x3db   : > { %v2665_v27 = vmax.f32 %v2367_v61, %v3539_v36  ;;  %v2666_v43 = vmax.f32 %v2368_v39, %v3540_v44  ;;  %v2667_v47 = vmax.f32 %v2369_v41, %v3541_v2  ;;  %v2728_v59 = vpack.c.bf16 %v2664_v24, %v2664_v24  ;;  %v5126_v44 = vpop.f32.mrf.mxu3  ;;  %v5508_v24 = vld [vmem:[#allocation106_spill] sm:$0xff] }
 0x3dc   : > { %v2950_v54 = vsel %vm2888_vm9, %v2949_v22, %v2948_v18  ;;  %v2247_v46 = vadd.f32 %v5075_v20, %v2158_v30  ;;  %v2071_v1 = vadd.f32 %v5087_v56, %v1982_v11  ;;  %v1898_v9 = vadd.f32 %v5508_v24, %v1809_v14  ;;  %v5131_v22 = vpop.f32.mrf.mxu0 }
 0x3dd   : > { %v2729_v25 = vpack.c.bf16 %v2665_v27, %v2665_v27  ;;  %v2730_v37 = vpack.c.bf16 %v2666_v43, %v2666_v43  ;;  %v2731_v50 = vpack.c.bf16 %v2667_v47, %v2667_v47  ;;  %v2856_v63 = vunpack.c.l.b16 %v2728_v59  ;;  %v5134_v43 = vpop.f32.mrf.mxu1  ;;  %v5509_v47 = vld [vmem:[#allocation44_spill] sm:$0xff]  ;;  %v5510_v59 = vld [vmem:[#allocation77_spill] sm:$0xff] }
 0x3de   : > { %v2952_v49 = vsel %vm2891_vm10, %v2951_v58, %v2950_v54  ;;  %v2160_v27 = vadd.f32 %v5090_v38, %v2071_v1  ;;  %v1723_v31 = vadd.f32 %v5510_v59, %v5509_v47 }
 0x3df   : > { %v2857_v40 = vunpack.c.l.b16 %v2729_v25  ;;  %v2858_v19 = vunpack.c.l.b16 %v2730_v37  ;;  %v2859_v7 = vunpack.c.l.b16 %v2731_v50  ;;  %v2953_v42 = vrot.slane %v2856_v63, 4 }
 0x3e0   : > { %v2249_v37 = vadd.f32 %v5095_v52, %v2160_v27 }
 0x3e1   : > { %v2955_v0 = vrot.slane %v2857_v40, 3  ;;  %v2957_v6 = vrot.slane %v2858_v19, 2  ;;  %v1984_v8 = vpop.f32.mrf.mxu2  ;;  %v2954_v13 = vsel %vm2894_vm11, %v2953_v42, %v2952_v49  ;;  %v2959_v41 = vrot.slane %v2859_v7, 1  ;;  %v5511_v7 = vld [vmem:[#allocation81_spill] sm:$0xff] }
 0x3e2   : > { %v1985_v61 = vadd.f32 %v1984_v8, %v1896_v4  ;;  %v1812_v26 = vadd.f32 %v5511_v7, %v1723_v31  ;;  %v2297_v5 = vmax.f32 %v2249_v37, 0.0  ;;  %v5520_v7 = vld [vmem:[#allocation111_spill] sm:$0xff] }
 0x3e3   : > { %v2956_v39 = vsel %vm2897_vm12, %v2955_v0, %v2954_v13  ;;  %v5139_v28 = vpop.f32.mrf.mxu3 }
 0x3e4   : > { %v2958_v16 = vsel %vm2900_vm13, %v2957_v6, %v2956_v39  ;;  %v2074_v51 = vadd.f32 %v5101_v23, %v1985_v61  ;;  %v2296_v23 = vmax.f32 %v2247_v46, 0.0  ;;  %v5142_v42 = vpop.f32.mrf.mxu0  ;;  %v1901_v8 = vadd.f32 %v5512_v10, %v1812_v26  ;;  %v5513_v39 = vld [vmem:[#allocation117_spill] sm:$0xff] }
 0x3e5   : > { %v2960_v53 = vsel %vm2903_vm14, %v2959_v41, %v2958_v16  ;;  %v5144_v49 = vpop.f32.mrf.mxu1  ;;  %v5514_v41 = vld [vmem:[#allocation80_spill] sm:$0xff]  ;;  %v5515_v16 = vld [vmem:[#allocation83_spill] sm:$0xff] }
 0x3e6   : > { %v3007_v48 = vpack.c.b16 %v2960_v53, %v2960_v53  ;;  %v2163_v36 = vadd.f32 %v2162_v35, %v2074_v51  ;;  %v1725_v11 = vadd.f32 %v5514_v41, %v5513_v39  ;;  %v1728_v51 = vadd.f32 %v5515_v16, %v4787_v32 }
 0x3e8   : > { %3023 = vst [vmem:[%s4914_s14 + $0x10] sm:$0xf] %v3007_v48  ;;  %v2252_v2 = vadd.f32 %v2251_v21, %v2163_v36 }
 0x3e9   : > { %v1986_v33 = vpop.f32.mrf.mxu2 }
 0x3ea   : > { %v2298_v17 = vmax.f32 %v2252_v2, 0.0  ;;  %v1987_v18 = vadd.f32 %v1986_v33, %v1898_v9 }
 0x3eb   : > { %v2083_v33 = vpop.f32.mrf.mxu3 }
 0x3ec   : > { %v2318_v20 = vmax.f32 %v2296_v23, %v2298_v17  ;;  %v2076_v35 = vadd.f32 %v2075_v29, %v1987_v18 }
 0x3ee   : > { %v2370_v56 = vrot.slane %v2318_v20, 2  ;;  %v2371_v3 = vrot.slane %v2318_v20, 4  ;;  %v2372_v21 = vrot.slane %v2318_v20, 6  ;;  %v3542_v25 = vrot.slane %v2318_v20, 9 }
 0x3ef   : > { %v2165_v50 = vadd.f32 %v2164_v45, %v2076_v35  ;;  %v5516_v35 = vld [vmem:[#allocation87_spill] sm:$0xff] }
 0x3f0   : > { %v3543_v34 = vrot.slane %v2370_v56, 9  ;;  %v3544_v12 = vrot.slane %v2371_v3, 9  ;;  %v3545_v54 = vrot.slane %v2372_v21, 9  ;;  %v2668_v63 = vmax.f32 %v2318_v20, %v3542_v25 }
 0x3f1   : > { %v2254_v38 = vadd.f32 %v2253_v55, %v2165_v50  ;;  %v1989_v58 = vpop.f32.mrf.mxu2  ;;  %v1817_v47 = vadd.f32 %v5516_v35, %v1728_v51 }
 0x3f2   : > { %v2669_v40 = vmax.f32 %v2370_v56, %v3543_v34  ;;  %v2670_v29 = vmax.f32 %v2371_v3, %v3544_v12  ;;  %v2671_v19 = vmax.f32 %v2372_v21, %v3545_v54  ;;  %v2732_v60 = vpack.c.bf16 %v2668_v63, %v2668_v63  ;;  %v5517_v56 = vld [vmem:[#allocation84_spill] sm:$0xff]  ;;  %v2172_v21 = vpop.f32.mrf.mxu0 }
 0x3f3   : > { %v2299_v62 = vmax.f32 %v2254_v38, 0.0  ;;  %v1990_v9 = vadd.f32 %v1989_v58, %v1901_v8  ;;  %v1814_v3 = vadd.f32 %v5517_v56, %v1725_v11  ;;  %v5518_v38 = vld [vmem:[#allocation118_spill] sm:$0xff]  ;;  %v1906_v26 = vadd.f32 %v5520_v7, %v1817_v47  ;;  %v2085_v39 = vpop.f32.mrf.mxu3 }
 0x3f4   : > { %v2733_v52 = vpack.c.bf16 %v2669_v40, %v2669_v40  ;;  %v2734_v45 = vpack.c.bf16 %v2670_v29, %v2670_v29  ;;  %v2735_v0 = vpack.c.bf16 %v2671_v19, %v2671_v19  ;;  %v2860_v57 = vunpack.c.l.b16 %v2732_v60  ;;  %v5519_v58 = vld [vmem:[#allocation86_spill] sm:$0xff]  ;;  %v2261_v29 = vpop.f32.mrf.mxu1 }
 0x3f5   : > { %v2319_v4 = vmax.f32 %v2297_v5, %v2299_v62  ;;  %v2079_v50 = vadd.f32 %v5126_v44, %v1990_v9  ;;  %v1730_v40 = vadd.f32 %v5519_v58, %v5518_v38 }
 0x3f6   : > { %v2861_v6 = vunpack.c.l.b16 %v2733_v52  ;;  %v2862_v15 = vunpack.c.l.b16 %v2734_v45  ;;  %v2863_v2 = vunpack.c.l.b16 %v2735_v0  ;;  %v5521_v52 = vld [vmem:[#allocation108_spill] sm:$0xff] }
 0x3f7   : > { %v2373_v55 = vrot.slane %v2319_v4, 2  ;;  %v2374_v13 = vrot.slane %v2319_v4, 4  ;;  %v2375_v30 = vrot.slane %v2319_v4, 6  ;;  %v3546_v61 = vrot.slane %v2319_v4, 9 }
 0x3f8   : > { %v2961_v14 = vrot.slane %v2861_v6, 7  ;;  %v2963_v24 = vrot.slane %v2862_v15, 6  ;;  %v2965_v34 = vrot.slane %v2863_v2, 5  ;;  %v1903_v45 = vadd.f32 %v5521_v52, %v1814_v3 }
 0x3f9   : > { %v3547_v53 = vrot.slane %v2373_v55, 9  ;;  %v3548_v48 = vrot.slane %v2374_v13, 9  ;;  %v3549_v46 = vrot.slane %v2375_v30, 9  ;;  %v2672_v36 = vmax.f32 %v2319_v4, %v3546_v61  ;;  %v1991_v1 = vpop.f32.mrf.mxu2 }
 0x3fa   : > { %v2962_v23 = vsel %vm2885_vm8, %v2961_v14, %v2860_v57  ;;  %v2168_v0 = vadd.f32 %v5131_v22, %v2079_v50  ;;  %v1992_v8 = vadd.f32 %v1991_v1, %v1903_v45  ;;  %v2174_v22 = vpop.f32.mrf.mxu0 }
 0x3fb   : > { %v2673_v17 = vmax.f32 %v2373_v55, %v3547_v53  ;;  %v2674_v18 = vmax.f32 %v2374_v13, %v3548_v48  ;;  %v2675_v27 = vmax.f32 %v2375_v30, %v3549_v46  ;;  %v2736_v20 = vpack.c.bf16 %v2672_v36, %v2672_v36  ;;  %v5522_v30 = vld [vmem:[#allocation90_spill] sm:$0xff]  ;;  %v5523_v53 = vld [vmem:[#allocation113_spill] sm:$0xff]  ;;  %v2088_v47 = vpop.f32.mrf.mxu3 }
 0x3fc   : > { %v2964_v25 = vsel %vm2888_vm9, %v2963_v24, %v2962_v23  ;;  %v1819_v61 = vadd.f32 %v5522_v30, %v1730_v40  ;;  %v2257_v16 = vadd.f32 %v5134_v43, %v2168_v0  ;;  %v2081_v57 = vadd.f32 %v5139_v28, %v1992_v8  ;;  %v2263_v36 = vpop.f32.mrf.mxu1  ;;  %v5530_v8 = vld [vmem:[#allocation121_spill] sm:$0xff] }
 0x3fd   : > { %v2737_v32 = vpack.c.bf16 %v2673_v17, %v2673_v17  ;;  %v2738_v59 = vpack.c.bf16 %v2674_v18, %v2674_v18  ;;  %v2739_v31 = vpack.c.bf16 %v2675_v27, %v2675_v27  ;;  %v2864_v37 = vunpack.c.l.b16 %v2736_v20  ;;  %v5524_v17 = vld [vmem:[#allocation119_spill] sm:$0xff]  ;;  %v5525_v18 = vld [vmem:[#allocation89_spill] sm:$0xff] }
 0x3fe   : > { %v2966_v5 = vsel %vm2891_vm10, %v2965_v34, %v2964_v25  ;;  %v1908_v48 = vadd.f32 %v5523_v53, %v1819_v61  ;;  %v2300_v1 = vmax.f32 %v2257_v16, 0.0  ;;  %v2170_v9 = vadd.f32 %v5142_v42, %v2081_v57 }
 0x3ff   : > { %v2865_v12 = vunpack.c.l.b16 %v2737_v32  ;;  %v2866_v54 = vunpack.c.l.b16 %v2738_v59  ;;  %v2867_v63 = vunpack.c.l.b16 %v2739_v31  ;;  %v2967_v19 = vrot.slane %v2864_v37, 4 }
 0x400   : > { %v1733_v43 = vadd.f32 %v5525_v18, %v5524_v17  ;;  %v2259_v32 = vadd.f32 %v5144_v49, %v2170_v9  ;;  %v5532_v9 = vld [vmem:[#allocation99_spill] sm:$0xff] }
 0x401   : > { %v2969_v62 = vrot.slane %v2865_v12, 3  ;;  %v2971_v60 = vrot.slane %v2866_v54, 2  ;;  %v1994_v4 = vpop.f32.mrf.mxu2  ;;  %v2968_v44 = vsel %vm2894_vm11, %v2967_v19, %v2966_v5  ;;  %v2973_v10 = vrot.slane %v2867_v63, 1  ;;  %v5526_v54 = vld [vmem:[#allocation93_spill] sm:$0xff] }
 0x402   : > { %v1995_v6 = vadd.f32 %v1994_v4, %v1906_v26  ;;  %v5175_v42 = vpop.f32.mrf.mxu0  ;;  %v1822_v63 = vadd.f32 %v5526_v54, %v1733_v43  ;;  %v2301_v38 = vmax.f32 %v2259_v32, 0.0  ;;  %v5533_v43 = vld [vmem:[#allocation96_spill] sm:$0xff] }
 0x403   : > { %v2970_v15 = vsel %vm2897_vm12, %v2969_v62, %v2968_v44 }
 0x404   : > { %v2972_v55 = vsel %vm2900_vm13, %v2971_v60, %v2970_v15  ;;  %v2084_v13 = vadd.f32 %v2083_v33, %v1995_v6  ;;  %v5178_v40 = vpop.f32.mrf.mxu1  ;;  %v5527_v60 = vld [vmem:[#allocation8_spill] sm:$0xff] }
 0x405   : > { %v2974_v41 = vsel %vm2903_vm14, %v2973_v10, %v2972_v55  ;;  %v1911_v52 = vadd.f32 %v5527_v60, %v1822_v63  ;;  %v5528_v6 = vld [vmem:[#allocation120_spill] sm:$0xff]  ;;  %v5531_v55 = vld [vmem:[#allocation95_spill] sm:$0xff] }
 0x406   : > { %v3008_v11 = vpack.c.b16 %v2974_v41, %v2974_v41  ;;  %v2173_v51 = vadd.f32 %v2172_v21, %v2084_v13  ;;  %v5529_v15 = vld [vmem:[#allocation92_spill] sm:$0xff]  ;;  %v1738_v13 = vadd.f32 %v5531_v55, %v5530_v8 }
 0x407   : > { %v1735_v10 = vadd.f32 %v5529_v15, %v5528_v6 }
 0x408   : > { %3024 = vst [vmem:[%s4914_s14 + $0x14] sm:$0xf] %v3008_v11  ;;  %v2262_v14 = vadd.f32 %v2261_v29, %v2173_v51 }
 0x409   : > { %v1996_v46 = vpop.f32.mrf.mxu2 }
 0x40a   : > { %v2302_v2 = vmax.f32 %v2262_v14, 0.0  ;;  %v1997_v24 = vadd.f32 %v1996_v46, %v1908_v48 }
 0x40c   : > { %v2320_v33 = vmax.f32 %v2300_v1, %v2302_v2  ;;  %v2086_v23 = vadd.f32 %v2085_v39, %v1997_v24  ;;  %v2090_v39 = vpop.f32.mrf.mxu3  ;;  %v2179_v2 = vpop.f32.mrf.mxu0 }
 0x40e   : > { %v2376_v27 = vrot.slane %v2320_v33, 2  ;;  %v2377_v20 = vrot.slane %v2320_v33, 4  ;;  %v2378_v28 = vrot.slane %v2320_v33, 6  ;;  %v3550_v35 = vrot.slane %v2320_v33, 9 }
 0x40f   : > { %v2175_v59 = vadd.f32 %v2174_v22, %v2086_v23 }
 0x410   : > { %v3551_v31 = vrot.slane %v2376_v27, 9  ;;  %v3552_v56 = vrot.slane %v2377_v20, 9  ;;  %v3553_v3 = vrot.slane %v2378_v28, 9  ;;  %v2676_v21 = vmax.f32 %v2320_v33, %v3550_v35 }
 0x411   : > { %v2264_v25 = vadd.f32 %v2263_v36, %v2175_v59  ;;  %v1999_v37 = vpop.f32.mrf.mxu2  ;;  %v1827_v33 = vadd.f32 %v5532_v9, %v1738_v13 }
 0x412   : > { %v2677_v50 = vmax.f32 %v2376_v27, %v3551_v31  ;;  %v2678_v34 = vmax.f32 %v2377_v20, %v3552_v56  ;;  %v2679_v12 = vmax.f32 %v2378_v28, %v3553_v3  ;;  %v2740_v29 = vpack.c.bf16 %v2676_v21, %v2676_v21  ;;  %v2268_v20 = vpop.f32.mrf.mxu1  ;;  %v5534_v21 = vld [vmem:[#allocation122_spill] sm:$0xff] }
 0x413   : > { %v2303_v58 = vmax.f32 %v2264_v25, 0.0  ;;  %v2000_v53 = vadd.f32 %v1999_v37, %v1911_v52  ;;  %v1824_v27 = vadd.f32 %v5533_v43, %v1735_v10  ;;  %v5535_v25 = vld [vmem:[#allocation98_spill] sm:$0xff] }
 0x414   : > { %v2741_v49 = vpack.c.bf16 %v2677_v50, %v2677_v50  ;;  %v2742_v19 = vpack.c.bf16 %v2678_v34, %v2678_v34  ;;  %v2743_v26 = vpack.c.bf16 %v2679_v12, %v2679_v12  ;;  %v2868_v30 = vunpack.c.l.b16 %v2740_v29  ;;  %v5536_v34 = vld [vmem:[#allocation25_spill] sm:$0xff] }
 0x415   : > { %v2321_v7 = vmax.f32 %v2301_v38, %v2303_v58  ;;  %v2089_v32 = vadd.f32 %v2088_v47, %v2000_v53  ;;  %v1740_v37 = vadd.f32 %v5535_v25, %v5534_v21  ;;  %v1916_v12 = vadd.f32 %v5536_v34, %v1827_v33  ;;  %v5537_v58 = vld [vmem:[#allocation20_spill] sm:$0xff] }
 0x416   : > { %v2869_v5 = vunpack.c.l.b16 %v2741_v49  ;;  %v2870_v62 = vunpack.c.l.b16 %v2742_v19  ;;  %v2871_v22 = vunpack.c.l.b16 %v2743_v26  ;;  %v1913_v29 = vadd.f32 %v5537_v58, %v1824_v27  ;;  %v2093_v49 = vpop.f32.mrf.mxu3 }
 0x417   : > { %v2379_v45 = vrot.slane %v2321_v7, 2  ;;  %v2380_v4 = vrot.slane %v2321_v7, 4  ;;  %v2381_v44 = vrot.slane %v2321_v7, 6  ;;  %v3554_v0 = vrot.slane %v2321_v7, 9 }
 0x418   : > { %v2975_v61 = vrot.slane %v2869_v5, 7  ;;  %v2977_v14 = vrot.slane %v2870_v62, 6  ;;  %v2979_v59 = vrot.slane %v2871_v22, 5 }
 0x419   : > { %v3555_v41 = vrot.slane %v2379_v45, 9  ;;  %v3556_v11 = vrot.slane %v2380_v4, 9  ;;  %v3557_v16 = vrot.slane %v2381_v44, 9  ;;  %v2680_v51 = vmax.f32 %v2321_v7, %v3554_v0  ;;  %v2001_v57 = vpop.f32.mrf.mxu2 }
 0x41a   : > { %v2976_v48 = vsel %vm2885_vm8, %v2975_v61, %v2868_v30  ;;  %v2178_v7 = vadd.f32 %v5175_v42, %v2089_v32  ;;  %v2002_v60 = vadd.f32 %v2001_v57, %v1913_v29  ;;  %v2271_v8 = vpop.f32.mrf.mxu1  ;;  %v5539_v30 = vld [vmem:[#allocation115_spill] sm:$0xff] }
 0x41b   : > { %v2681_v46 = vmax.f32 %v2379_v45, %v3555_v41  ;;  %v2682_v36 = vmax.f32 %v2380_v4, %v3556_v11  ;;  %v2683_v1 = vmax.f32 %v2381_v44, %v3557_v16  ;;  %v2744_v24 = vpack.c.bf16 %v2680_v51, %v2680_v51  ;;  %v2182_v45 = vpop.f32.mrf.mxu0  ;;  %v5538_v44 = vld [vmem:[#allocation101_spill] sm:$0xff] }
 0x41c   : > { %v2978_v28 = vsel %vm2888_vm9, %v2977_v14, %v2976_v48  ;;  %v1829_v0 = vadd.f32 %v5538_v44, %v1740_v37  ;;  %v2267_v10 = vadd.f32 %v5178_v40, %v2178_v7  ;;  %v2091_v13 = vadd.f32 %v2090_v39, %v2002_v60 }
 0x41d   : > { %v2745_v23 = vpack.c.bf16 %v2681_v46, %v2681_v46  ;;  %v2746_v17 = vpack.c.bf16 %v2682_v36, %v2682_v36  ;;  %v2747_v18 = vpack.c.bf16 %v2683_v1, %v2683_v1  ;;  %v2872_v35 = vunpack.c.l.b16 %v2744_v24 }
 0x41e   : > { %v2980_v54 = vsel %vm2891_vm10, %v2979_v59, %v2978_v28  ;;  %v1918_v61 = vadd.f32 %v5539_v30, %v1829_v0  ;;  %v2304_v11 = vmax.f32 %v2267_v10, 0.0  ;;  %v2180_v57 = vadd.f32 %v2179_v2, %v2091_v13  ;;  %v2095_v22 = vpop.f32.mrf.mxu3 }
 0x41f   : > { %v2873_v31 = vunpack.c.l.b16 %v2745_v23  ;;  %v2874_v56 = vunpack.c.l.b16 %v2746_v17  ;;  %v2875_v3 = vunpack.c.l.b16 %v2747_v18  ;;  %v2981_v50 = vrot.slane %v2872_v35, 4 }
 0x420   : > { %v2269_v24 = vadd.f32 %v2268_v20, %v2180_v57 }
 0x421   : > { %v2983_v63 = vrot.slane %v2873_v31, 3  ;;  %v2985_v38 = vrot.slane %v2874_v56, 2  ;;  %v2004_v19 = vpop.f32.mrf.mxu2  ;;  %v2982_v47 = vsel %vm2894_vm11, %v2981_v50, %v2980_v54  ;;  %v2987_v62 = vrot.slane %v2875_v3, 1 }
 0x422   : > { %v2005_v26 = vadd.f32 %v2004_v19, %v1916_v12  ;;  %v2273_v18 = vpop.f32.mrf.mxu1  ;;  %v2305_v2 = vmax.f32 %v2269_v24, 0.0 }
 0x423   : > { %v2984_v5 = vsel %vm2897_vm12, %v2983_v63, %v2982_v47  ;;  %v2184_v40 = vpop.f32.mrf.mxu0 }
 0x424   : > { %v2986_v52 = vsel %vm2900_vm13, %v2985_v38, %v2984_v5  ;;  %v2094_v4 = vadd.f32 %v2093_v49, %v2005_v26 }
 0x425   : > { %v2988_v6 = vsel %vm2903_vm14, %v2987_v62, %v2986_v52 }
 0x426   : > { %v3009_v15 = vpack.c.b16 %v2988_v6, %v2988_v6  ;;  %v2183_v55 = vadd.f32 %v2182_v45, %v2094_v4 }
 0x428   : > { %3025 = vst [vmem:[%s4914_s14 + $0x18] sm:$0xf] %v3009_v15  ;;  %v2272_v42 = vadd.f32 %v2271_v8, %v2183_v55 }
 0x429   : > { %v2006_v41 = vpop.f32.mrf.mxu2 }
 0x42a   : > { %v2306_v16 = vmax.f32 %v2272_v42, 0.0  ;;  %v2007_v51 = vadd.f32 %v2006_v41, %v1918_v61 }
 0x42c   : > { %v2322_v14 = vmax.f32 %v2304_v11, %v2306_v16  ;;  %v2096_v53 = vadd.f32 %v2095_v22, %v2007_v51 }
 0x42e   : > { %v2382_v48 = vrot.slane %v2322_v14, 2  ;;  %v2383_v46 = vrot.slane %v2322_v14, 4  ;;  %v2384_v36 = vrot.slane %v2322_v14, 6  ;;  %v3558_v1 = vrot.slane %v2322_v14, 9 }
 0x42f   : > { %v2185_v9 = vadd.f32 %v2184_v40, %v2096_v53 }
 0x430   : > { %v3559_v39 = vrot.slane %v2382_v48, 9  ;;  %v3560_v33 = vrot.slane %v2383_v46, 9  ;;  %v3561_v23 = vrot.slane %v2384_v36, 9  ;;  %v2684_v17 = vmax.f32 %v2322_v14, %v3558_v1 }
 0x431   : > { %v2274_v43 = vadd.f32 %v2273_v18, %v2185_v9 }
 0x432   : > { %v2685_v27 = vmax.f32 %v2382_v48, %v3559_v39  ;;  %v2686_v28 = vmax.f32 %v2383_v46, %v3560_v33  ;;  %v2687_v35 = vmax.f32 %v2384_v36, %v3561_v23  ;;  %v2748_v59 = vpack.c.bf16 %v2684_v17, %v2684_v17 }
 0x433   : > { %v2307_v32 = vmax.f32 %v2274_v43, 0.0 }
 0x434   : > { %v2749_v31 = vpack.c.bf16 %v2685_v27, %v2685_v27  ;;  %v2750_v56 = vpack.c.bf16 %v2686_v28, %v2686_v28  ;;  %v2751_v21 = vpack.c.bf16 %v2687_v35, %v2687_v35  ;;  %v2876_v54 = vunpack.c.l.b16 %v2748_v59 }
 0x435   : > { %v2323_v3 = vmax.f32 %v2305_v2, %v2307_v32 }
 0x436   : > { %v2877_v25 = vunpack.c.l.b16 %v2749_v31  ;;  %v2878_v37 = vunpack.c.l.b16 %v2750_v56  ;;  %v2879_v19 = vunpack.c.l.b16 %v2751_v21 }
 0x437   : > { %v2385_v20 = vrot.slane %v2323_v3, 2  ;;  %v2386_v50 = vrot.slane %v2323_v3, 4  ;;  %v2387_v34 = vrot.slane %v2323_v3, 6  ;;  %v3562_v12 = vrot.slane %v2323_v3, 9 }
 0x438   : > { %v2989_v63 = vrot.slane %v2877_v25, 7  ;;  %v2991_v47 = vrot.slane %v2878_v37, 6  ;;  %v2993_v6 = vrot.slane %v2879_v19, 5 }
 0x439   : > { %v3563_v38 = vrot.slane %v2385_v20, 9  ;;  %v3564_v58 = vrot.slane %v2386_v50, 9  ;;  %v3565_v29 = vrot.slane %v2387_v34, 9  ;;  %v2688_v49 = vmax.f32 %v2323_v3, %v3562_v12 }
 0x43a   : > { %v2990_v7 = vsel %vm2885_vm8, %v2989_v63, %v2876_v54 }
 0x43b   : > { %v2689_v26 = vmax.f32 %v2385_v20, %v3563_v38  ;;  %v2690_v5 = vmax.f32 %v2386_v50, %v3564_v58  ;;  %v2691_v62 = vmax.f32 %v2387_v34, %v3565_v29  ;;  %v2752_v60 = vpack.c.bf16 %v2688_v49, %v2688_v49 }
 0x43c   : > { %v2992_v44 = vsel %vm2888_vm9, %v2991_v47, %v2990_v7 }
 0x43d   : > { %v2753_v52 = vpack.c.bf16 %v2689_v26, %v2689_v26  ;;  %v2754_v45 = vpack.c.bf16 %v2690_v5, %v2690_v5  ;;  %v2755_v4 = vpack.c.bf16 %v2691_v62, %v2691_v62  ;;  %v2880_v0 = vunpack.c.l.b16 %v2752_v60 }
 0x43e   : > { %v2994_v13 = vsel %vm2891_vm10, %v2993_v6, %v2992_v44 }
 0x43f   : > { %v2881_v15 = vunpack.c.l.b16 %v2753_v52  ;;  %v2882_v10 = vunpack.c.l.b16 %v2754_v45  ;;  %v2883_v8 = vunpack.c.l.b16 %v2755_v4  ;;  %v2995_v55 = vrot.slane %v2880_v0, 4 }
 0x441   : > { %v2997_v42 = vrot.slane %v2881_v15, 3  ;;  %v2999_v30 = vrot.slane %v2882_v10, 2  ;;  %v2996_v61 = vsel %vm2894_vm11, %v2995_v55, %v2994_v13  ;;  %v3001_v11 = vrot.slane %v2883_v8, 1 }
 0x443   : > { %v2998_v41 = vsel %vm2897_vm12, %v2997_v42, %v2996_v61 }
 0x444   : > { %v3000_v16 = vsel %vm2900_vm13, %v2999_v30, %v2998_v41 }
 0x445   : > { %v3002_v51 = vsel %vm2903_vm14, %v3001_v11, %v3000_v16 }
 0x446   : > { %v3010_v57 = vpack.c.b16 %v3002_v51, %v3002_v51 }
 0x448   : > { %3026 = vst [vmem:[%s4914_s14 + $0x1c] sm:$0xf] %v3010_v57 }
 0x449   : > { %3787 = shalt.err (!%p3784_p8)
}
 0x44a   : > { %s3832_s10 = smov 64   ;;  %s3833_s11 = smov 4  }
 0x44b   : > { %3677 = dma.vmem_to_hbm [thread:$0]  (%p3902_p5), %s3041_s22, 512, %s3043_s23, %s3028_s12, %s3832_s10, %s3832_s10, %s3833_s11  }
 0x44c PF: > { %p3689_p9 = scmp.ge.s32.totalorder %s3826_s21, 2  ;;  %s3057_s13 = sand.u32 1, %s3814_s18  }
 0x44d   : > { %s3058_s14 = scalar_lea.sflag [#allocation4], %s3057_s13 }
 0x44e   : > { %p3684_p10 = pnand %p3689_p9, %p3906_p6 }
 0x450   : > { %p3685_p11 = pneg %p3684_p10 }
 0x452   : > { %3809 = dma.done.wait (%p3685_p11), %s3058_s14, 512  }
 0x453   : > { %3811 = vsyncadd (%p3685_p11), %s3058_s14, 4294966784  ;;  %p16_p12 = scmp.ge.s32.totalorder %s3889_s24, 4   ;;  %s5540_s18 = smov %s3818_s19 }
 0x454   : > { %s5541_s19 = smov %s3822_s20  ;;  %s5542_s20 = smov %s3900_s27 }
 0x455   : > { %s5543_s21 = smov %s3889_s24  ;;  %18 = sbr.rel (!%p16_p12) target bundleno = 4 (0x4), region = 80 }
 0x45a   :  { %3064 = vsyncpa [#allocation3], 1 }
 0x45b   :  { %3066 = vsyncpa [#allocation3 + $0x1], 1 }
 0x45c   :  { %3067 = vsyncpa [#allocation4], 1 }
 0x45d   :  { %3069 = vsyncpa [#allocation4 + $0x1], 1 }

</bundles_post_ra>
